<compile_context>
chip_gen: v5e
topology: v5e:2x2
jax: 0.10.0
libtpu: 0.0.40
codegen_flags: <defaults>
</compile_context>

<pallas_src>
import numpy as np

import jax
import jax.numpy as jnp
from jax.experimental import pallas as pl
from jax.experimental.pallas import tpu as pltpu  # noqa: F401  (TPU backend)

# ----------------------------- configuration ---------------------------------
B, T = 2, 8          # batch, caption length
E = 32               # embed_size
H = 32               # hidden_size
VOCAB = 128          # vocab_size (128 -> lane-dense score output)
CFEAT = 128          # stand-in for resnet's 2048 feature channels
K = 49               # 7x7 spatial positions (Atten uses Linear(hidden, 49))
KPAD = 64            # spatial positions padded to 64 lanes
JPAD = 64            # attention scoring dim (49) padded to 64 lanes
IMG = 14             # image spatial size; 2x2 stride-2 conv -> 7x7
PPAD = 32            # im2col patch dim 3*2*2=12 padded to 32

# packed-slab column offsets (all 128-lane aligned)
REC_OFF, CONV_OFF, MLP_OFF = 0, 256, 384          # in w32 slab [32, 896]
AWV_OFF, AWG_OFF, AWS_OFF = 512, 640, 768
W32_COLS = 896
WA_OFF, WB_OFF, EMB_OFF = 0, 128, 256             # in w128 slab [128, 384]
W128_COLS = 384
CONVB_ROW, BLSTM_ROW, BMLP_ROW, BA_ROW, BB_ROW, AWH_ROW = 0, 1, 2, 3, 4, 5  # bias slab rows


# ----------------------------- fused Pallas kernel ----------------------------
def fused_forward_kernel(patches_ref, caps_ref, w32_ref, wx_ref, w128_ref, bias_ref, out_ref):
  f32 = jnp.float32

  # ---- static slices of the packed parameter slabs (setup phase, one-time) ----
  wrec = w32_ref[:, REC_OFF:REC_OFF + 5 * H]          # [H, 5H]  = whh | swh (fused)
  conv_w = w32_ref[:, CONV_OFF:CONV_OFF + CFEAT]      # [PPAD, CFEAT] (rows 12.. are zero)
  wmlp = w32_ref[:, MLP_OFF:MLP_OFF + VOCAB]          # [H, VOCAB]
  awv = w32_ref[:, AWV_OFF:AWV_OFF + JPAD]            # [H, JPAD] (cols 49.. zero)
  awg = w32_ref[:, AWG_OFF:AWG_OFF + JPAD]
  aws = w32_ref[:, AWS_OFF:AWS_OFF + JPAD]
  wa = w128_ref[:, WA_OFF:WA_OFF + H]                 # [CFEAT, H]
  wb = w128_ref[:, WB_OFF:WB_OFF + E]                 # [CFEAT, E]
  embed = w128_ref[:, EMB_OFF:EMB_OFF + E]            # [VOCAB, E]
  conv_b = bias_ref[CONVB_ROW:CONVB_ROW + 1, :]       # [1, CFEAT]
  blstm = bias_ref[BLSTM_ROW:BLSTM_ROW + 1, :]        # [1, 4H]
  bmlp = bias_ref[BMLP_ROW:BMLP_ROW + 1, :]           # [1, VOCAB]
  ba = bias_ref[BA_ROW:BA_ROW + 1, :H]                # [1, H]
  bb = bias_ref[BB_ROW:BB_ROW + 1, :E]                # [1, E]
  awh = bias_ref[AWH_ROW:AWH_ROW + 1, :JPAD]          # [1, JPAD] (cols 49.. zero)

  # ---- encoder: conv stem + masked avgpool + affine_a / affine_b --------------
  patches = patches_ref[...]                                            # [B*KPAD, PPAD]
  A2 = jnp.dot(patches, conv_w, preferred_element_type=f32) + conv_b    # [B*KPAD, CFEAT]
  A3 = A2.reshape(B, KPAD, CFEAT)
  k_iota = jax.lax.broadcasted_iota(jnp.int32, (B, KPAD, 1), 1)
  # avgpool over the 49 real spatial positions (rows 49..63 are padding = conv_b)
  a_g = jnp.sum(jnp.where(k_iota < K, A3, 0.0), axis=1) * (1.0 / K)     # [B, CFEAT]

  Vflat = jnp.maximum(jnp.dot(A2, wa, preferred_element_type=f32) + ba, 0.0)   # [B*KPAD, H]
  V3 = Vflat.reshape(B, KPAD, H)
  v_g = jnp.maximum(jnp.dot(a_g, wb, preferred_element_type=f32) + bb, 0.0)    # [B, E]

  # ---- embedding lookup as one-hot @ table (MXU; no XLA gather dispatch) ------
  caps = caps_ref[...]                                                   # [B*T, 1] int32
  vocab_iota = jax.lax.broadcasted_iota(jnp.int32, (B * T, VOCAB), 1)
  onehot = (vocab_iota == caps).astype(f32)                              # [B*T, VOCAB]
  emb2 = jnp.dot(onehot, embed, preferred_element_type=f32)              # [B*T, E]

  # ---- hoisted x-projections: x = [emb ; v_g], fused [wih | swx] --------------
  wx = wx_ref[...]                                                       # [2E, 5H]
  bias5h = jnp.concatenate([blstm, jnp.zeros((1, H), f32)], axis=-1)     # [1, 5H]
  xz = (jnp.dot(emb2, wx[:E, :], preferred_element_type=f32).reshape(B, T, 5 * H)
        + jnp.dot(v_g, wx[E:, :], preferred_element_type=f32)[:, None, :]
        + bias5h[None, :, :])                                            # [B, T, 5H]

  # ---- LSTM recurrence (unrolled): one fused h @ [whh|swh] matmul per step ----
  h = jnp.zeros((B, H), f32)
  c = jnp.zeros((B, H), f32)
  hs, ss = [], []
  for t in range(T):
    pre = xz[:, t, :] + jnp.dot(h, wrec, preferred_element_type=f32)     # [B, 5H]
    sig = jax.nn.sigmoid(pre)            # full-width sigmoid: i | f | (g) | o | sentinel-gate
    g_g = jnp.tanh(pre[:, 2 * H:3 * H])
    c = sig[:, :H] * g_g + sig[:, H:2 * H] * c
    tanh_c = jnp.tanh(c)
    h = sig[:, 3 * H:4 * H] * tanh_c
    ss.append(sig[:, 4 * H:5 * H] * tanh_c)   # sentinel: gate uses h_{t-1} (inside pre), cell_t
    hs.append(h)

  hid3 = jnp.stack(hs, axis=1)                                           # [B, T, H]
  sen3 = jnp.stack(ss, axis=1)                                           # [B, T, H]
  h2 = hid3.reshape(B * T, H)
  s2 = sen3.reshape(B * T, H)

  # ---- adaptive attention (content_v blocked over T: 8 vregs live per chunk) --
  cv = jnp.dot(Vflat, awv, preferred_element_type=f32).reshape(B, KPAD, JPAD)
  cg = jnp.dot(h2, awg, preferred_element_type=f32).reshape(B, T, JPAD)
  zs = []
  for t in range(T):
    content = jnp.tanh(cv + cg[:, t, :][:, None, :])                     # [B, KPAD, JPAD]
    zs.append(jnp.sum(content * awh, axis=-1))                           # [B, KPAD]
  z = jnp.stack(zs, axis=1)                                              # [B, T, KPAD]

  kcol = jax.lax.broadcasted_iota(jnp.int32, (B, T, KPAD), 2)
  z = jnp.where(kcol < K, z, jnp.full_like(z, -1e30))                    # mask padded K cols
  m = jnp.max(z, axis=-1, keepdims=True)
  e = jnp.exp(z - m)
  alpha = e / jnp.sum(e, axis=-1, keepdims=True)                         # [B, T, KPAD]

  c_t = jnp.einsum('btk,bkh->bth', alpha, V3, preferred_element_type=f32)  # [B, T, H]

  content_s = jnp.dot(s2, aws, preferred_element_type=f32).reshape(B, T, JPAD) + cg
  z_ext = jnp.sum(jnp.tanh(content_s) * awh, axis=-1, keepdims=True)     # [B, T, 1]
  m2 = jnp.maximum(m, z_ext)
  e_ext = jnp.exp(z_ext - m2)
  denom2 = jnp.sum(jnp.exp(z - m2), axis=-1, keepdims=True) + e_ext
  beta = e_ext / denom2                                                  # [B, T, 1]

  c_hat = beta * sen3 + (1.0 - beta) * c_t
  scores = (jnp.dot((c_hat + hid3).reshape(B * T, H), wmlp,
                    preferred_element_type=f32) + bmlp).reshape(B, T, VOCAB)

  # ---- single lane-dense output slab: [scores(128) | alpha(49) beta(1) zeros] ----
  alpha_ext = jnp.where(kcol < K, alpha, jnp.where(kcol == K, beta, 0.0))
  alpha128 = jnp.concatenate(
      [alpha_ext, jnp.zeros((B, T, VOCAB - KPAD), f32)], axis=-1)        # [B, T, 128]
  out_ref[...] = jnp.concatenate([scores, alpha128], axis=-1)            # [B, T, 256]


def run_fused_forward(patches, caps, pk):
  return pl.pallas_call(
      fused_forward_kernel,
      out_shape=jax.ShapeDtypeStruct((B, T, 2 * VOCAB), jnp.float32),
      cost_estimate=pl.CostEstimate(flops=4_000_000, transcendentals=72_000,
                                    bytes_accessed=400_000),
  )(patches, caps, pk["w32"], pk["wx"], pk["w128"], pk["bias"])


# ----------------------------- glue (plain JAX / host) -------------------------
def im2col_padded(images):
  """2x2 stride-2 patches: [B, 3, 14, 14] -> [B*KPAD, PPAD]; spatial index = h*7 + w,
  rows K..KPAD-1 and patch cols 12..PPAD-1 zero-padded for lane/sublane density."""
  Bn, C, _, _ = images.shape
  patch = images.reshape(Bn, C, 7, 2, 7, 2)
  patch = jnp.transpose(patch, (0, 2, 4, 1, 3, 5))          # [B, 7, 7, C, 2, 2]
  patch = patch.reshape(Bn, K, C * 4)                        # [B, 49, 12]
  patch = jnp.pad(patch, ((0, 0), (0, KPAD - K), (0, PPAD - C * 4)))
  return patch.reshape(Bn * KPAD, PPAD)


def pack_params(p):
  """Pack the small per-layer parameters into 4 DMA slabs (done once, host-side)."""
  f32 = jnp.float32
  w32 = jnp.zeros((H, W32_COLS), f32)
  w32 = w32.at[:, REC_OFF:REC_OFF + 4 * H].set(p["whh"])
  w32 = w32.at[:, REC_OFF + 4 * H:REC_OFF + 5 * H].set(p["swh"])
  w32 = w32.at[:12, CONV_OFF:CONV_OFF + CFEAT].set(p["conv_w"])
  w32 = w32.at[:, MLP_OFF:MLP_OFF + VOCAB].set(p["wmlp"])
  w32 = w32.at[:, AWV_OFF:AWV_OFF + JPAD].set(p["awv"])
  w32 = w32.at[:, AWG_OFF:AWG_OFF + JPAD].set(p["awg"])
  w32 = w32.at[:, AWS_OFF:AWS_OFF + JPAD].set(p["aws"])

  wx = jnp.concatenate([p["wih"], p["swx"]], axis=1)         # [2E, 5H]

  w128 = jnp.zeros((CFEAT, W128_COLS), f32)
  w128 = w128.at[:, WA_OFF:WA_OFF + H].set(p["wa"])
  w128 = w128.at[:, WB_OFF:WB_OFF + E].set(p["wb"])
  w128 = w128.at[:, EMB_OFF:EMB_OFF + E].set(p["embed"])

  bias = jnp.zeros((8, 128), f32)
  bias = bias.at[CONVB_ROW, :CFEAT].set(p["conv_b"][0])
  bias = bias.at[BLSTM_ROW, :4 * H].set(p["blstm"][0])
  bias = bias.at[BMLP_ROW, :VOCAB].set(p["bmlp"][0])
  bias = bias.at[BA_ROW, :H].set(p["ba"][0])
  bias = bias.at[BB_ROW, :E].set(p["bb"][0])
  bias = bias.at[AWH_ROW, :JPAD].set(p["awh"][0])
  return {"w32": w32, "wx": wx, "w128": w128, "bias": bias}


def encoder2decoder_forward(images, captions, lengths, packed):
  patches = im2col_padded(images)                            # [B*KPAD, PPAD]
  caps = captions.reshape(B * T, 1).astype(jnp.int32)        # gather happens in-kernel

  out = run_fused_forward(patches, caps, packed)             # [B, T, 256]
  scores = out[..., :VOCAB]                                  # [B, T, VOCAB]
  alpha = out[..., VOCAB:VOCAB + K]                          # [B, T, 49]
  beta = out[..., VOCAB + K:VOCAB + K + 1]                   # [B, T, 1]

  # pack_padded_sequence(scores, lengths, batch_first=True) -- host-side index plumbing.
  # (Static Python lengths only; would break under tracing.)
  lengths_np = np.asarray(lengths)
  b_idx, t_idx = [], []
  for t in range(T):
    for bb in range(B):
      if lengths_np[bb] > t:
        b_idx.append(bb)
        t_idx.append(t)
  packed_scores = scores[jnp.array(b_idx), jnp.array(t_idx)]   # [sum(lengths), VOCAB]
  batch_sizes = np.array([(lengths_np > t).sum() for t in range(int(lengths_np.max()))])
  return packed_scores, batch_sizes, scores, alpha, beta


# ----------------------------- pure-JAX reference ------------------------------
def reference_forward(images, captions, params):
  patch = images.reshape(B, 3, 7, 2, 7, 2)
  patch = jnp.transpose(patch, (0, 2, 4, 1, 3, 5)).reshape(B, K, 12)
  A = jnp.einsum('bkc,cf->bkf', patch, params["conv_w"]) + params["conv_b"]
  a_g = jnp.mean(A, axis=1)
  V = jax.nn.relu(jnp.einsum('bkf,fh->bkh', A, params["wa"]) + params["ba"])
  v_g = jax.nn.relu(a_g @ params["wb"] + params["bb"])

  emb = jnp.take(params["embed"], captions, axis=0)
  x = jnp.concatenate([emb, jnp.broadcast_to(v_g[:, None, :], (B, T, E))], axis=2)

  h = jnp.zeros((B, H)); c = jnp.zeros((B, H))
  hs, cs = [], []
  for t in range(T):
    pre = x[:, t, :] @ params["wih"] + h @ params["whh"] + params["blstm"]
    i_g = jax.nn.sigmoid(pre[:, :H]); f_g = jax.nn.sigmoid(pre[:, H:2 * H])
    g_g = jnp.tanh(pre[:, 2 * H:3 * H]); o_g = jax.nn.sigmoid(pre[:, 3 * H:])
    c = f_g * c + i_g * g_g
    h = o_g * jnp.tanh(c)
    hs.append(h); cs.append(c)
  hiddens = jnp.stack(hs, axis=1); cells = jnp.stack(cs, axis=1)

  h0 = jnp.zeros((B, 1, H), jnp.float32)
  hprev = jnp.concatenate([h0, hiddens[:, :-1, :]], axis=1)
  gate = jax.nn.sigmoid(x @ params["swx"] + hprev @ params["swh"])
  s = gate * jnp.tanh(cells)

  awv = params["awv"][:, :K]; awg = params["awg"][:, :K]; aws = params["aws"][:, :K]
  whv = params["awh"][0, :K]
  cv = jnp.einsum('bkh,hj->bkj', V, awv)
  cg = jnp.einsum('bth,hj->btj', hiddens, awg)
  content_v = cv[:, None, :, :] + cg[:, :, None, :]
  z = jnp.sum(jnp.tanh(content_v) * whv, axis=-1)
  alpha = jax.nn.softmax(z, axis=-1)
  c_t = jnp.einsum('btk,bkh->bth', alpha, V)

  content_s = jnp.einsum('bth,hj->btj', s, aws) + cg
  z_ext = jnp.sum(jnp.tanh(content_s) * whv, axis=-1, keepdims=True)
  extended = jnp.concatenate([z, z_ext], axis=-1)
  alpha_hat = jax.nn.softmax(extended, axis=-1)
  beta = alpha_hat[:, :, -1:]

  c_hat = beta * s + (1.0 - beta) * c_t
  scores = (c_hat + hiddens) @ params["wmlp"] + params["bmlp"]
  return scores, alpha, beta


# ----------------------------- parameters & main -------------------------------
def make_params(key):
  ks = jax.random.split(key, 16)
  init = lambda k, shape: 0.1 * jax.random.normal(k, shape, jnp.float32)
  pad_cols = lambda w: jnp.pad(w, ((0, 0), (0, JPAD - K)))   # zero-pad attention dim 49 -> 64
  return {
      # conv stem (stand-in for resnet152 conv backbone)
      "conv_w": init(ks[0], (12, CFEAT)), "conv_b": jnp.zeros((1, CFEAT), jnp.float32),
      # AttentiveCNN affines
      "wa": init(ks[1], (CFEAT, H)), "ba": jnp.zeros((1, H), jnp.float32),
      "wb": init(ks[2], (CFEAT, E)), "bb": jnp.zeros((1, E), jnp.float32),
      # decoder embedding + LSTM (fused gate layout [i|f|g|o], b = b_ih + b_hh)
      "embed": init(ks[3], (VOCAB, E)),
      "wih": init(ks[4], (2 * E, 4 * H)),
      "whh": init(ks[5], (H, 4 * H)),
      "blstm": jnp.zeros((1, 4 * H), jnp.float32),
      # Sentinel
      "swx": init(ks[6], (2 * E, H)),
      "swh": init(ks[7], (H, H)),
      # Atten (columns K..JPAD-1 zero so padded lanes contribute nothing)
      "awv": pad_cols(init(ks[8], (H, K))),
      "awg": pad_cols(init(ks[9], (H, K))),
      "aws": pad_cols(init(ks[10], (H, K))),
      "awh": pad_cols(init(ks[11], (1, K))),
      # final MLP
      "wmlp": init(ks[12], (H, VOCAB)), "bmlp": jnp.zeros((1, VOCAB), jnp.float32),
  }


if __name__ == "__main__":
  key = jax.random.PRNGKey(0)
  k_par, k_img, k_cap = jax.random.split(key, 3)

  params = make_params(k_par)
  packed = pack_params(params)                               # packed once, reused per call
  images = jax.random.normal(k_img, (B, 3, IMG, IMG), jnp.float32)
  captions = jax.random.randint(k_cap, (B, T), 0, VOCAB, dtype=jnp.int32)
  lengths = [T, T - 2]   # sorted descending, as pack_padded_sequence requires

  packed_scores, batch_sizes, scores, alpha, beta = encoder2decoder_forward(
      images, captions, lengths, packed)
  jax.block_until_ready((packed_scores, scores, alpha, beta))

  # sanity-check against a pure-JAX reference of the same forward
  ref_scores, ref_alpha, ref_beta = reference_forward(images, captions, params)
  np.testing.assert_allclose(np.asarray(scores), np.asarray(ref_scores), rtol=1e-2, atol=1e-2)
  np.testing.assert_allclose(np.asarray(alpha), np.asarray(ref_alpha), rtol=1e-2, atol=1e-2)
  np.testing.assert_allclose(np.asarray(beta), np.asarray(ref_beta), rtol=1e-2, atol=1e-2)
  assert packed_scores.shape == (sum(lengths), VOCAB)

  print("KERNEL_OK")
</pallas_src>

<mosaic_0001>
module attributes {stable_mosaic.version = 11 : i64} {
  func.func @fused_forward_kernel(%arg0: memref<128x32xf32, #tpu.memory_space<vmem>>, %arg1: memref<16x1xi32, #tpu.memory_space<vmem>>, %arg2: memref<32x896xf32, #tpu.memory_space<vmem>>, %arg3: memref<64x160xf32, #tpu.memory_space<vmem>>, %arg4: memref<128x384xf32, #tpu.memory_space<vmem>>, %arg5: memref<8x128xf32, #tpu.memory_space<vmem>>, %arg6: memref<2x8x256xf32, #tpu.memory_space<vmem>>) attributes {dimension_semantics = [], scalar_prefetch = 0 : i64, scratch_operands = 0 : i64, tpu.core_type = #tpu.core_type<tc>} {
    %c0 = arith.constant 0 : index
    %c0_0 = arith.constant 0 : index
    %0 = vector.load %arg2[%c0, %c0_0] : memref<32x896xf32, #tpu.memory_space<vmem>>, vector<32x160xf32>
    %c0_1 = arith.constant 0 : index
    %c256 = arith.constant 256 : index
    %1 = vector.load %arg2[%c0_1, %c256] : memref<32x896xf32, #tpu.memory_space<vmem>>, vector<32x128xf32>
    %c0_2 = arith.constant 0 : index
    %c384 = arith.constant 384 : index
    %2 = vector.load %arg2[%c0_2, %c384] : memref<32x896xf32, #tpu.memory_space<vmem>>, vector<32x128xf32>
    %c0_3 = arith.constant 0 : index
    %c512 = arith.constant 512 : index
    %3 = vector.load %arg2[%c0_3, %c512] : memref<32x896xf32, #tpu.memory_space<vmem>>, vector<32x64xf32>
    %c0_4 = arith.constant 0 : index
    %c640 = arith.constant 640 : index
    %4 = vector.load %arg2[%c0_4, %c640] : memref<32x896xf32, #tpu.memory_space<vmem>>, vector<32x64xf32>
    %c0_5 = arith.constant 0 : index
    %c768 = arith.constant 768 : index
    %5 = vector.load %arg2[%c0_5, %c768] : memref<32x896xf32, #tpu.memory_space<vmem>>, vector<32x64xf32>
    %c0_6 = arith.constant 0 : index
    %c0_7 = arith.constant 0 : index
    %6 = vector.load %arg4[%c0_6, %c0_7] : memref<128x384xf32, #tpu.memory_space<vmem>>, vector<128x32xf32>
    %c0_8 = arith.constant 0 : index
    %c128 = arith.constant 128 : index
    %7 = vector.load %arg4[%c0_8, %c128] : memref<128x384xf32, #tpu.memory_space<vmem>>, vector<128x32xf32>
    %c0_9 = arith.constant 0 : index
    %c256_10 = arith.constant 256 : index
    %8 = vector.load %arg4[%c0_9, %c256_10] : memref<128x384xf32, #tpu.memory_space<vmem>>, vector<128x32xf32>
    %c0_11 = arith.constant 0 : index
    %c0_12 = arith.constant 0 : index
    %9 = vector.load %arg5[%c0_11, %c0_12] : memref<8x128xf32, #tpu.memory_space<vmem>>, vector<1x128xf32>
    %c1 = arith.constant 1 : index
    %c0_13 = arith.constant 0 : index
    %10 = vector.load %arg5[%c1, %c0_13] : memref<8x128xf32, #tpu.memory_space<vmem>>, vector<1x128xf32>
    %c2 = arith.constant 2 : index
    %c0_14 = arith.constant 0 : index
    %11 = vector.load %arg5[%c2, %c0_14] : memref<8x128xf32, #tpu.memory_space<vmem>>, vector<1x128xf32>
    %c3 = arith.constant 3 : index
    %c0_15 = arith.constant 0 : index
    %12 = vector.load %arg5[%c3, %c0_15] : memref<8x128xf32, #tpu.memory_space<vmem>>, vector<1x32xf32>
    %c4 = arith.constant 4 : index
    %c0_16 = arith.constant 0 : index
    %13 = vector.load %arg5[%c4, %c0_16] : memref<8x128xf32, #tpu.memory_space<vmem>>, vector<1x32xf32>
    %c5 = arith.constant 5 : index
    %c0_17 = arith.constant 0 : index
    %14 = vector.load %arg5[%c5, %c0_17] : memref<8x128xf32, #tpu.memory_space<vmem>>, vector<1x64xf32>
    %c0_18 = arith.constant 0 : index
    %c0_19 = arith.constant 0 : index
    %15 = vector.load %arg0[%c0_18, %c0_19] : memref<128x32xf32, #tpu.memory_space<vmem>>, vector<128x32xf32>
    %cst = arith.constant dense<0.000000e+00> : vector<128x128xf32>
    %16 = tpu.matmul %15, %1, %cst {dimension_numbers = #tpu.dot_dimension_numbers<[1], [0], [0], [1], [0, 0, 1, 1], [], []>} : vector<128x32xf32>, vector<32x128xf32>, vector<128x128xf32> -> vector<128x128xf32>
    %17 = vector.broadcast %9 : vector<1x128xf32> to vector<128x128xf32>
    %18 = arith.addf %16, %17 : vector<128x128xf32>
    %19 = vector.shape_cast %18 : vector<128x128xf32> to vector<2x64x128xf32>
    %20 = tpu.iota {dimensions = array<i32: 1>} : vector<2x64x1xi32>
    %c49_i32 = arith.constant 49 : i32
    %21 = vector.broadcast %c49_i32 : i32 to vector<2x64x1xi32>
    %22 = arith.cmpi slt, %20, %21 : vector<2x64x1xi32>
    %cst_20 = arith.constant 0.000000e+00 : f32
    %23 = vector.shape_cast %22 : vector<2x64x1xi1> to vector<2x64x1xi1>
    %24 = vector.broadcast %23 : vector<2x64x1xi1> to vector<2x64x128xi1>
    %25 = vector.broadcast %cst_20 : f32 to vector<2x64x128xf32>
    %26 = arith.select %24, %19, %25 : vector<2x64x128xi1>, vector<2x64x128xf32>
    %cst_21 = arith.constant dense<0.000000e+00> : vector<2x128xf32>
    %27 = vector.multi_reduction <add>, %26, %cst_21 [1] : vector<2x64x128xf32> to vector<2x128xf32>
    %cst_22 = arith.constant 0.0204081628 : f32
    %28 = vector.broadcast %cst_22 : f32 to vector<2x128xf32>
    %29 = arith.mulf %27, %28 : vector<2x128xf32>
    %cst_23 = arith.constant dense<0.000000e+00> : vector<128x32xf32>
    %30 = tpu.matmul %18, %6, %cst_23 {dimension_numbers = #tpu.dot_dimension_numbers<[1], [0], [0], [1], [0, 0, 1, 1], [], []>} : vector<128x128xf32>, vector<128x32xf32>, vector<128x32xf32> -> vector<128x32xf32>
    %31 = vector.broadcast %12 : vector<1x32xf32> to vector<128x32xf32>
    %32 = arith.addf %30, %31 : vector<128x32xf32>
    %cst_24 = arith.constant 0.000000e+00 : f32
    %33 = vector.broadcast %cst_24 : f32 to vector<128x32xf32>
    %34 = arith.maximumf %32, %33 : vector<128x32xf32>
    %35 = vector.shape_cast %34 : vector<128x32xf32> to vector<2x64x32xf32>
    %cst_25 = arith.constant dense<0.000000e+00> : vector<2x32xf32>
    %36 = tpu.matmul %29, %7, %cst_25 {dimension_numbers = #tpu.dot_dimension_numbers<[1], [0], [0], [1], [0, 0, 1, 1], [], []>} : vector<2x128xf32>, vector<128x32xf32>, vector<2x32xf32> -> vector<2x32xf32>
    %37 = vector.broadcast %13 : vector<1x32xf32> to vector<2x32xf32>
    %38 = arith.addf %36, %37 : vector<2x32xf32>
    %cst_26 = arith.constant 0.000000e+00 : f32
    %39 = vector.broadcast %cst_26 : f32 to vector<2x32xf32>
    %40 = arith.maximumf %38, %39 : vector<2x32xf32>
    %c0_27 = arith.constant 0 : index
    %c0_28 = arith.constant 0 : index
    %41 = vector.load %arg1[%c0_27, %c0_28] : memref<16x1xi32, #tpu.memory_space<vmem>>, vector<16x1xi32>
    %42 = tpu.iota {dimensions = array<i32: 1>} : vector<16x128xi32>
    %43 = vector.broadcast %41 : vector<16x1xi32> to vector<16x128xi32>
    %44 = arith.cmpi eq, %42, %43 : vector<16x128xi32>
    %45 = arith.extui %44 : vector<16x128xi1> to vector<16x128xi32>
    %46 = arith.sitofp %45 : vector<16x128xi32> to vector<16x128xf32>
    %cst_29 = arith.constant dense<0.000000e+00> : vector<16x32xf32>
    %47 = tpu.matmul %46, %8, %cst_29 {dimension_numbers = #tpu.dot_dimension_numbers<[1], [0], [0], [1], [0, 0, 1, 1], [], []>} : vector<16x128xf32>, vector<128x32xf32>, vector<16x32xf32> -> vector<16x32xf32>
    %c0_30 = arith.constant 0 : index
    %c0_31 = arith.constant 0 : index
    %48 = vector.load %arg3[%c0_30, %c0_31] : memref<64x160xf32, #tpu.memory_space<vmem>>, vector<64x160xf32>
    %cst_32 = arith.constant 0.000000e+00 : f32
    %49 = vector.broadcast %cst_32 : f32 to vector<1x32xf32>
    %50 = tpu.concatenate %10, %49 in 1 : vector<1x128xf32>, vector<1x32xf32> -> vector<1x160xf32>
    %51 = vector.extract_strided_slice %48 {offsets = [0, 0], sizes = [32, 160], strides = [1, 1]} : vector<64x160xf32> to vector<32x160xf32>
    %cst_33 = arith.constant dense<0.000000e+00> : vector<16x160xf32>
    %52 = tpu.matmul %47, %51, %cst_33 {dimension_numbers = #tpu.dot_dimension_numbers<[1], [0], [0], [1], [0, 0, 1, 1], [], []>} : vector<16x32xf32>, vector<32x160xf32>, vector<16x160xf32> -> vector<16x160xf32>
    %53 = vector.shape_cast %52 : vector<16x160xf32> to vector<2x8x160xf32>
    %54 = vector.extract_strided_slice %48 {offsets = [32, 0], sizes = [32, 160], strides = [1, 1]} : vector<64x160xf32> to vector<32x160xf32>
    %cst_34 = arith.constant dense<0.000000e+00> : vector<2x160xf32>
    %55 = tpu.matmul %40, %54, %cst_34 {dimension_numbers = #tpu.dot_dimension_numbers<[1], [0], [0], [1], [0, 0, 1, 1], [], []>} : vector<2x32xf32>, vector<32x160xf32>, vector<2x160xf32> -> vector<2x160xf32>
    %56 = vector.shape_cast %55 : vector<2x160xf32> to vector<2x1x160xf32>
    %57 = vector.broadcast %56 : vector<2x1x160xf32> to vector<2x8x160xf32>
    %58 = arith.addf %53, %57 : vector<2x8x160xf32>
    %59 = vector.shape_cast %50 : vector<1x160xf32> to vector<1x1x160xf32>
    %60 = vector.broadcast %59 : vector<1x1x160xf32> to vector<2x8x160xf32>
    %61 = arith.addf %58, %60 : vector<2x8x160xf32>
    %cst_35 = arith.constant 0.000000e+00 : f32
    %62 = vector.broadcast %cst_35 : f32 to vector<2x32xf32>
    %cst_36 = arith.constant 0.000000e+00 : f32
    %63 = vector.broadcast %cst_36 : f32 to vector<2x32xf32>
    %64 = vector.extract_strided_slice %61 {offsets = [0, 0, 0], sizes = [2, 1, 160], strides = [1, 1, 1]} : vector<2x8x160xf32> to vector<2x1x160xf32>
    %65 = vector.shape_cast %64 : vector<2x1x160xf32> to vector<2x160xf32>
    %cst_37 = arith.constant dense<0.000000e+00> : vector<2x160xf32>
    %66 = tpu.matmul %62, %0, %cst_37 {dimension_numbers = #tpu.dot_dimension_numbers<[1], [0], [0], [1], [0, 0, 1, 1], [], []>} : vector<2x32xf32>, vector<32x160xf32>, vector<2x160xf32> -> vector<2x160xf32>
    %67 = arith.addf %65, %66 : vector<2x160xf32>
    %68 = arith.negf %67 : vector<2x160xf32>
    %69 = math.exp %68 : vector<2x160xf32>
    %cst_38 = arith.constant 1.000000e+00 : f32
    %70 = vector.broadcast %cst_38 : f32 to vector<2x160xf32>
    %71 = arith.addf %70, %69 : vector<2x160xf32>
    %72 = arith.divf %70, %71 : vector<2x160xf32>
    %73 = vector.extract_strided_slice %67 {offsets = [0, 64], sizes = [2, 32], strides = [1, 1]} : vector<2x160xf32> to vector<2x32xf32>
    %74 = math.tanh %73 : vector<2x32xf32>
    %75 = vector.extract_strided_slice %72 {offsets = [0, 0], sizes = [2, 32], strides = [1, 1]} : vector<2x160xf32> to vector<2x32xf32>
    %76 = arith.mulf %75, %74 : vector<2x32xf32>
    %77 = vector.extract_strided_slice %72 {offsets = [0, 32], sizes = [2, 32], strides = [1, 1]} : vector<2x160xf32> to vector<2x32xf32>
    %78 = arith.mulf %77, %63 : vector<2x32xf32>
    %79 = arith.addf %76, %78 : vector<2x32xf32>
    %80 = math.tanh %79 : vector<2x32xf32>
    %81 = vector.extract_strided_slice %72 {offsets = [0, 96], sizes = [2, 32], strides = [1, 1]} : vector<2x160xf32> to vector<2x32xf32>
    %82 = arith.mulf %81, %80 : vector<2x32xf32>
    %83 = vector.extract_strided_slice %72 {offsets = [0, 128], sizes = [2, 32], strides = [1, 1]} : vector<2x160xf32> to vector<2x32xf32>
    %84 = arith.mulf %83, %80 : vector<2x32xf32>
    %85 = vector.extract_strided_slice %61 {offsets = [0, 1, 0], sizes = [2, 1, 160], strides = [1, 1, 1]} : vector<2x8x160xf32> to vector<2x1x160xf32>
    %86 = vector.shape_cast %85 : vector<2x1x160xf32> to vector<2x160xf32>
    %cst_39 = arith.constant dense<0.000000e+00> : vector<2x160xf32>
    %87 = tpu.matmul %82, %0, %cst_39 {dimension_numbers = #tpu.dot_dimension_numbers<[1], [0], [0], [1], [0, 0, 1, 1], [], []>} : vector<2x32xf32>, vector<32x160xf32>, vector<2x160xf32> -> vector<2x160xf32>
    %88 = arith.addf %86, %87 : vector<2x160xf32>
    %89 = arith.negf %88 : vector<2x160xf32>
    %90 = math.exp %89 : vector<2x160xf32>
    %cst_40 = arith.constant 1.000000e+00 : f32
    %91 = vector.broadcast %cst_40 : f32 to vector<2x160xf32>
    %92 = arith.addf %91, %90 : vector<2x160xf32>
    %93 = arith.divf %91, %92 : vector<2x160xf32>
    %94 = vector.extract_strided_slice %88 {offsets = [0, 64], sizes = [2, 32], strides = [1, 1]} : vector<2x160xf32> to vector<2x32xf32>
    %95 = math.tanh %94 : vector<2x32xf32>
    %96 = vector.extract_strided_slice %93 {offsets = [0, 0], sizes = [2, 32], strides = [1, 1]} : vector<2x160xf32> to vector<2x32xf32>
    %97 = arith.mulf %96, %95 : vector<2x32xf32>
    %98 = vector.extract_strided_slice %93 {offsets = [0, 32], sizes = [2, 32], strides = [1, 1]} : vector<2x160xf32> to vector<2x32xf32>
    %99 = arith.mulf %98, %79 : vector<2x32xf32>
    %100 = arith.addf %97, %99 : vector<2x32xf32>
    %101 = math.tanh %100 : vector<2x32xf32>
    %102 = vector.extract_strided_slice %93 {offsets = [0, 96], sizes = [2, 32], strides = [1, 1]} : vector<2x160xf32> to vector<2x32xf32>
    %103 = arith.mulf %102, %101 : vector<2x32xf32>
    %104 = vector.extract_strided_slice %93 {offsets = [0, 128], sizes = [2, 32], strides = [1, 1]} : vector<2x160xf32> to vector<2x32xf32>
    %105 = arith.mulf %104, %101 : vector<2x32xf32>
    %106 = vector.extract_strided_slice %61 {offsets = [0, 2, 0], sizes = [2, 1, 160], strides = [1, 1, 1]} : vector<2x8x160xf32> to vector<2x1x160xf32>
    %107 = vector.shape_cast %106 : vector<2x1x160xf32> to vector<2x160xf32>
    %cst_41 = arith.constant dense<0.000000e+00> : vector<2x160xf32>
    %108 = tpu.matmul %103, %0, %cst_41 {dimension_numbers = #tpu.dot_dimension_numbers<[1], [0], [0], [1], [0, 0, 1, 1], [], []>} : vector<2x32xf32>, vector<32x160xf32>, vector<2x160xf32> -> vector<2x160xf32>
    %109 = arith.addf %107, %108 : vector<2x160xf32>
    %110 = arith.negf %109 : vector<2x160xf32>
    %111 = math.exp %110 : vector<2x160xf32>
    %cst_42 = arith.constant 1.000000e+00 : f32
    %112 = vector.broadcast %cst_42 : f32 to vector<2x160xf32>
    %113 = arith.addf %112, %111 : vector<2x160xf32>
    %114 = arith.divf %112, %113 : vector<2x160xf32>
    %115 = vector.extract_strided_slice %109 {offsets = [0, 64], sizes = [2, 32], strides = [1, 1]} : vector<2x160xf32> to vector<2x32xf32>
    %116 = math.tanh %115 : vector<2x32xf32>
    %117 = vector.extract_strided_slice %114 {offsets = [0, 0], sizes = [2, 32], strides = [1, 1]} : vector<2x160xf32> to vector<2x32xf32>
    %118 = arith.mulf %117, %116 : vector<2x32xf32>
    %119 = vector.extract_strided_slice %114 {offsets = [0, 32], sizes = [2, 32], strides = [1, 1]} : vector<2x160xf32> to vector<2x32xf32>
    %120 = arith.mulf %119, %100 : vector<2x32xf32>
    %121 = arith.addf %118, %120 : vector<2x32xf32>
    %122 = math.tanh %121 : vector<2x32xf32>
    %123 = vector.extract_strided_slice %114 {offsets = [0, 96], sizes = [2, 32], strides = [1, 1]} : vector<2x160xf32> to vector<2x32xf32>
    %124 = arith.mulf %123, %122 : vector<2x32xf32>
    %125 = vector.extract_strided_slice %114 {offsets = [0, 128], sizes = [2, 32], strides = [1, 1]} : vector<2x160xf32> to vector<2x32xf32>
    %126 = arith.mulf %125, %122 : vector<2x32xf32>
    %127 = vector.extract_strided_slice %61 {offsets = [0, 3, 0], sizes = [2, 1, 160], strides = [1, 1, 1]} : vector<2x8x160xf32> to vector<2x1x160xf32>
    %128 = vector.shape_cast %127 : vector<2x1x160xf32> to vector<2x160xf32>
    %cst_43 = arith.constant dense<0.000000e+00> : vector<2x160xf32>
    %129 = tpu.matmul %124, %0, %cst_43 {dimension_numbers = #tpu.dot_dimension_numbers<[1], [0], [0], [1], [0, 0, 1, 1], [], []>} : vector<2x32xf32>, vector<32x160xf32>, vector<2x160xf32> -> vector<2x160xf32>
    %130 = arith.addf %128, %129 : vector<2x160xf32>
    %131 = arith.negf %130 : vector<2x160xf32>
    %132 = math.exp %131 : vector<2x160xf32>
    %cst_44 = arith.constant 1.000000e+00 : f32
    %133 = vector.broadcast %cst_44 : f32 to vector<2x160xf32>
    %134 = arith.addf %133, %132 : vector<2x160xf32>
    %135 = arith.divf %133, %134 : vector<2x160xf32>
    %136 = vector.extract_strided_slice %130 {offsets = [0, 64], sizes = [2, 32], strides = [1, 1]} : vector<2x160xf32> to vector<2x32xf32>
    %137 = math.tanh %136 : vector<2x32xf32>
    %138 = vector.extract_strided_slice %135 {offsets = [0, 0], sizes = [2, 32], strides = [1, 1]} : vector<2x160xf32> to vector<2x32xf32>
    %139 = arith.mulf %138, %137 : vector<2x32xf32>
    %140 = vector.extract_strided_slice %135 {offsets = [0, 32], sizes = [2, 32], strides = [1, 1]} : vector<2x160xf32> to vector<2x32xf32>
    %141 = arith.mulf %140, %121 : vector<2x32xf32>
    %142 = arith.addf %139, %141 : vector<2x32xf32>
    %143 = math.tanh %142 : vector<2x32xf32>
    %144 = vector.extract_strided_slice %135 {offsets = [0, 96], sizes = [2, 32], strides = [1, 1]} : vector<2x160xf32> to vector<2x32xf32>
    %145 = arith.mulf %144, %143 : vector<2x32xf32>
    %146 = vector.extract_strided_slice %135 {offsets = [0, 128], sizes = [2, 32], strides = [1, 1]} : vector<2x160xf32> to vector<2x32xf32>
    %147 = arith.mulf %146, %143 : vector<2x32xf32>
    %148 = vector.extract_strided_slice %61 {offsets = [0, 4, 0], sizes = [2, 1, 160], strides = [1, 1, 1]} : vector<2x8x160xf32> to vector<2x1x160xf32>
    %149 = vector.shape_cast %148 : vector<2x1x160xf32> to vector<2x160xf32>
    %cst_45 = arith.constant dense<0.000000e+00> : vector<2x160xf32>
    %150 = tpu.matmul %145, %0, %cst_45 {dimension_numbers = #tpu.dot_dimension_numbers<[1], [0], [0], [1], [0, 0, 1, 1], [], []>} : vector<2x32xf32>, vector<32x160xf32>, vector<2x160xf32> -> vector<2x160xf32>
    %151 = arith.addf %149, %150 : vector<2x160xf32>
    %152 = arith.negf %151 : vector<2x160xf32>
    %153 = math.exp %152 : vector<2x160xf32>
    %cst_46 = arith.constant 1.000000e+00 : f32
    %154 = vector.broadcast %cst_46 : f32 to vector<2x160xf32>
    %155 = arith.addf %154, %153 : vector<2x160xf32>
    %156 = arith.divf %154, %155 : vector<2x160xf32>
    %157 = vector.extract_strided_slice %151 {offsets = [0, 64], sizes = [2, 32], strides = [1, 1]} : vector<2x160xf32> to vector<2x32xf32>
    %158 = math.tanh %157 : vector<2x32xf32>
    %159 = vector.extract_strided_slice %156 {offsets = [0, 0], sizes = [2, 32], strides = [1, 1]} : vector<2x160xf32> to vector<2x32xf32>
    %160 = arith.mulf %159, %158 : vector<2x32xf32>
    %161 = vector.extract_strided_slice %156 {offsets = [0, 32], sizes = [2, 32], strides = [1, 1]} : vector<2x160xf32> to vector<2x32xf32>
    %162 = arith.mulf %161, %142 : vector<2x32xf32>
    %163 = arith.addf %160, %162 : vector<2x32xf32>
    %164 = math.tanh %163 : vector<2x32xf32>
    %165 = vector.extract_strided_slice %156 {offsets = [0, 96], sizes = [2, 32], strides = [1, 1]} : vector<2x160xf32> to vector<2x32xf32>
    %166 = arith.mulf %165, %164 : vector<2x32xf32>
    %167 = vector.extract_strided_slice %156 {offsets = [0, 128], sizes = [2, 32], strides = [1, 1]} : vector<2x160xf32> to vector<2x32xf32>
    %168 = arith.mulf %167, %164 : vector<2x32xf32>
    %169 = vector.extract_strided_slice %61 {offsets = [0, 5, 0], sizes = [2, 1, 160], strides = [1, 1, 1]} : vector<2x8x160xf32> to vector<2x1x160xf32>
    %170 = vector.shape_cast %169 : vector<2x1x160xf32> to vector<2x160xf32>
    %cst_47 = arith.constant dense<0.000000e+00> : vector<2x160xf32>
    %171 = tpu.matmul %166, %0, %cst_47 {dimension_numbers = #tpu.dot_dimension_numbers<[1], [0], [0], [1], [0, 0, 1, 1], [], []>} : vector<2x32xf32>, vector<32x160xf32>, vector<2x160xf32> -> vector<2x160xf32>
    %172 = arith.addf %170, %171 : vector<2x160xf32>
    %173 = arith.negf %172 : vector<2x160xf32>
    %174 = math.exp %173 : vector<2x160xf32>
    %cst_48 = arith.constant 1.000000e+00 : f32
    %175 = vector.broadcast %cst_48 : f32 to vector<2x160xf32>
    %176 = arith.addf %175, %174 : vector<2x160xf32>
    %177 = arith.divf %175, %176 : vector<2x160xf32>
    %178 = vector.extract_strided_slice %172 {offsets = [0, 64], sizes = [2, 32], strides = [1, 1]} : vector<2x160xf32> to vector<2x32xf32>
    %179 = math.tanh %178 : vector<2x32xf32>
    %180 = vector.extract_strided_slice %177 {offsets = [0, 0], sizes = [2, 32], strides = [1, 1]} : vector<2x160xf32> to vector<2x32xf32>
    %181 = arith.mulf %180, %179 : vector<2x32xf32>
    %182 = vector.extract_strided_slice %177 {offsets = [0, 32], sizes = [2, 32], strides = [1, 1]} : vector<2x160xf32> to vector<2x32xf32>
    %183 = arith.mulf %182, %163 : vector<2x32xf32>
    %184 = arith.addf %181, %183 : vector<2x32xf32>
    %185 = math.tanh %184 : vector<2x32xf32>
    %186 = vector.extract_strided_slice %177 {offsets = [0, 96], sizes = [2, 32], strides = [1, 1]} : vector<2x160xf32> to vector<2x32xf32>
    %187 = arith.mulf %186, %185 : vector<2x32xf32>
    %188 = vector.extract_strided_slice %177 {offsets = [0, 128], sizes = [2, 32], strides = [1, 1]} : vector<2x160xf32> to vector<2x32xf32>
    %189 = arith.mulf %188, %185 : vector<2x32xf32>
    %190 = vector.extract_strided_slice %61 {offsets = [0, 6, 0], sizes = [2, 1, 160], strides = [1, 1, 1]} : vector<2x8x160xf32> to vector<2x1x160xf32>
    %191 = vector.shape_cast %190 : vector<2x1x160xf32> to vector<2x160xf32>
    %cst_49 = arith.constant dense<0.000000e+00> : vector<2x160xf32>
    %192 = tpu.matmul %187, %0, %cst_49 {dimension_numbers = #tpu.dot_dimension_numbers<[1], [0], [0], [1], [0, 0, 1, 1], [], []>} : vector<2x32xf32>, vector<32x160xf32>, vector<2x160xf32> -> vector<2x160xf32>
    %193 = arith.addf %191, %192 : vector<2x160xf32>
    %194 = arith.negf %193 : vector<2x160xf32>
    %195 = math.exp %194 : vector<2x160xf32>
    %cst_50 = arith.constant 1.000000e+00 : f32
    %196 = vector.broadcast %cst_50 : f32 to vector<2x160xf32>
    %197 = arith.addf %196, %195 : vector<2x160xf32>
    %198 = arith.divf %196, %197 : vector<2x160xf32>
    %199 = vector.extract_strided_slice %193 {offsets = [0, 64], sizes = [2, 32], strides = [1, 1]} : vector<2x160xf32> to vector<2x32xf32>
    %200 = math.tanh %199 : vector<2x32xf32>
    %201 = vector.extract_strided_slice %198 {offsets = [0, 0], sizes = [2, 32], strides = [1, 1]} : vector<2x160xf32> to vector<2x32xf32>
    %202 = arith.mulf %201, %200 : vector<2x32xf32>
    %203 = vector.extract_strided_slice %198 {offsets = [0, 32], sizes = [2, 32], strides = [1, 1]} : vector<2x160xf32> to vector<2x32xf32>
    %204 = arith.mulf %203, %184 : vector<2x32xf32>
    %205 = arith.addf %202, %204 : vector<2x32xf32>
    %206 = math.tanh %205 : vector<2x32xf32>
    %207 = vector.extract_strided_slice %198 {offsets = [0, 96], sizes = [2, 32], strides = [1, 1]} : vector<2x160xf32> to vector<2x32xf32>
    %208 = arith.mulf %207, %206 : vector<2x32xf32>
    %209 = vector.extract_strided_slice %198 {offsets = [0, 128], sizes = [2, 32], strides = [1, 1]} : vector<2x160xf32> to vector<2x32xf32>
    %210 = arith.mulf %209, %206 : vector<2x32xf32>
    %211 = vector.extract_strided_slice %61 {offsets = [0, 7, 0], sizes = [2, 1, 160], strides = [1, 1, 1]} : vector<2x8x160xf32> to vector<2x1x160xf32>
    %212 = vector.shape_cast %211 : vector<2x1x160xf32> to vector<2x160xf32>
    %cst_51 = arith.constant dense<0.000000e+00> : vector<2x160xf32>
    %213 = tpu.matmul %208, %0, %cst_51 {dimension_numbers = #tpu.dot_dimension_numbers<[1], [0], [0], [1], [0, 0, 1, 1], [], []>} : vector<2x32xf32>, vector<32x160xf32>, vector<2x160xf32> -> vector<2x160xf32>
    %214 = arith.addf %212, %213 : vector<2x160xf32>
    %215 = arith.negf %214 : vector<2x160xf32>
    %216 = math.exp %215 : vector<2x160xf32>
    %cst_52 = arith.constant 1.000000e+00 : f32
    %217 = vector.broadcast %cst_52 : f32 to vector<2x160xf32>
    %218 = arith.addf %217, %216 : vector<2x160xf32>
    %219 = arith.divf %217, %218 : vector<2x160xf32>
    %220 = vector.extract_strided_slice %214 {offsets = [0, 64], sizes = [2, 32], strides = [1, 1]} : vector<2x160xf32> to vector<2x32xf32>
    %221 = math.tanh %220 : vector<2x32xf32>
    %222 = vector.extract_strided_slice %219 {offsets = [0, 0], sizes = [2, 32], strides = [1, 1]} : vector<2x160xf32> to vector<2x32xf32>
    %223 = arith.mulf %222, %221 : vector<2x32xf32>
    %224 = vector.extract_strided_slice %219 {offsets = [0, 32], sizes = [2, 32], strides = [1, 1]} : vector<2x160xf32> to vector<2x32xf32>
    %225 = arith.mulf %224, %205 : vector<2x32xf32>
    %226 = arith.addf %223, %225 : vector<2x32xf32>
    %227 = math.tanh %226 : vector<2x32xf32>
    %228 = vector.extract_strided_slice %219 {offsets = [0, 96], sizes = [2, 32], strides = [1, 1]} : vector<2x160xf32> to vector<2x32xf32>
    %229 = arith.mulf %228, %227 : vector<2x32xf32>
    %230 = vector.extract_strided_slice %219 {offsets = [0, 128], sizes = [2, 32], strides = [1, 1]} : vector<2x160xf32> to vector<2x32xf32>
    %231 = arith.mulf %230, %227 : vector<2x32xf32>
    %232 = vector.shape_cast %82 : vector<2x32xf32> to vector<2x1x32xf32>
    %233 = vector.shape_cast %103 : vector<2x32xf32> to vector<2x1x32xf32>
    %234 = vector.shape_cast %124 : vector<2x32xf32> to vector<2x1x32xf32>
    %235 = vector.shape_cast %145 : vector<2x32xf32> to vector<2x1x32xf32>
    %236 = vector.shape_cast %166 : vector<2x32xf32> to vector<2x1x32xf32>
    %237 = vector.shape_cast %187 : vector<2x32xf32> to vector<2x1x32xf32>
    %238 = vector.shape_cast %208 : vector<2x32xf32> to vector<2x1x32xf32>
    %239 = vector.shape_cast %229 : vector<2x32xf32> to vector<2x1x32xf32>
    %240 = tpu.concatenate %232, %233, %234, %235, %236, %237, %238, %239 in 1 : vector<2x1x32xf32>, vector<2x1x32xf32>, vector<2x1x32xf32>, vector<2x1x32xf32>, vector<2x1x32xf32>, vector<2x1x32xf32>, vector<2x1x32xf32>, vector<2x1x32xf32> -> vector<2x8x32xf32>
    %241 = vector.shape_cast %84 : vector<2x32xf32> to vector<2x1x32xf32>
    %242 = vector.shape_cast %105 : vector<2x32xf32> to vector<2x1x32xf32>
    %243 = vector.shape_cast %126 : vector<2x32xf32> to vector<2x1x32xf32>
    %244 = vector.shape_cast %147 : vector<2x32xf32> to vector<2x1x32xf32>
    %245 = vector.shape_cast %168 : vector<2x32xf32> to vector<2x1x32xf32>
    %246 = vector.shape_cast %189 : vector<2x32xf32> to vector<2x1x32xf32>
    %247 = vector.shape_cast %210 : vector<2x32xf32> to vector<2x1x32xf32>
    %248 = vector.shape_cast %231 : vector<2x32xf32> to vector<2x1x32xf32>
    %249 = tpu.concatenate %241, %242, %243, %244, %245, %246, %247, %248 in 1 : vector<2x1x32xf32>, vector<2x1x32xf32>, vector<2x1x32xf32>, vector<2x1x32xf32>, vector<2x1x32xf32>, vector<2x1x32xf32>, vector<2x1x32xf32>, vector<2x1x32xf32> -> vector<2x8x32xf32>
    %250 = vector.shape_cast %240 : vector<2x8x32xf32> to vector<16x32xf32>
    %251 = vector.shape_cast %249 : vector<2x8x32xf32> to vector<16x32xf32>
    %cst_53 = arith.constant dense<0.000000e+00> : vector<128x64xf32>
    %252 = tpu.matmul %34, %3, %cst_53 {dimension_numbers = #tpu.dot_dimension_numbers<[1], [0], [0], [1], [0, 0, 1, 1], [], []>} : vector<128x32xf32>, vector<32x64xf32>, vector<128x64xf32> -> vector<128x64xf32>
    %253 = vector.shape_cast %252 : vector<128x64xf32> to vector<2x64x64xf32>
    %cst_54 = arith.constant dense<0.000000e+00> : vector<16x64xf32>
    %254 = tpu.matmul %250, %4, %cst_54 {dimension_numbers = #tpu.dot_dimension_numbers<[1], [0], [0], [1], [0, 0, 1, 1], [], []>} : vector<16x32xf32>, vector<32x64xf32>, vector<16x64xf32> -> vector<16x64xf32>
    %255 = vector.shape_cast %254 : vector<16x64xf32> to vector<2x8x64xf32>
    %256 = vector.extract_strided_slice %255 {offsets = [0, 0, 0], sizes = [2, 1, 64], strides = [1, 1, 1]} : vector<2x8x64xf32> to vector<2x1x64xf32>
    %257 = vector.shape_cast %256 : vector<2x1x64xf32> to vector<2x64xf32>
    %258 = vector.shape_cast %257 : vector<2x64xf32> to vector<2x1x64xf32>
    %259 = vector.broadcast %258 : vector<2x1x64xf32> to vector<2x64x64xf32>
    %260 = arith.addf %253, %259 : vector<2x64x64xf32>
    %261 = math.tanh %260 : vector<2x64x64xf32>
    %262 = vector.shape_cast %14 : vector<1x64xf32> to vector<1x1x64xf32>
    %263 = vector.broadcast %262 : vector<1x1x64xf32> to vector<2x64x64xf32>
    %264 = arith.mulf %261, %263 : vector<2x64x64xf32>
    %cst_55 = arith.constant dense<0.000000e+00> : vector<2x64xf32>
    %265 = vector.multi_reduction <add>, %264, %cst_55 [2] : vector<2x64x64xf32> to vector<2x64xf32>
    %266 = vector.extract_strided_slice %255 {offsets = [0, 1, 0], sizes = [2, 1, 64], strides = [1, 1, 1]} : vector<2x8x64xf32> to vector<2x1x64xf32>
    %267 = vector.shape_cast %266 : vector<2x1x64xf32> to vector<2x64xf32>
    %268 = vector.shape_cast %267 : vector<2x64xf32> to vector<2x1x64xf32>
    %269 = vector.broadcast %268 : vector<2x1x64xf32> to vector<2x64x64xf32>
    %270 = arith.addf %253, %269 : vector<2x64x64xf32>
    %271 = math.tanh %270 : vector<2x64x64xf32>
    %272 = vector.shape_cast %14 : vector<1x64xf32> to vector<1x1x64xf32>
    %273 = vector.broadcast %272 : vector<1x1x64xf32> to vector<2x64x64xf32>
    %274 = arith.mulf %271, %273 : vector<2x64x64xf32>
    %cst_56 = arith.constant dense<0.000000e+00> : vector<2x64xf32>
    %275 = vector.multi_reduction <add>, %274, %cst_56 [2] : vector<2x64x64xf32> to vector<2x64xf32>
    %276 = vector.extract_strided_slice %255 {offsets = [0, 2, 0], sizes = [2, 1, 64], strides = [1, 1, 1]} : vector<2x8x64xf32> to vector<2x1x64xf32>
    %277 = vector.shape_cast %276 : vector<2x1x64xf32> to vector<2x64xf32>
    %278 = vector.shape_cast %277 : vector<2x64xf32> to vector<2x1x64xf32>
    %279 = vector.broadcast %278 : vector<2x1x64xf32> to vector<2x64x64xf32>
    %280 = arith.addf %253, %279 : vector<2x64x64xf32>
    %281 = math.tanh %280 : vector<2x64x64xf32>
    %282 = vector.shape_cast %14 : vector<1x64xf32> to vector<1x1x64xf32>
    %283 = vector.broadcast %282 : vector<1x1x64xf32> to vector<2x64x64xf32>
    %284 = arith.mulf %281, %283 : vector<2x64x64xf32>
    %cst_57 = arith.constant dense<0.000000e+00> : vector<2x64xf32>
    %285 = vector.multi_reduction <add>, %284, %cst_57 [2] : vector<2x64x64xf32> to vector<2x64xf32>
    %286 = vector.extract_strided_slice %255 {offsets = [0, 3, 0], sizes = [2, 1, 64], strides = [1, 1, 1]} : vector<2x8x64xf32> to vector<2x1x64xf32>
    %287 = vector.shape_cast %286 : vector<2x1x64xf32> to vector<2x64xf32>
    %288 = vector.shape_cast %287 : vector<2x64xf32> to vector<2x1x64xf32>
    %289 = vector.broadcast %288 : vector<2x1x64xf32> to vector<2x64x64xf32>
    %290 = arith.addf %253, %289 : vector<2x64x64xf32>
    %291 = math.tanh %290 : vector<2x64x64xf32>
    %292 = vector.shape_cast %14 : vector<1x64xf32> to vector<1x1x64xf32>
    %293 = vector.broadcast %292 : vector<1x1x64xf32> to vector<2x64x64xf32>
    %294 = arith.mulf %291, %293 : vector<2x64x64xf32>
    %cst_58 = arith.constant dense<0.000000e+00> : vector<2x64xf32>
    %295 = vector.multi_reduction <add>, %294, %cst_58 [2] : vector<2x64x64xf32> to vector<2x64xf32>
    %296 = vector.extract_strided_slice %255 {offsets = [0, 4, 0], sizes = [2, 1, 64], strides = [1, 1, 1]} : vector<2x8x64xf32> to vector<2x1x64xf32>
    %297 = vector.shape_cast %296 : vector<2x1x64xf32> to vector<2x64xf32>
    %298 = vector.shape_cast %297 : vector<2x64xf32> to vector<2x1x64xf32>
    %299 = vector.broadcast %298 : vector<2x1x64xf32> to vector<2x64x64xf32>
    %300 = arith.addf %253, %299 : vector<2x64x64xf32>
    %301 = math.tanh %300 : vector<2x64x64xf32>
    %302 = vector.shape_cast %14 : vector<1x64xf32> to vector<1x1x64xf32>
    %303 = vector.broadcast %302 : vector<1x1x64xf32> to vector<2x64x64xf32>
    %304 = arith.mulf %301, %303 : vector<2x64x64xf32>
    %cst_59 = arith.constant dense<0.000000e+00> : vector<2x64xf32>
    %305 = vector.multi_reduction <add>, %304, %cst_59 [2] : vector<2x64x64xf32> to vector<2x64xf32>
    %306 = vector.extract_strided_slice %255 {offsets = [0, 5, 0], sizes = [2, 1, 64], strides = [1, 1, 1]} : vector<2x8x64xf32> to vector<2x1x64xf32>
    %307 = vector.shape_cast %306 : vector<2x1x64xf32> to vector<2x64xf32>
    %308 = vector.shape_cast %307 : vector<2x64xf32> to vector<2x1x64xf32>
    %309 = vector.broadcast %308 : vector<2x1x64xf32> to vector<2x64x64xf32>
    %310 = arith.addf %253, %309 : vector<2x64x64xf32>
    %311 = math.tanh %310 : vector<2x64x64xf32>
    %312 = vector.shape_cast %14 : vector<1x64xf32> to vector<1x1x64xf32>
    %313 = vector.broadcast %312 : vector<1x1x64xf32> to vector<2x64x64xf32>
    %314 = arith.mulf %311, %313 : vector<2x64x64xf32>
    %cst_60 = arith.constant dense<0.000000e+00> : vector<2x64xf32>
    %315 = vector.multi_reduction <add>, %314, %cst_60 [2] : vector<2x64x64xf32> to vector<2x64xf32>
    %316 = vector.extract_strided_slice %255 {offsets = [0, 6, 0], sizes = [2, 1, 64], strides = [1, 1, 1]} : vector<2x8x64xf32> to vector<2x1x64xf32>
    %317 = vector.shape_cast %316 : vector<2x1x64xf32> to vector<2x64xf32>
    %318 = vector.shape_cast %317 : vector<2x64xf32> to vector<2x1x64xf32>
    %319 = vector.broadcast %318 : vector<2x1x64xf32> to vector<2x64x64xf32>
    %320 = arith.addf %253, %319 : vector<2x64x64xf32>
    %321 = math.tanh %320 : vector<2x64x64xf32>
    %322 = vector.shape_cast %14 : vector<1x64xf32> to vector<1x1x64xf32>
    %323 = vector.broadcast %322 : vector<1x1x64xf32> to vector<2x64x64xf32>
    %324 = arith.mulf %321, %323 : vector<2x64x64xf32>
    %cst_61 = arith.constant dense<0.000000e+00> : vector<2x64xf32>
    %325 = vector.multi_reduction <add>, %324, %cst_61 [2] : vector<2x64x64xf32> to vector<2x64xf32>
    %326 = vector.extract_strided_slice %255 {offsets = [0, 7, 0], sizes = [2, 1, 64], strides = [1, 1, 1]} : vector<2x8x64xf32> to vector<2x1x64xf32>
    %327 = vector.shape_cast %326 : vector<2x1x64xf32> to vector<2x64xf32>
    %328 = vector.shape_cast %327 : vector<2x64xf32> to vector<2x1x64xf32>
    %329 = vector.broadcast %328 : vector<2x1x64xf32> to vector<2x64x64xf32>
    %330 = arith.addf %253, %329 : vector<2x64x64xf32>
    %331 = math.tanh %330 : vector<2x64x64xf32>
    %332 = vector.shape_cast %14 : vector<1x64xf32> to vector<1x1x64xf32>
    %333 = vector.broadcast %332 : vector<1x1x64xf32> to vector<2x64x64xf32>
    %334 = arith.mulf %331, %333 : vector<2x64x64xf32>
    %cst_62 = arith.constant dense<0.000000e+00> : vector<2x64xf32>
    %335 = vector.multi_reduction <add>, %334, %cst_62 [2] : vector<2x64x64xf32> to vector<2x64xf32>
    %336 = vector.shape_cast %265 : vector<2x64xf32> to vector<2x1x64xf32>
    %337 = vector.shape_cast %275 : vector<2x64xf32> to vector<2x1x64xf32>
    %338 = vector.shape_cast %285 : vector<2x64xf32> to vector<2x1x64xf32>
    %339 = vector.shape_cast %295 : vector<2x64xf32> to vector<2x1x64xf32>
    %340 = vector.shape_cast %305 : vector<2x64xf32> to vector<2x1x64xf32>
    %341 = vector.shape_cast %315 : vector<2x64xf32> to vector<2x1x64xf32>
    %342 = vector.shape_cast %325 : vector<2x64xf32> to vector<2x1x64xf32>
    %343 = vector.shape_cast %335 : vector<2x64xf32> to vector<2x1x64xf32>
    %344 = tpu.concatenate %336, %337, %338, %339, %340, %341, %342, %343 in 1 : vector<2x1x64xf32>, vector<2x1x64xf32>, vector<2x1x64xf32>, vector<2x1x64xf32>, vector<2x1x64xf32>, vector<2x1x64xf32>, vector<2x1x64xf32>, vector<2x1x64xf32> -> vector<2x8x64xf32>
    %345 = tpu.iota {dimensions = array<i32: 2>} : vector<2x8x64xi32>
    %c49_i32_63 = arith.constant 49 : i32
    %346 = vector.broadcast %c49_i32_63 : i32 to vector<2x8x64xi32>
    %347 = arith.cmpi slt, %345, %346 : vector<2x8x64xi32>
    %cst_64 = arith.constant -1.000000e+30 : f32
    %348 = vector.broadcast %cst_64 : f32 to vector<2x8x64xf32>
    %349 = arith.select %347, %344, %348 : vector<2x8x64xi1>, vector<2x8x64xf32>
    %cst_65 = arith.constant dense<0xFF800000> : vector<2x8xf32>
    %350 = vector.multi_reduction <maximumf>, %349, %cst_65 [2] : vector<2x8x64xf32> to vector<2x8xf32>
    %351 = vector.shape_cast %350 : vector<2x8xf32> to vector<2x8x1xf32>
    %352 = vector.broadcast %351 : vector<2x8x1xf32> to vector<2x8x64xf32>
    %353 = arith.subf %349, %352 : vector<2x8x64xf32>
    %354 = math.exp %353 : vector<2x8x64xf32>
    %cst_66 = arith.constant dense<0.000000e+00> : vector<2x8xf32>
    %355 = vector.multi_reduction <add>, %354, %cst_66 [2] : vector<2x8x64xf32> to vector<2x8xf32>
    %356 = vector.shape_cast %355 : vector<2x8xf32> to vector<2x8x1xf32>
    %357 = vector.broadcast %356 : vector<2x8x1xf32> to vector<2x8x64xf32>
    %358 = arith.divf %354, %357 : vector<2x8x64xf32>
    "tpu.trace_start"() <{level = 10 : i32, message = "btk,bkh->bth"}> : () -> ()
    %cst_67 = arith.constant dense<0.000000e+00> : vector<2x8x32xf32>
    %359 = tpu.matmul %358, %35, %cst_67 {dimension_numbers = #tpu.dot_dimension_numbers<[2], [1], [1], [2], [0, 0, 0, 1, 1, 2], [0], [0]>} : vector<2x8x64xf32>, vector<2x64x32xf32>, vector<2x8x32xf32> -> vector<2x8x32xf32>
    "tpu.trace_stop"() : () -> ()
    %cst_68 = arith.constant dense<0.000000e+00> : vector<16x64xf32>
    %360 = tpu.matmul %251, %5, %cst_68 {dimension_numbers = #tpu.dot_dimension_numbers<[1], [0], [0], [1], [0, 0, 1, 1], [], []>} : vector<16x32xf32>, vector<32x64xf32>, vector<16x64xf32> -> vector<16x64xf32>
    %361 = vector.shape_cast %360 : vector<16x64xf32> to vector<2x8x64xf32>
    %362 = arith.addf %361, %255 : vector<2x8x64xf32>
    %363 = math.tanh %362 : vector<2x8x64xf32>
    %364 = vector.shape_cast %14 : vector<1x64xf32> to vector<1x1x64xf32>
    %365 = vector.broadcast %364 : vector<1x1x64xf32> to vector<2x8x64xf32>
    %366 = arith.mulf %363, %365 : vector<2x8x64xf32>
    %cst_69 = arith.constant dense<0.000000e+00> : vector<2x8xf32>
    %367 = vector.multi_reduction <add>, %366, %cst_69 [2] : vector<2x8x64xf32> to vector<2x8xf32>
    %368 = vector.shape_cast %367 : vector<2x8xf32> to vector<2x8x1xf32>
    %369 = arith.maximumf %351, %368 : vector<2x8x1xf32>
    %370 = arith.subf %368, %369 : vector<2x8x1xf32>
    %371 = math.exp %370 : vector<2x8x1xf32>
    %372 = vector.broadcast %369 : vector<2x8x1xf32> to vector<2x8x64xf32>
    %373 = arith.subf %349, %372 : vector<2x8x64xf32>
    %374 = math.exp %373 : vector<2x8x64xf32>
    %cst_70 = arith.constant dense<0.000000e+00> : vector<2x8xf32>
    %375 = vector.multi_reduction <add>, %374, %cst_70 [2] : vector<2x8x64xf32> to vector<2x8xf32>
    %376 = vector.shape_cast %375 : vector<2x8xf32> to vector<2x8x1xf32>
    %377 = arith.addf %376, %371 : vector<2x8x1xf32>
    %378 = arith.divf %371, %377 : vector<2x8x1xf32>
    %379 = vector.broadcast %378 : vector<2x8x1xf32> to vector<2x8x32xf32>
    %380 = arith.mulf %379, %249 : vector<2x8x32xf32>
    %cst_71 = arith.constant 1.000000e+00 : f32
    %381 = vector.broadcast %cst_71 : f32 to vector<2x8x1xf32>
    %382 = arith.subf %381, %378 : vector<2x8x1xf32>
    %383 = vector.broadcast %382 : vector<2x8x1xf32> to vector<2x8x32xf32>
    %384 = arith.mulf %383, %359 : vector<2x8x32xf32>
    %385 = arith.addf %380, %384 : vector<2x8x32xf32>
    %386 = arith.addf %385, %240 : vector<2x8x32xf32>
    %387 = vector.shape_cast %386 : vector<2x8x32xf32> to vector<16x32xf32>
    %cst_72 = arith.constant dense<0.000000e+00> : vector<16x128xf32>
    %388 = tpu.matmul %387, %2, %cst_72 {dimension_numbers = #tpu.dot_dimension_numbers<[1], [0], [0], [1], [0, 0, 1, 1], [], []>} : vector<16x32xf32>, vector<32x128xf32>, vector<16x128xf32> -> vector<16x128xf32>
    %389 = vector.broadcast %11 : vector<1x128xf32> to vector<16x128xf32>
    %390 = arith.addf %388, %389 : vector<16x128xf32>
    %391 = vector.shape_cast %390 : vector<16x128xf32> to vector<2x8x128xf32>
    %c49_i32_73 = arith.constant 49 : i32
    %392 = vector.broadcast %c49_i32_73 : i32 to vector<2x8x64xi32>
    %393 = arith.cmpi slt, %345, %392 : vector<2x8x64xi32>
    %c49_i32_74 = arith.constant 49 : i32
    %394 = vector.broadcast %c49_i32_74 : i32 to vector<2x8x64xi32>
    %395 = arith.cmpi eq, %345, %394 : vector<2x8x64xi32>
    %cst_75 = arith.constant 0.000000e+00 : f32
    %396 = vector.shape_cast %378 : vector<2x8x1xf32> to vector<2x8x1xf32>
    %397 = vector.broadcast %396 : vector<2x8x1xf32> to vector<2x8x64xf32>
    %398 = vector.broadcast %cst_75 : f32 to vector<2x8x64xf32>
    %399 = arith.select %395, %397, %398 : vector<2x8x64xi1>, vector<2x8x64xf32>
    %400 = arith.select %393, %358, %399 : vector<2x8x64xi1>, vector<2x8x64xf32>
    %cst_76 = arith.constant 0.000000e+00 : f32
    %401 = vector.broadcast %cst_76 : f32 to vector<2x8x64xf32>
    %402 = tpu.concatenate %400, %401 in 2 : vector<2x8x64xf32>, vector<2x8x64xf32> -> vector<2x8x128xf32>
    %403 = tpu.concatenate %391, %402 in 2 : vector<2x8x128xf32>, vector<2x8x128xf32> -> vector<2x8x256xf32>
    %c0_77 = arith.constant 0 : index
    %c0_78 = arith.constant 0 : index
    %c0_79 = arith.constant 0 : index
    %404 = vector.load %arg6[%c0_77, %c0_78, %c0_79] : memref<2x8x256xf32, #tpu.memory_space<vmem>>, vector<2x8x256xf32>
    tpu.vector_store %arg6[%c0_77, %c0_78, %c0_79], %403 {strides = array<i32>} : memref<2x8x256xf32, #tpu.memory_space<vmem>>, vector<2x8x256xf32>,
    return
  }
}

</mosaic_0001>

<bundles_post_ra>
// kernel: tpu_custom_call.1
= control target key start
LH: loop header
LB: loop body
LE: loop exit
PB: predicated region body
PF: predicated region fallthrough
CT: control target
= control target key end

     0   :  { %11 = vsyncpa [#allocation3], 0  ;;  %s6279_s0 = inlined_call_operand.vmem [shape: f32[128,32], index: 0, kind: input, shape index: {}]   ;;  %s6280_s1 = inlined_call_operand.vmem [shape: s32[16,1], index: 1, kind: input, shape index: {}]   ;;  %s6281_s2 = inlined_call_operand.hbm [shape: f32[32,896], index: 2, kind: input, shape index: {}]   ;;  %s6282_s3 = inlined_call_operand.vmem [shape: f32[64,160], index: 3, kind: input, shape index: {}]   ;;  %s6283_s4 = inlined_call_operand.hbm [shape: f32[128,384], index: 4, kind: input, shape index: {}]   ;;  %s6284_s5 = inlined_call_operand.vmem [shape: f32[8,128], index: 5, kind: input, shape index: {}]   ;;  %s6285_s6 = inlined_call_operand.hbm [shape: f32[2,8,256], index: 6, kind: output, shape index: {}]  }
   0x1   :  { %12 = vsyncpa [#allocation6], 0 }
   0x2   :  { %13 = vsyncpa [#allocation4], 0  ;;  %s22_s23 = sshll.u32 %s6281_s2, 4  ;;  %s4436_s24 = smov [#allocation2]   ;;  %s23_s23 = int_to_ptr.hbm [resolvable:$true] %s22_s23 }
   0x3   :  { %s24_s25 = sshll.u32 %s4436_s24, 4  ;;  %s37_s28 = sshll.u32 %s6283_s4, 4  ;;  %s25_s25 = int_to_ptr.vmem [resolvable:$true] %s24_s25  ;;  %s38_s28 = int_to_ptr.hbm [resolvable:$true] %s37_s28 }
   0x4   :  { %s4437_s29 = smov 896   ;;  %s4438_s30 = smov 56  }
   0x5   :  { %30 = dma.hbm_to_vmem [thread:$0]  %s23_s23, 3584, %s25_s25, [#allocation3], %s4437_s29, %s4437_s29, %s4438_s30  }
   0x6   :  { %s4439_s7 = smov [#allocation5]   ;;  %s4440_s9 = smov 384  }
   0x7   :  { %s39_s8 = sshll.u32 %s4439_s7, 4  ;;  %s4441_s10 = smov 24   ;;  %s40_s8 = int_to_ptr.vmem [resolvable:$true] %s39_s8 }
   0x8   :  { %45 = dma.hbm_to_vmem [thread:$0]  %s38_s28, 6144, %s40_s8, [#allocation6], %s4440_s9, %s4440_s9, %s4441_s10  }
   0x9   :  { %4430 = dma.done.wait [#allocation3], 3584  }
   0xa   :  { %4431 = vsyncadd [#allocation3], 4294963712 }
   0xb   :  { %4432 = dma.done.wait [#allocation6], 6144  }
   0xc   :  { %4433 = vsyncadd [#allocation6], 4294961152  ;;  %v67_v0 = vld [vmem:[#allocation2 + $0xb8] sm:$0xff]  ;;  %v66_v1 = vld [vmem:[#allocation2 + $0x80] sm:$0xff]  ;;  %vm155_vm0 = vcmask 261120   ;;  %v4442_v36 = vmov 0  }
   0xd   :  { %216 = vmatpush.msra.mxu0 %v67_v0  ;;  %3841 = vmatpush.msra.mxu2 %v67_v0  ;;  %v65_v2 = vld [vmem:[#allocation2 + $0x48] sm:$0xff]  ;;  %v64_v3 = vld [vmem:[#allocation2 + $0x10] sm:$0xff]  ;;  %v138_v4 = vld [vmem:[%s6279_s0] sm:$0xff]  ;;  %vm431_vm3 = vcmask 1041409   ;;  %vm608_vm5 = vcmask 1040384   ;;  %s4445_s28 = smov 64  }
   0xe   :  { %v139_v5 = vld [vmem:[%s6279_s0 + $0x8] sm:$0xff]  ;;  %v140_v6 = vld [vmem:[%s6279_s0 + $0x10] sm:$0xff]  ;;  %v141_v7 = vld [vmem:[%s6279_s0 + $0x18] sm:$0xff]  ;;  %3868 = vset.pattern.permute.xlu0 %v4442_v36  ;;  %s4446_s29 = smov 96   ;;  %s4447_s30 = smov 32  }
   0xf   :  { %217 = vmatpush.msra.mxu0 %v66_v1  ;;  %3842 = vmatpush.msra.mxu2 %v66_v1  ;;  %v142_v8 = vld [vmem:[%s6279_s0 + $0x20] sm:$0xff]  ;;  %v143_v9 = vld [vmem:[%s6279_s0 + $0x28] sm:$0xff]  ;;  %v144_v10 = vld [vmem:[%s6279_s0 + $0x30] sm:$0xff]  ;;  %s4448_s15 = smov [#allocation7]   ;;  %s3731_s19 = sshll.u32 %s6285_s6, 4  ;;  %s3732_s19 = int_to_ptr.hbm [resolvable:$true] %s3731_s19 }
  0x10   :  { %v145_v11 = vld [vmem:[%s6279_s0 + $0x38] sm:$0xff]  ;;  %v146_v12 = vld [vmem:[%s6279_s0 + $0x40] sm:$0xff]  ;;  %v99_v13 = vld [vmem:[#allocation5 + $0x168] sm:$0xff]  ;;  %s3729_s16 = sshll.u32 %s4448_s15, 4  ;;  %s4449_s20 = smov 256   ;;  %s3730_s16 = int_to_ptr.vmem [resolvable:$true] %s3729_s16 }
  0x11   :  { %218 = vmatpush.msra.mxu0 %v65_v2  ;;  %3843 = vmatpush.msra.mxu2 %v65_v2  ;;  %v98_v14 = vld [vmem:[#allocation5 + $0x150] sm:$0xff]  ;;  %v97_v15 = vld [vmem:[#allocation5 + $0x138] sm:$0xff]  ;;  %v96_v16 = vld [vmem:[#allocation5 + $0x120] sm:$0xff] }
  0x12   :  { %347 = vmatpush.msra.mxu1 %v99_v13  ;;  %v147_v17 = vld [vmem:[%s6279_s0 + $0x48] sm:$0xff]  ;;  %v94_v19 = vld [vmem:[#allocation5 + $0xf0] sm:$0xff]  ;;  %v93_v20 = vld [vmem:[#allocation5 + $0xd8] sm:$0xff] }
  0x13   :  { %219 = vmatpush.msra.mxu0 %v64_v3  ;;  %3844 = vmatpush.msra.mxu2 %v64_v3  ;;  %v95_v18 = vld [vmem:[#allocation5 + $0x108] sm:$0xff]  ;;  %v92_v21 = vld [vmem:[#allocation5 + $0xc0] sm:$0xff]  ;;  %v148_v22 = vld [vmem:[%s6279_s0 + $0x50] sm:$0xff] }
  0x14   :  { %3745 = vmatmul.msk.f32.vlgmr.msra.gmra.mxu0 %vm155_vm0, %v138_v4  ;;  %348 = vmatpush.msra.mxu1 %v98_v14  ;;  %v91_v23 = vld [vmem:[#allocation5 + $0xa8] sm:$0xff]  ;;  %v153_v24 = vld [vmem:[%s6279_s0 + $0x78] sm:$0xff]  ;;  %v90_v25 = vld [vmem:[#allocation5 + $0x90] sm:$0xff] }
  0x15   :  { %3760 = vmatmul.msk.f32.vlgmr.msra.gmra.mxu2 %vm155_vm0, %v153_v24  ;;  %v89_v26 = vld [vmem:[#allocation5 + $0x78] sm:$0xff]  ;;  %v88_v27 = vld [vmem:[#allocation5 + $0x60] sm:$0xff]  ;;  %v87_v29 = vld [vmem:[#allocation5 + $0x48] sm:$0xff] }
  0x16   :  { %349 = vmatpush.msra.mxu1 %v97_v15  ;;  %v149_v28 = vld [vmem:[%s6279_s0 + $0x58] sm:$0xff]  ;;  %v86_v30 = vld [vmem:[#allocation5 + $0x30] sm:$0xff]  ;;  %v150_v32 = vld [vmem:[%s6279_s0 + $0x60] sm:$0xff] }
  0x17   :  { %v85_v31 = vld [vmem:[#allocation5 + $0x18] sm:$0xff]  ;;  %v84_v33 = vld [vmem:[#allocation5] sm:$0xff]  ;;  %v151_v37 = vld [vmem:[%s6279_s0 + $0x68] sm:$0xff] }
  0x18   :  { %350 = vmatpush.msra.mxu1 %v96_v16  ;;  %v131_v34 = vld [vmem:[#allocation5 + $0x178] sm:$0xff]  ;;  %v455_v35 = vld [vmem:[%s6280_s1] sm:$0xff]  ;;  %v456_v39 = vld [vmem:[%s6280_s1 + $0x8] sm:$0xff] }
  0x19   :  { %460 = vperm.xlu0 %3868, %v455_v35   ;;  %v130_v38 = vld [vmem:[#allocation5 + $0x160] sm:$0xff]  ;;  %v152_v40 = vld [vmem:[%s6279_s0 + $0x70] sm:$0xff]  ;;  %v129_v41 = vld [vmem:[#allocation5 + $0x148] sm:$0xff]  ;;  %s4450_s0 = smov 16  }
  0x1a   :  { %351 = vmatpush.msra.mxu1 %v95_v18  ;;  %v128_v42 = vld [vmem:[#allocation5 + $0x130] sm:$0xff]  ;;  %v4565_v44 = vld [vmem:[%s6284_s5] ss:$0 sm:$0xff]  ;;  %v127_v47 = vld [vmem:[#allocation5 + $0x118] sm:$0xff] }
  0x1b   :  { %v115_v43 = vld [vmem:[#allocation5 + $0x170] sm:$0xff]  ;;  %v114_v48 = vld [vmem:[#allocation5 + $0x158] sm:$0xff]  ;;  %v126_v52 = vld [vmem:[#allocation5 + $0x100] sm:$0xff] }
  0x1c   :  { %3746 = vmatmul.msk.f32.gmra.mxu0 %vm155_vm0, %v139_v5  ;;  %352 = vmatpush.msra.mxu1 %v94_v19  ;;  %v113_v53 = vld [vmem:[#allocation5 + $0x140] sm:$0xff]  ;;  %v125_v60 = vld [vmem:[#allocation5 + $0xe8] sm:$0xff]  ;;  %v124_v62 = vld [vmem:[#allocation5 + $0xd0] sm:$0xff]  ;;  %v269_v5 = vlaneseq }
  0x1d   :  { %434 = vmatpush.msrb.mxu0 %v115_v43  ;;  %v112_v61 = vld [vmem:[#allocation5 + $0x128] sm:$0xff]  ;;  %v111_v63 = vld [vmem:[#allocation5 + $0x110] sm:$0xff]  ;;  %v123_v3 = vld [vmem:[#allocation5 + $0xb8] sm:$0xff] }
  0x1e   :  { %353 = vmatpush.msra.mxu1 %v93_v20  ;;  %v110_v4 = vld [vmem:[#allocation5 + $0xf8] sm:$0xff]  ;;  %v121_v16 = vld [vmem:[#allocation5 + $0x88] sm:$0xff] }
  0x1f   :  { %435 = vmatpush.msrb.mxu0 %v114_v48  ;;  %v104_v35 = vld [vmem:[#allocation5 + $0x68] sm:$0xff] }
  0x20   :  { %354 = vmatpush.msra.mxu1 %v92_v21  ;;  %v107_v21 = vld [vmem:[#allocation5 + $0xb0] sm:$0xff]  ;;  %v117_v36 = vld [vmem:[#allocation5 + $0x28] sm:$0xff] }
  0x21   :  { %463 = vperm.xlu0 %3868, %v456_v39   ;;  %436 = vmatpush.msrb.mxu0 %v113_v53  ;;  %v102_v39 = vld [vmem:[#allocation5 + $0x38] sm:$0xff]  ;;  %v100_v43 = vld [vmem:[#allocation5 + $0x8] sm:$0xff] }
  0x22   :  { %355 = vmatpush.msra.mxu1 %v91_v23 }
  0x23   :  { %437 = vmatpush.msrb.mxu0 %v112_v61 }
  0x24   :  { %3747 = vmatmul.msk.f32.gmra.mxu0 %vm155_vm0, %v140_v6  ;;  %356 = vmatpush.msra.mxu1 %v90_v25  ;;  %v106_v25 = vld [vmem:[#allocation5 + $0x98] sm:$0xff] }
  0x25   :  { %438 = vmatpush.msrb.mxu0 %v111_v63 }
  0x26   :  { %357 = vmatpush.msra.mxu1 %v89_v26  ;;  %v119_v26 = vld [vmem:[#allocation5 + $0x58] sm:$0xff] }
  0x27   :  { %439 = vmatpush.msrb.mxu0 %v110_v4 }
  0x28   :  { %358 = vmatpush.msra.mxu1 %v88_v27 }
  0x2a   :  { %359 = vmatpush.msra.mxu1 %v87_v29  ;;  %v105_v29 = vld [vmem:[#allocation5 + $0x80] sm:$0xff] }
  0x2c   :  { %3748 = vmatmul.msk.f32.gmra.mxu0 %vm155_vm0, %v141_v7  ;;  %360 = vmatpush.msra.mxu1 %v86_v30  ;;  %v270_v7 = vshrl.u32 %v269_v5, 7  ;;  %v118_v30 = vld [vmem:[#allocation5 + $0x40] sm:$0xff] }
  0x2e   :  { %361 = vmatpush.msra.mxu1 %v85_v31 }
  0x30   :  { %362 = vmatpush.msra.mxu1 %v84_v33 }
  0x32   :  { %471 = vmatpush.msrb.mxu1 %v131_v34 }
  0x34   :  { %3749 = vmatmul.msk.f32.gmra.mxu0 %vm155_vm0, %v142_v8  ;;  %472 = vmatpush.msrb.mxu1 %v130_v38  ;;  %v116_v38 = vld [vmem:[#allocation5 + $0x10] sm:$0xff] }
  0x36   :  { %473 = vmatpush.msrb.mxu1 %v129_v41 }
  0x38   :  { %474 = vmatpush.msrb.mxu1 %v128_v42  ;;  %v101_v42 = vld [vmem:[#allocation5 + $0x20] sm:$0xff] }
  0x3a   :  { %475 = vmatpush.msrb.mxu1 %v127_v47 }
  0x3c   :  { %3750 = vmatmul.msk.f32.gmra.mxu0 %vm155_vm0, %v143_v9  ;;  %476 = vmatpush.msrb.mxu1 %v126_v52 }
  0x3e   :  { %477 = vmatpush.msrb.mxu1 %v125_v60 }
  0x40   :  { %478 = vmatpush.msrb.mxu1 %v124_v62 }
  0x42   :  { %479 = vmatpush.msrb.mxu1 %v123_v3 }
  0x44   :  { %3751 = vmatmul.msk.f32.gmra.mxu0 %vm155_vm0, %v144_v10  ;;  %v122_v10 = vld [vmem:[#allocation5 + $0xa0] sm:$0xff] }
  0x45   :  { %480 = vmatpush.msrb.mxu1 %v122_v10 }
  0x47   :  { %481 = vmatpush.msrb.mxu1 %v121_v16 }
  0x4c   :  { %3752 = vmatmul.msk.f32.gmra.mxu0 %vm155_vm0, %v145_v11  ;;  %v109_v11 = vld [vmem:[#allocation5 + $0xe0] sm:$0xff] }
  0x4d   :  { %440 = vmatpush.msrb.mxu0 %v109_v11 }
  0x54   :  { %3753 = vmatmul.msk.f32.gmra.mxu0 %vm155_vm0, %v146_v12  ;;  %v4574_v12 = vadd.s32 48, %v270_v7 }
  0x56   :  { %vm284_vm1 = vcmp.lt.s32.totalorder %v4574_v12, 49 }
  0x5c   :  { %3754 = vmatmul.msk.f32.gmra.mxu0 %vm155_vm0, %v147_v17  ;;  %v108_v17 = vld [vmem:[#allocation5 + $0xc8] sm:$0xff] }
  0x5d   :  { %441 = vmatpush.msrb.mxu0 %v108_v17 }
  0x5f   :  { %442 = vmatpush.msrb.mxu0 %v107_v21 }
  0x61   :  { %443 = vmatpush.msrb.mxu0 %v106_v25 }
  0x63   :  { %444 = vmatpush.msrb.mxu0 %v105_v29  ;;  %v76_v29 = vld [vmem:[#allocation2 + $0x28] sm:$0xff] }
  0x64   :  { %3755 = vmatmul.msk.f32.gmra.mxu0 %vm155_vm0, %v148_v22  ;;  %v120_v22 = vld [vmem:[#allocation5 + $0x70] sm:$0xff] }
  0x65   :  { %482 = vmatpush.msrb.mxu1 %v120_v22  ;;  %445 = vmatpush.msrb.mxu0 %v104_v35  ;;  %v497_v35 = vld [vmem:[%s6282_s3 + $0x18] sm:$0xff] }
  0x67   :  { %483 = vmatpush.msrb.mxu1 %v119_v26  ;;  %v500_v26 = vld [vmem:[%s6282_s3 + $0x30] sm:$0xff] }
  0x68   :  { %528 = vmatpush.msrb.mxu2 %v500_v26 }
  0x69   :  { %484 = vmatpush.msrb.mxu1 %v118_v30  ;;  %v496_v30 = vld [vmem:[%s6282_s3 + $0x10] sm:$0xff] }
  0x6b   :  { %485 = vmatpush.msrb.mxu1 %v117_v36  ;;  %v495_v36 = vld [vmem:[%s6282_s3 + $0x8] sm:$0xff] }
  0x6c   :  { %3756 = vmatmul.msk.f32.gmra.mxu0 %vm155_vm0, %v149_v28 }
  0x6d   :  { %486 = vmatpush.msrb.mxu1 %v116_v38 }
  0x74   :  { %3757 = vmatmul.msk.f32.gmra.mxu0 %vm155_vm0, %v150_v32 }
  0x7c   :  { %3758 = vmatmul.msk.f32.gmra.mxu0 %vm155_vm0, %v151_v37  ;;  %v103_v37 = vld [vmem:[#allocation5 + $0x50] sm:$0xff] }
  0x7d   :  { %446 = vmatpush.msrb.mxu0 %v103_v37 }
  0x7f   :  { %447 = vmatpush.msrb.mxu0 %v102_v39  ;;  %v3870_v39 = vld [vmem:[%s6284_s5 + $0x3] ss:$0 sm:$0xff] }
  0x81   :  { %448 = vmatpush.msrb.mxu0 %v101_v42 }
  0x83   :  { %449 = vmatpush.msrb.mxu0 %v100_v43 }
  0x84   :  { %3759 = vmatmul.msk.f32.gmra.mxu0 %vm155_vm0, %v152_v40 }
  0x8b   :  { %v461_v4 = vpop.permute.xlu0 %460 }
  0x91   :  { %v221_v45 = vpop.f32.mrf.mxu0 }
  0x92   :  { %v222_v46 = vadd.f32 %v4565_v44, %v221_v45 }
  0x94   :  { %363 = vmatmul.f32.vlgmr.msra.gmra.mxu1 %v222_v46 }
  0x99   :  { %v224_v49 = vpop.f32.mrf.mxu0 }
  0x9a   :  { %v225_v50 = vadd.f32 %v4565_v44, %v224_v49 }
  0x9c   :  { %v318_v51 = vadd.f32 %v225_v50, %v222_v46  ;;  %366 = vmatmul.f32.gmra.mxu1 %v225_v50 }
  0xa1   :  { %v227_v54 = vpop.f32.mrf.mxu0 }
  0xa2   :  { %v228_v55 = vadd.f32 %v4565_v44, %v227_v54 }
  0xa4   :  { %v319_v56 = vadd.f32 %v318_v51, %v228_v55  ;;  %369 = vmatmul.f32.gmra.mxu1 %v228_v55 }
  0xa9   :  { %v230_v57 = vpop.f32.mrf.mxu0 }
  0xaa   :  { %v231_v58 = vadd.f32 %v4565_v44, %v230_v57 }
  0xac   :  { %v320_v59 = vadd.f32 %v319_v56, %v231_v58  ;;  %372 = vmatmul.f32.gmra.mxu1 %v231_v58 }
  0xb1   :  { %v233_v0 = vpop.f32.mrf.mxu0 }
  0xb2   :  { %v234_v1 = vadd.f32 %v4565_v44, %v233_v0 }
  0xb4   :  { %v321_v2 = vadd.f32 %v320_v59, %v234_v1  ;;  %375 = vmatmul.f32.gmra.mxu1 %v234_v1  ;;  %v266_v59 = vpop.f32.mrf.mxu2 }
  0xb5   :  { %v267_v62 = vadd.f32 %v4565_v44, %v266_v59  ;;  %v4682_v59 = vld [vmem:[#allocation2 + $0x38] sm:$0xff] }
  0xb9   :  { %v236_v6 = vpop.f32.mrf.mxu0 }
  0xba   :  { %v237_v8 = vadd.f32 %v4565_v44, %v236_v6 }
  0xbc   :  { %v322_v9 = vadd.f32 %v321_v2, %v237_v8  ;;  %378 = vmatmul.f32.gmra.mxu1 %v237_v8  ;;  %v4592_v2 = vand.u32 127, %v269_v5 }
  0xbe   :  { %vm465_vm2 = vcmp.eq.s32.totalorder %v4592_v2, %v461_v4 }
  0xc1   :  { %v239_v13 = vpop.f32.mrf.mxu0 }
  0xc2   :  { %v240_v14 = vadd.f32 %v4565_v44, %v239_v13  ;;  %v464_v13 = vpop.permute.xlu0 %463 }
  0xc3   :  { %vm466_vm4 = vcmp.eq.s32.totalorder %v4592_v2, %v464_v13  ;;  %v503_v13 = vld [vmem:[%s6282_s3 + $0x48] sm:$0xff] }
  0xc4   :  { %v308_v15 = vsel %vm284_vm1, %v240_v14, 0.0  ;;  %381 = vmatmul.f32.gmra.mxu1 %v240_v14 }
  0xc5   :  { %v323_v18 = vadd.f32 %v322_v9, %v308_v15 }
  0xc7   :  { %v325_v47 = vrot.slane %v323_v18, 4 }
  0xc9   :  { %v242_v19 = vpop.f32.mrf.mxu0  ;;  %v326_v50 = vadd.f32 %v325_v47, %v323_v18 }
  0xca   :  { %v243_v20 = vadd.f32 %v4565_v44, %v242_v19 }
  0xcb   :  { %v327_v55 = vrot.slane %v326_v50, 2 }
  0xcc   :  { %384 = vmatmul.f32.gmra.mxu1 %v243_v20 }
  0xcd   :  { %v328_v60 = vadd.f32 %v327_v55, %v326_v50  ;;  %v508_v50 = vld [vmem:[%s6282_s3 + $0x70] sm:$0xff]  ;;  %v4671_v55 = vld [vmem:[#allocation2 + $0xa8] sm:$0xff] }
  0xcf   :  { %v329_v1 = vrot.slane %v328_v60, 1 }
  0xd1   :  { %v245_v23 = vpop.f32.mrf.mxu0  ;;  %v330_v6 = vadd.f32 %v329_v1, %v328_v60 }
  0xd2   :  { %v246_v24 = vadd.f32 %v4565_v44, %v245_v23  ;;  %v79_v23 = vld [vmem:[#allocation2 + $0xd0] sm:$0xff] }
  0xd3   :  { %v344_v10 = vmul.f32 0.020408163, %v330_v6  ;;  %2273 = vmatpush.msra.mxu0 %v79_v23  ;;  %v3871_v6 = vld [vmem:[%s6284_s5 + $0x4] ss:$0 sm:$0xff] }
  0xd4   :  { %387 = vmatmul.f32.gmra.mxu1 %v246_v24  ;;  %v4740_v23 = vld [vmem:[#allocation2 + $0x40] sm:$0xff] }
  0xd9   :  { %v248_v27 = vpop.f32.mrf.mxu0 }
  0xda   :  { %v249_v28 = vadd.f32 %v4565_v44, %v248_v27  ;;  %v77_v27 = vld [vmem:[#allocation2 + $0x60] sm:$0xff] }
  0xdc   :  { %390 = vmatmul.f32.gmra.mxu1 %v249_v28  ;;  %v331_v48 = vadd.f32 %v249_v28, %v246_v24  ;;  %v78_v24 = vld [vmem:[#allocation2 + $0x98] sm:$0xff]  ;;  %v498_v28 = vld [vmem:[%s6282_s3 + $0x20] sm:$0xff] }
  0xdd   :  { %2274 = vmatpush.msra.mxu0 %v78_v24  ;;  %529 = vmatpush.msrb.mxu2 %v498_v28  ;;  %v4743_v24 = vld [vmem:[#allocation2 + $0x8] sm:$0xff] }
  0xdf   :  { %2275 = vmatpush.msra.mxu0 %v77_v27  ;;  %530 = vmatpush.msrb.mxu2 %v496_v30 }
  0xe1   :  { %v251_v31 = vpop.f32.mrf.mxu0  ;;  %2276 = vmatpush.msra.mxu0 %v76_v29 }
  0xe2   :  { %v252_v32 = vadd.f32 %v4565_v44, %v251_v31  ;;  %v494_v31 = vld [vmem:[%s6282_s3] sm:$0xff] }
  0xe3   :  { %531 = vmatpush.msrb.mxu2 %v494_v31 }
  0xe4   :  { %393 = vmatmul.f32.gmra.mxu1 %v252_v32  ;;  %v332_v49 = vadd.f32 %v331_v48, %v252_v32 }
  0xe9   :  { %v254_v33 = vpop.f32.mrf.mxu0 }
  0xea   :  { %v255_v34 = vadd.f32 %v4565_v44, %v254_v33  ;;  %v501_v33 = vld [vmem:[%s6282_s3 + $0x38] sm:$0xff] }
  0xeb   :  { %551 = vmatpush.msra.mxu2 %v501_v33  ;;  %3845 = vmatpush.msra.mxu3 %v501_v33 }
  0xec   :  { %396 = vmatmul.f32.gmra.mxu1 %v255_v34  ;;  %v333_v51 = vadd.f32 %v332_v49, %v255_v34  ;;  %v499_v34 = vld [vmem:[%s6282_s3 + $0x28] sm:$0xff] }
  0xed   :  { %3846 = vmatpush.msra.mxu3 %v499_v34  ;;  %552 = vmatpush.msra.mxu2 %v499_v34 }
  0xef   :  { %3847 = vmatpush.msra.mxu3 %v497_v35  ;;  %553 = vmatpush.msra.mxu2 %v497_v35 }
  0xf1   :  { %v257_v40 = vpop.f32.mrf.mxu0  ;;  %3848 = vmatpush.msra.mxu3 %v495_v36  ;;  %554 = vmatpush.msra.mxu2 %v495_v36 }
  0xf2   :  { %v258_v41 = vadd.f32 %v4565_v44, %v257_v40 }
  0xf3   :  { %645 = vmatpush.msrb.mxu3 %v4671_v55 }
  0xf4   :  { %399 = vmatmul.f32.gmra.mxu1 %v258_v41  ;;  %v334_v52 = vadd.f32 %v333_v51, %v258_v41 }
  0xf9   :  { %v260_v45 = vpop.f32.mrf.mxu0 }
  0xfa   :  { %v261_v46 = vadd.f32 %v4565_v44, %v260_v45 }
  0xfc   :  { %402 = vmatmul.f32.gmra.mxu1 %v261_v46  ;;  %v335_v56 = vadd.f32 %v334_v52, %v261_v46 }
 0x101   :  { %v263_v53 = vpop.f32.mrf.mxu0 }
 0x102   :  { %v264_v54 = vadd.f32 %v4565_v44, %v263_v53  ;;  %v4443_v44 = vmov 1.0  }
 0x104   :  { %v316_v57 = vsel %vm284_vm1, %v264_v54, 0.0  ;;  %405 = vmatmul.f32.gmra.mxu1 %v264_v54  ;;  %v506_v54 = vld [vmem:[%s6282_s3 + $0x60] sm:$0xff] }
 0x105   :  { %v336_v58 = vadd.f32 %v335_v56, %v316_v57  ;;  %v4673_v56 = vld [vmem:[#allocation2 + $0x70] sm:$0xff] }
 0x106   :  { %646 = vmatpush.msrb.mxu3 %v4673_v56 }
 0x107   :  { %v338_v61 = vrot.slane %v336_v58, 4 }
 0x108   :  { %647 = vmatpush.msrb.mxu3 %v4682_v59 }
 0x109   :  { %v339_v63 = vadd.f32 %v338_v61, %v336_v58  ;;  %v504_v58 = vld [vmem:[%s6282_s3 + $0x50] sm:$0xff] }
 0x10b   :  { %v340_v0 = vrot.slane %v339_v63, 2 }
 0x10c   :  { %408 = vmatmul.f32.gmra.mxu1 %v267_v62  ;;  %v502_v62 = vld [vmem:[%s6282_s3 + $0x40] sm:$0xff] }
 0x10d   :  { %v341_v3 = vadd.f32 %v340_v0, %v339_v63  ;;  %v4693_v63 = vld [vmem:[#allocation2] sm:$0xff] }
 0x10e   :  { %648 = vmatpush.msrb.mxu3 %v4693_v63 }
 0x10f   :  { %v342_v7 = vrot.slane %v341_v3, 1 }
 0x111   :  { %v4595_v8 = vpop.f32.mrf.mxu1  ;;  %v343_v9 = vadd.f32 %v342_v7, %v341_v3  ;;  %v509_v7 = vld [vmem:[%s6282_s3 + $0x78] sm:$0xff] }
 0x113   :  { %v345_v11 = vmul.f32 0.020408163, %v343_v9 }
 0x114   :  { %3763 = vmatmul.msk.f32.vlgmr.msrb.gmra.mxu1 %vm465_vm2, %v4443_v44 }
 0x115   :  { %v432_v12 = vsel %vm431_vm3, %v345_v11, %v344_v10  ;;  %v507_v10 = vld [vmem:[%s6282_s3 + $0x68] sm:$0xff]  ;;  %v4444_v11 = vmov 0.0  }
 0x116   :  { %450 = vmatmul.f32.vlgmr.msrb.gmra.mxu0 %v432_v12  ;;  %v505_v12 = vld [vmem:[%s6282_s3 + $0x58] sm:$0xff]  ;;  %v625_v34 = vperm.slane %v4444_v11, 0 }
 0x119   :  { %v4598_v5 = vpop.f32.mrf.mxu1 }
 0x11c   :  { %3764 = vmatmul.msk.f32.gmra.mxu1 %vm466_vm4, %v4443_v44 }
 0x121   :  { %v4601_v14 = vpop.f32.mrf.mxu1 }
 0x129   :  { %v4603_v15 = vpop.f32.mrf.mxu1 }
 0x131   :  { %v4605_v16 = vpop.f32.mrf.mxu1 }
 0x139   :  { %v4607_v17 = vpop.f32.mrf.mxu1 }
 0x141   :  { %v4609_v18 = vpop.f32.mrf.mxu1 }
 0x149   :  { %v4611_v19 = vpop.f32.mrf.mxu1 }
 0x151   :  { %v4613_v20 = vpop.f32.mrf.mxu1 }
 0x152   :  { %v4696_v0 = vadd.f32 %v3870_v39, %v4613_v20 }
 0x154   :  { %v420_v4 = vmax.f32 %v4696_v0, 0.0 }
 0x159   :  { %v391_v21 = vpop.f32.mrf.mxu1 }
 0x15a   :  { %v4684_v60 = vadd.f32 %v3870_v39, %v391_v21  ;;  %v4733_v21 = vld [vmem:[#allocation2 + $0xb0] sm:$0xff] }
 0x15c   :  { %v421_v1 = vmax.f32 %v4684_v60, 0.0 }
 0x161   :  { %v394_v22 = vpop.f32.mrf.mxu1 }
 0x162   :  { %v4662_v52 = vadd.f32 %v3870_v39, %v394_v22  ;;  %v4737_v22 = vld [vmem:[#allocation2 + $0x78] sm:$0xff] }
 0x164   :  { %v422_v61 = vmax.f32 %v4662_v52, 0.0 }
 0x169   :  { %v397_v25 = vpop.f32.mrf.mxu1 }
 0x16a   :  { %v4654_v48 = vadd.f32 %v3870_v39, %v397_v25 }
 0x16c   :  { %v423_v57 = vmax.f32 %v4654_v48, 0.0 }
 0x171   :  { %v400_v32 = vpop.f32.mrf.mxu1 }
 0x172   :  { %v4649_v46 = vadd.f32 %v3870_v39, %v400_v32 }
 0x174   :  { %v424_v53 = vmax.f32 %v4649_v46, 0.0 }
 0x179   :  { %v403_v37 = vpop.f32.mrf.mxu1 }
 0x17a   :  { %v4646_v43 = vadd.f32 %v3870_v39, %v403_v37 }
 0x17c   :  { %v425_v49 = vmax.f32 %v4646_v43, 0.0 }
 0x181   :  { %v406_v38 = vpop.f32.mrf.mxu1 }
 0x182   :  { %v4642_v41 = vadd.f32 %v3870_v39, %v406_v38  ;;  %v3872_v38 = vld [vmem:[%s6284_s5 + $0x1] ss:$0 sm:$0xff] }
 0x184   :  { %v6287_v47 = vmax.f32 %v4642_v41, 0.0 }
 0x189   :  { %v409_v40 = vpop.f32.mrf.mxu1 }
 0x18a   :  { %v4644_v42 = vadd.f32 %v3870_v39, %v409_v40 }
 0x18c   :  { %v6286_v45 = vmax.f32 %v4644_v42, 0.0 }
 0x18e   :  { %3567 = vmatpush.msrb.mxu0 %v6286_v45 }
 0x190   :  { %3568 = vmatpush.msrb.mxu0 %v6287_v47 }
 0x191   :  { %v488_v51 = vpop.f32.mrf.mxu1 }
 0x192   :  { %3765 = vmatmul.msk.f32.vlgmr.msrb.gmra.mxu2 %vm155_vm0, %v488_v51  ;;  %3569 = vmatpush.msrb.mxu0 %v425_v49 }
 0x193   :  { %577 = vmatpush.msrb.mxu2 %v508_v50  ;;  %v451_v9 = vpop.f32.mrf.mxu0 }
 0x194   :  { %3570 = vmatpush.msrb.mxu0 %v424_v53  ;;  %v452_v44 = vadd.f32 %v3871_v6, %v451_v9 }
 0x195   :  { %578 = vmatpush.msrb.mxu2 %v506_v54 }
 0x196   :  { %3571 = vmatpush.msrb.mxu0 %v423_v57  ;;  %v454_v20 = vmax.f32 %v452_v44, 0.0 }
 0x197   :  { %579 = vmatpush.msrb.mxu2 %v504_v58 }
 0x198   :  { %3572 = vmatpush.msrb.mxu0 %v422_v61 }
 0x199   :  { %v491_v3 = vpop.f32.mrf.mxu1  ;;  %580 = vmatpush.msrb.mxu2 %v502_v62 }
 0x19a   :  { %3766 = vmatmul.msk.f32.gmra.mxu2 %vm155_vm0, %v491_v3  ;;  %3768 = vmatmul.msk.f32.vlgmr.msra.gmra.mxu3 %vm155_vm0, %v491_v3 }
 0x19b   :  { %3573 = vmatpush.msrb.mxu0 %v421_v1  ;;  %819 = vmatpush.msra.mxu3 %v4671_v55 }
 0x19d   :  { %3574 = vmatpush.msrb.mxu0 %v420_v4  ;;  %820 = vmatpush.msra.mxu3 %v4673_v56 }
 0x19f   :  { %821 = vmatpush.msra.mxu3 %v4682_v59 }
 0x1a1   :  { %822 = vmatpush.msra.mxu3 %v4693_v63 }
 0x1a2   :  { %3767 = vmatmul.msk.f32.vlgmr.msra.gmra.mxu2 %vm155_vm0, %v488_v51  ;;  %649 = vmatmul.f32.vlgmr.msrb.gmra.mxu3 %v4444_v11 }
 0x1a3   :  { %597 = vmatpush.msra.mxu2 %v509_v7  ;;  %1003 = vmatpush.msrb.mxu3 %v4671_v55 }
 0x1a5   :  { %598 = vmatpush.msra.mxu2 %v507_v10  ;;  %1004 = vmatpush.msrb.mxu3 %v4673_v56 }
 0x1a7   :  { %599 = vmatpush.msra.mxu2 %v505_v12  ;;  %1005 = vmatpush.msrb.mxu3 %v4682_v59 }
 0x1a9   :  { %600 = vmatpush.msra.mxu2 %v503_v13  ;;  %1006 = vmatpush.msrb.mxu3 %v4693_v63 }
 0x1aa   :  { %3769 = vmatmul.msk.f32.vlgmr.msrb.gmra.mxu2 %vm155_vm0, %v454_v20 }
 0x1ab   :  { %665 = vmatpush.msrb.mxu2 %v4733_v21 }
 0x1ad   :  { %666 = vmatpush.msrb.mxu2 %v4737_v22 }
 0x1af   :  { %667 = vmatpush.msrb.mxu2 %v4740_v23 }
 0x1b1   :  { %668 = vmatpush.msrb.mxu2 %v4743_v24 }
 0x1b2   :  { %3770 = vmatmul.msk.f32.vlgmr.msra.gmra.mxu2 %vm155_vm0, %v454_v20 }
 0x1b3   :  { %839 = vmatpush.msra.mxu2 %v4733_v21 }
 0x1b5   :  { %840 = vmatpush.msra.mxu2 %v4737_v22 }
 0x1b7   :  { %841 = vmatpush.msra.mxu2 %v4740_v23 }
 0x1b9   :  { %842 = vmatpush.msra.mxu2 %v4743_v24 }
 0x1ba   :  { %669 = vmatmul.f32.vlgmr.msrb.gmra.mxu2 %v4444_v11 }
 0x1bb   :  { %1023 = vmatpush.msrb.mxu2 %v4733_v21 }
 0x1bd   :  { %1024 = vmatpush.msrb.mxu2 %v4737_v22 }
 0x1bf   :  { %1025 = vmatpush.msrb.mxu2 %v4740_v23 }
 0x1c1   :  { %1026 = vmatpush.msrb.mxu2 %v4743_v24 }
 0x215   :  { %v533_v25 = vpop.f32.mrf.mxu2 }
 0x21d   :  { %v536_v26 = vpop.f32.mrf.mxu2  ;;  %v559_v29 = vpop.f32.mrf.mxu3 }
 0x225   :  { %v556_v27 = vpop.f32.mrf.mxu2  ;;  %v650_v39 = vpop.f32.mrf.mxu3 }
 0x226   :  { %v675_v58 = vrot.slane %v650_v39, 1 }
 0x22d   :  { %v582_v28 = vpop.f32.mrf.mxu2 }
 0x235   :  { %v602_v30 = vpop.f32.mrf.mxu2 }
 0x236   :  { %v607_v31 = vrot.slane %v602_v30, 7 }
 0x238   :  { %v609_v32 = vsel %vm608_vm5, %v582_v28, %v607_v31  ;;  %v610_v33 = vsel %vm431_vm3, %v582_v28, %v607_v31 }
 0x239   :  { %v611_v35 = vrot.slane %v610_v33, 1  ;;  %v612_v36 = vperm.slane %v609_v32, 0  ;;  %v613_v37 = vperm.slane %v609_v32, 1 }
 0x23b   :  { %v614_v40 = vperm.slane %v611_v35, 0  ;;  %v615_v50 = vperm.slane %v611_v35, 1  ;;  %v620_v51 = vadd.f32 %v612_v36, %v533_v25  ;;  %v621_v54 = vadd.f32 %v613_v37, %v556_v27 }
 0x23d   :  { %v622_v62 = vadd.f32 %v614_v40, %v536_v26  ;;  %v623_v3 = vadd.f32 %v615_v50, %v559_v29  ;;  %v4761_v6 = vadd.f32 %v3872_v38, %v620_v51  ;;  %v4763_v7 = vadd.f32 %v625_v34, %v621_v54 }
 0x23f   :  { %v4765_v9 = vadd.f32 %v3872_v38, %v622_v62  ;;  %v4767_v10 = vadd.f32 %v625_v34, %v623_v3  ;;  %v681_v11 = vadd.f32 %v650_v39, %v4761_v6 }
 0x241   :  { %v683_v44 = vadd.f32 %v675_v58, %v4765_v9  ;;  %v3771_v12 = vmul.f32 -1.442695, %v681_v11 }
 0x243   :  { %3875 = vpow2.f32 %v3771_v12  ;;  %v3773_v13 = vmul.f32 -1.442695, %v683_v44 }
 0x244   :  { %3877 = vtanh.f32 %v683_v44 }
 0x245   :  { %3879 = vpow2.f32 %v3773_v13 }
 0x246   :  { %3881 = vtanh.f32 %v681_v11 }
 0x249   :  { %v3876_v20 = vpop.eup %3875 }
 0x24a   :  { %v3878_v25 = vpop.eup %3877  ;;  %v697_v26 = vadd.f32 1.0, %v3876_v20 }
 0x24b   :  { %v3880_v27 = vpop.eup %3879  ;;  %767 = vrot.lane.b32.xlu1 %v3878_v25, %s4445_s28  ;;  %v670_v25 = vpop.f32.mrf.mxu2 }
 0x24c   :  { %v699_v28 = vadd.f32 1.0, %v3880_v27  ;;  %3883 = vrcp.f32 %v697_v26  ;;  %v3882_v29 = vpop.eup %3881  ;;  %v712_v62 = vand.u32 2147483648, %v697_v26  ;;  %vm706_vm11 = vweird.f32 %v697_v26 }
 0x24d   :  { %v710_v11 = vand.u32 2147483647, %v697_v26  ;;  %v676_v27 = vrot.slane %v670_v25, 1 }
 0x24e   :  { %3885 = vrcp.f32 %v699_v28  ;;  %v742_v36 = vand.u32 2147483648, %v699_v28  ;;  %v740_v38 = vand.u32 2147483647, %v699_v28  ;;  %vm736_vm7 = vweird.f32 %v699_v28 }
 0x24f   :  { %v713_v12 = vor.u32 1.1754944e-38, %v712_v62  ;;  %vm711_vm13 = vcmp.eq.f32.partialorder %v710_v11, 8.507059e+37 }
 0x250   :  { %v743_v50 = vor.u32 1.1754944e-38, %v742_v36  ;;  %vm741_vm9 = vcmp.eq.f32.partialorder %v740_v38, 8.507059e+37 }
 0x252   :  { %v3884_v30 = vpop.eup %3883 }
 0x253   :  { %765 = vrot.lane.b32.xlu1 %v3882_v29, %s4445_s28  ;;  %v702_v31 = vmul.f32 %v3884_v30, %v697_v26  ;;  %vm707_vm10 = vweird.f32 %v3884_v30  ;;  %v682_v26 = vadd.f32 %v670_v25, %v4763_v7 }
 0x254   :  { %v3886_v32 = vpop.eup %3885  ;;  %vm708_vm12 = vmor %vm706_vm11, %vm707_vm10 }
 0x255   :  { %v732_v33 = vmul.f32 %v3886_v32, %v699_v28  ;;  %v703_v34 = vsub.f32 1.0, %v702_v31  ;;  %vm737_vm6 = vweird.f32 %v3886_v32  ;;  %v684_v28 = vadd.f32 %v676_v27, %v4767_v10 }
 0x256   :  { %vm738_vm8 = vmor %vm736_vm7, %vm737_vm6  ;;  %v3772_v31 = vmul.f32 -1.442695, %v682_v26 }
 0x257   :  { %v733_v35 = vsub.f32 1.0, %v732_v33  ;;  %v704_v39 = vmul.f32 %v3884_v30, %v703_v34  ;;  %v3774_v29 = vmul.f32 -1.442695, %v684_v28 }
 0x259   :  { %v734_v37 = vmul.f32 %v3886_v32, %v733_v35  ;;  %v705_v54 = vadd.f32 %v3884_v30, %v704_v39  ;;  %3887 = vpow2.f32 %v3774_v29 }
 0x25a   :  { %3889 = vpow2.f32 %v3772_v31 }
 0x25b   :  { %v735_v40 = vadd.f32 %v3886_v32, %v734_v37  ;;  %v709_v44 = vsel %vm708_vm12, %v3884_v30, %v705_v54 }
 0x25c   :  { %v4777_v13 = vsel %vm711_vm13, %v713_v12, %v709_v44 }
 0x25d   :  { %v739_v51 = vsel %vm738_vm8, %v3886_v32, %v735_v40  ;;  %v773_v20 = vmul.f32 0.0, %v4777_v13 }
 0x25e   :  { %v4773_v58 = vsel %vm741_vm9, %v743_v50, %v739_v51 }
 0x25f   :  { %v774_v3 = vmul.f32 0.0, %v4773_v58  ;;  %v3888_v32 = vpop.eup %3887 }
 0x260   :  { %v700_v30 = vadd.f32 1.0, %v3888_v32  ;;  %v3890_v33 = vpop.eup %3889 }
 0x261   :  { %779 = vrot.lane.b32.xlu2 %v774_v3, %s4446_s29  ;;  %v698_v34 = vadd.f32 1.0, %v3890_v33 }
 0x262   :  { %3891 = vrcp.f32 %v700_v30  ;;  %v757_v44 = vand.u32 2147483648, %v700_v30  ;;  %vm751_vm15 = vweird.f32 %v700_v30  ;;  %v755_v12 = vand.u32 2147483647, %v700_v30 }
 0x263   :  { %3893 = vrcp.f32 %v698_v34  ;;  %vm721_vm6 = vweird.f32 %v698_v34 }
 0x264   :  { %v758_v28 = vor.u32 1.1754944e-38, %v757_v44  ;;  %vm756_vm2 = vcmp.eq.f32.partialorder %v755_v12, 8.507059e+37 }
 0x268   :  { %v3892_v35 = vpop.eup %3891 }
 0x269   :  { %777 = vrot.lane.b32.xlu2 %v773_v20, %s4446_s29  ;;  %v747_v36 = vmul.f32 %v3892_v35, %v700_v30  ;;  %v3894_v38 = vpop.eup %3893  ;;  %vm752_vm14 = vweird.f32 %v3892_v35  ;;  %v725_v30 = vand.u32 2147483647, %v698_v34 }
 0x26a   :  { %v717_v39 = vmul.f32 %v3894_v38, %v698_v34  ;;  %vm753_vm1 = vmor %vm751_vm15, %vm752_vm14  ;;  %vm722_vm4 = vweird.f32 %v3894_v38 }
 0x26b   :  { %v748_v37 = vsub.f32 1.0, %v747_v36  ;;  %vm723_vm7 = vmor %vm721_vm6, %vm722_vm4  ;;  %vm726_vm8 = vcmp.eq.f32.partialorder %v725_v30, 8.507059e+37 }
 0x26c   :  { %v718_v3 = vsub.f32 1.0, %v717_v39  ;;  %v727_v39 = vand.u32 2147483648, %v698_v34 }
 0x26d   :  { %v749_v40 = vmul.f32 %v3892_v35, %v748_v37 }
 0x26e   :  { %v719_v20 = vmul.f32 %v3894_v38, %v718_v3 }
 0x26f   :  { %v750_v11 = vadd.f32 %v3892_v35, %v749_v40  ;;  %v728_v40 = vor.u32 1.1754944e-38, %v727_v39 }
 0x270   :  { %v720_v37 = vadd.f32 %v3894_v38, %v719_v20 }
 0x271   :  { %v754_v25 = vsel %vm753_vm1, %v3892_v35, %v750_v11 }
 0x272   :  { %v759_v32 = vsel %vm756_vm2, %v758_v28, %v754_v25  ;;  %v724_v35 = vsel %vm723_vm7, %v3894_v38, %v720_v37 }
 0x2bb   :  { %v780_v50 = vpop.permute.xlu2 %779 }
 0x2bd   :  { %v768_v51 = vpop.permute.xlu1 %767 }
 0x2be   :  { %v772_v54 = vmul.f32 %v768_v51, %v4773_v58 }
 0x2c0   :  { %v784_v62 = vadd.f32 %v780_v50, %v772_v54  ;;  %v729_v54 = vsel %vm726_vm8, %v728_v40, %v724_v35 }
 0x2c2   :  { %3895 = vtanh.f32 %v784_v62  ;;  %v950_v11 = vrot.slane %v784_v62, 7 }
 0x2c3   :  { %v778_v26 = vpop.permute.xlu2 %777 }
 0x2c5   :  { %v766_v27 = vpop.permute.xlu1 %765 }
 0x2c6   :  { %v771_v29 = vmul.f32 %v766_v27, %v4777_v13 }
 0x2c8   :  { %v3896_v31 = vpop.eup %3895  ;;  %v783_v33 = vadd.f32 %v778_v26, %v771_v29 }
 0x2c9   :  { %v4785_v36 = vmul.f32 %v3896_v31, %v759_v32  ;;  %791 = vrot.lane.b32.xlu0 %v3896_v31, %s4446_s29 }
 0x2ca   :  { %3897 = vtanh.f32 %v783_v33  ;;  %v949_v50 = vrot.slane %v783_v33, 7 }
 0x2d0   :  { %v3898_v51 = vpop.eup %3897 }
 0x2d1   :  { %v4788_v3 = vmul.f32 %v3898_v51, %v729_v54  ;;  %789 = vrot.lane.b32.xlu1 %v3898_v51, %s4446_s29  ;;  %951 = vrot.lane.b32.xlu0 %v949_v50, %s4447_s30 }
 0x2d9   :  { %953 = vrot.lane.b32.xlu1 %v950_v11, %s4447_s30 }
 0x33b   :  { %v792_v44 = vpop.permute.xlu0 %791 }
 0x33c   :  { %v4794_v34 = vmul.f32 %v792_v44, %v4773_v58 }
 0x33e   :  { %v801_v12 = vrot.slane %v4794_v34, 7 }
 0x343   :  { %v790_v38 = vpop.permute.xlu1 %789 }
 0x344   :  { %v4798_v20 = vmul.f32 %v790_v38, %v4777_v13 }
 0x346   :  { %v802_v25 = vsel %vm431_vm3, %v801_v12, %v4798_v20 }
 0x347   :  { %803 = vrot.lane.b32.xlu2 %v802_v25, %s4447_s30 }
 0x3a1   :  { %v804_v27 = vpop.permute.xlu2 %803 }
 0x3a2   :  { %3775 = vmatmul.msk.f32.vlgmr.msra.gmra.mxu3 %vm155_vm0, %v804_v27  ;;  %3776 = vmatmul.msk.f32.vlgmr.msra.gmra.mxu2 %vm155_vm0, %v804_v27 }
 0x3a3   :  { %1190 = vmatpush.msra.mxu3 %v4671_v55  ;;  %1210 = vmatpush.msra.mxu2 %v4733_v21 }
 0x3a5   :  { %1191 = vmatpush.msra.mxu3 %v4673_v56  ;;  %1211 = vmatpush.msra.mxu2 %v4737_v22 }
 0x3a7   :  { %1192 = vmatpush.msra.mxu3 %v4682_v59  ;;  %1212 = vmatpush.msra.mxu2 %v4740_v23 }
 0x3a9   :  { %1193 = vmatpush.msra.mxu3 %v4693_v63  ;;  %1213 = vmatpush.msra.mxu2 %v4743_v24 }
 0x425   :  { %v824_v58 = vpop.f32.mrf.mxu3 }
 0x426   :  { %v849_v13 = vrot.slane %v824_v58, 7  ;;  %v857_v62 = vadd.f32 %v824_v58, %v4765_v9 }
 0x428   :  { %v855_v28 = vadd.f32 %v849_v13, %v4761_v6  ;;  %v3779_v29 = vmul.f32 -1.442695, %v857_v62  ;;  %3899 = vtanh.f32 %v857_v62 }
 0x42a   :  { %v3777_v26 = vmul.f32 -1.442695, %v855_v28  ;;  %3901 = vpow2.f32 %v3779_v29 }
 0x42b   :  { %3903 = vtanh.f32 %v855_v28 }
 0x42c   :  { %3905 = vpow2.f32 %v3777_v26  ;;  %v954_v26 = vpop.permute.xlu1 %953 }
 0x42e   :  { %v3900_v31 = vpop.eup %3899 }
 0x42f   :  { %941 = vrot.lane.b32.xlu0 %v3900_v31, %s4445_s28 }
 0x430   :  { %v3902_v32 = vpop.eup %3901 }
 0x431   :  { %v3904_v33 = vpop.eup %3903  ;;  %v873_v37 = vadd.f32 1.0, %v3902_v32 }
 0x432   :  { %v3906_v39 = vpop.eup %3905  ;;  %939 = vrot.lane.b32.xlu2 %v3904_v33, %s4445_s28 }
 0x433   :  { %v871_v30 = vadd.f32 1.0, %v3906_v39  ;;  %3907 = vrcp.f32 %v873_v37  ;;  %v916_v11 = vand.u32 2147483648, %v873_v37  ;;  %v914_v38 = vand.u32 2147483647, %v873_v37 }
 0x434   :  { %vm910_vm10 = vweird.f32 %v873_v37 }
 0x435   :  { %3909 = vrcp.f32 %v871_v30  ;;  %v886_v25 = vand.u32 2147483648, %v871_v30  ;;  %v884_v13 = vand.u32 2147483647, %v871_v30  ;;  %v917_v62 = vor.u32 1.1754944e-38, %v916_v11 }
 0x436   :  { %vm915_vm13 = vcmp.eq.f32.partialorder %v914_v38, 8.507059e+37  ;;  %vm880_vm14 = vweird.f32 %v871_v30 }
 0x437   :  { %v887_v32 = vor.u32 1.1754944e-38, %v886_v25  ;;  %vm885_vm1 = vcmp.eq.f32.partialorder %v884_v13, 8.507059e+37 }
 0x439   :  { %v3908_v35 = vpop.eup %3907 }
 0x43a   :  { %v906_v40 = vmul.f32 %v3908_v35, %v873_v37  ;;  %vm911_vm9 = vweird.f32 %v3908_v35  ;;  %v952_v37 = vpop.permute.xlu0 %951 }
 0x43b   :  { %v3910_v50 = vpop.eup %3909  ;;  %vm912_vm12 = vmor %vm910_vm10, %vm911_vm9 }
 0x43c   :  { %v907_v51 = vsub.f32 1.0, %v906_v40  ;;  %v876_v54 = vmul.f32 %v3910_v50, %v871_v30  ;;  %vm881_vm11 = vweird.f32 %v3910_v50 }
 0x43d   :  { %vm882_vm15 = vmor %vm880_vm14, %vm881_vm11 }
 0x43e   :  { %v908_v44 = vmul.f32 %v3908_v35, %v907_v51  ;;  %v877_v12 = vsub.f32 1.0, %v876_v54 }
 0x440   :  { %v909_v27 = vadd.f32 %v3908_v35, %v908_v44  ;;  %v878_v58 = vmul.f32 %v3910_v50, %v877_v12 }
 0x442   :  { %v913_v28 = vsel %vm912_vm12, %v3908_v35, %v909_v27  ;;  %v879_v29 = vadd.f32 %v3910_v50, %v878_v58  ;;  %v844_v35 = vpop.f32.mrf.mxu2 }
 0x443   :  { %v4817_v31 = vsel %vm915_vm13, %v917_v62, %v913_v28  ;;  %v858_v30 = vadd.f32 %v844_v35, %v4767_v10  ;;  %v850_v38 = vrot.slane %v844_v35, 7 }
 0x444   :  { %v958_v33 = vmul.f32 %v954_v26, %v4817_v31  ;;  %v883_v39 = vsel %vm882_vm15, %v3910_v50, %v879_v29 }
 0x445   :  { %v4820_v40 = vsel %vm885_vm1, %v887_v32, %v883_v39  ;;  %v3780_v54 = vmul.f32 -1.442695, %v858_v30  ;;  %v856_v50 = vadd.f32 %v850_v38, %v4763_v7 }
 0x446   :  { %963 = vrot.lane.b32.xlu2 %v958_v33, %s4446_s29  ;;  %v957_v51 = vmul.f32 %v952_v37, %v4820_v40 }
 0x447   :  { %3911 = vpow2.f32 %v3780_v54  ;;  %v3778_v25 = vmul.f32 -1.442695, %v856_v50 }
 0x448   :  { %961 = vrot.lane.b32.xlu1 %v957_v51, %s4446_s29 }
 0x44d   :  { %v3912_v11 = vpop.eup %3911 }
 0x44e   :  { %v874_v44 = vadd.f32 1.0, %v3912_v11 }
 0x450   :  { %3913 = vrcp.f32 %v874_v44  ;;  %v931_v51 = vand.u32 2147483648, %v874_v44  ;;  %vm925_vm4 = vweird.f32 %v874_v44  ;;  %v929_v35 = vand.u32 2147483647, %v874_v44 }
 0x451   :  { %3915 = vpow2.f32 %v3778_v25 }
 0x452   :  { %v932_v54 = vor.u32 1.1754944e-38, %v931_v51  ;;  %vm930_vm7 = vcmp.eq.f32.partialorder %v929_v35, 8.507059e+37 }
 0x456   :  { %v3914_v12 = vpop.eup %3913 }
 0x457   :  { %v921_v27 = vmul.f32 %v3914_v12, %v874_v44  ;;  %v3916_v62 = vpop.eup %3915  ;;  %vm926_vm2 = vweird.f32 %v3914_v12 }
 0x458   :  { %v872_v32 = vadd.f32 1.0, %v3916_v62  ;;  %vm927_vm6 = vmor %vm925_vm4, %vm926_vm2 }
 0x459   :  { %v922_v13 = vsub.f32 1.0, %v921_v27 }
 0x45a   :  { %vm895_vm9 = vweird.f32 %v872_v32 }
 0x45b   :  { %v923_v28 = vmul.f32 %v3914_v12, %v922_v13 }
 0x45d   :  { %v924_v37 = vadd.f32 %v3914_v12, %v923_v28 }
 0x45f   :  { %v928_v30 = vsel %vm927_vm6, %v3914_v12, %v924_v37  ;;  %v901_v12 = vand.u32 2147483648, %v872_v32  ;;  %v899_v37 = vand.u32 2147483647, %v872_v32 }
 0x460   :  { %v933_v38 = vsel %vm930_vm7, %v932_v54, %v928_v30 }
 0x461   :  { %v902_v35 = vor.u32 1.1754944e-38, %v901_v12  ;;  %vm900_vm11 = vcmp.eq.f32.partialorder %v899_v37, 8.507059e+37 }
 0x48c   :  { %v940_v58 = vpop.permute.xlu2 %939 }
 0x4a0   :  { %v964_v33 = vpop.permute.xlu2 %963 }
 0x4a1   :  { %v942_v29 = vpop.permute.xlu0 %941 }
 0x4a2   :  { %v946_v26 = vmul.f32 %v942_v29, %v4817_v31  ;;  %v945_v29 = vmul.f32 %v940_v58, %v4820_v40 }
 0x4a4   :  { %v968_v39 = vadd.f32 %v964_v33, %v946_v26 }
 0x4a6   :  { %3917 = vtanh.f32 %v968_v39  ;;  %v1136_v13 = vrot.slane %v968_v39, 7 }
 0x4a7   :  { %3919 = vrcp.f32 %v872_v32 }
 0x4ac   :  { %v3918_v11 = vpop.eup %3917 }
 0x4ad   :  { %v3920_v50 = vpop.eup %3919  ;;  %v982_v25 = vmul.f32 %v3918_v11, %v933_v38  ;;  %975 = vrot.lane.b32.xlu1 %v3918_v11, %s4446_s29 }
 0x4ae   :  { %v891_v27 = vmul.f32 %v3920_v50, %v872_v32  ;;  %vm896_vm8 = vweird.f32 %v3920_v50 }
 0x4af   :  { %vm897_vm10 = vmor %vm895_vm9, %vm896_vm8  ;;  %v4839_v38 = vsel %vm608_vm5, %v4785_v36, %v982_v25 }
 0x4b0   :  { %v892_v62 = vsub.f32 1.0, %v891_v27 }
 0x4b2   :  { %v893_v28 = vmul.f32 %v3920_v50, %v892_v62 }
 0x4b4   :  { %v894_v33 = vadd.f32 %v3920_v50, %v893_v28 }
 0x4b5   :  { %1139 = vrot.lane.b32.xlu1 %v1136_v13, %s4447_s30 }
 0x4b6   :  { %v898_v51 = vsel %vm897_vm10, %v3920_v50, %v894_v33 }
 0x4b7   :  { %v903_v39 = vsel %vm900_vm11, %v902_v35, %v898_v51 }
 0x4ba   :  { %v962_v26 = vpop.permute.xlu1 %961 }
 0x4bb   :  { %v967_v44 = vadd.f32 %v962_v26, %v945_v29 }
 0x4bd   :  { %3921 = vtanh.f32 %v967_v44  ;;  %v1135_v11 = vrot.slane %v967_v44, 7 }
 0x4c3   :  { %v3922_v30 = vpop.eup %3921 }
 0x4c4   :  { %v981_v54 = vmul.f32 %v3922_v30, %v903_v39  ;;  %973 = vrot.lane.b32.xlu0 %v3922_v30, %s4446_s29 }
 0x4c6   :  { %v4834_v58 = vsel %vm608_vm5, %v4788_v3, %v981_v54 }
 0x4cc   :  { %1137 = vrot.lane.b32.xlu0 %v1135_v11, %s4447_s30 }
 0x51f   :  { %v976_v32 = vpop.permute.xlu1 %975 }
 0x520   :  { %v4845_v13 = vmul.f32 %v976_v32, %v4817_v31 }
 0x536   :  { %v974_v50 = vpop.permute.xlu0 %973 }
 0x537   :  { %v4842_v27 = vmul.f32 %v974_v50, %v4820_v40 }
 0x539   :  { %v985_v62 = vrot.slane %v4842_v27, 1 }
 0x53b   :  { %v986_v3 = vsel %vm431_vm3, %v4845_v13, %v985_v62 }
 0x53c   :  { %987 = vrot.lane.b32.xlu2 %v986_v3, %s4447_s30 }
 0x596   :  { %v988_v28 = vpop.permute.xlu2 %987 }
 0x597   :  { %3781 = vmatmul.msk.f32.vlgmr.msrb.gmra.mxu3 %vm155_vm0, %v988_v28  ;;  %3782 = vmatmul.msk.f32.vlgmr.msrb.gmra.mxu2 %vm155_vm0, %v988_v28 }
 0x598   :  { %1377 = vmatpush.msrb.mxu3 %v4671_v55  ;;  %1397 = vmatpush.msrb.mxu2 %v4733_v21 }
 0x59a   :  { %1378 = vmatpush.msrb.mxu3 %v4673_v56  ;;  %1398 = vmatpush.msrb.mxu2 %v4737_v22 }
 0x59c   :  { %1379 = vmatpush.msrb.mxu3 %v4682_v59  ;;  %1399 = vmatpush.msrb.mxu2 %v4740_v23 }
 0x59e   :  { %1380 = vmatpush.msrb.mxu3 %v4693_v63  ;;  %1400 = vmatpush.msrb.mxu2 %v4743_v24 }
 0x61a   :  { %v1008_v36 = vpop.f32.mrf.mxu3 }
 0x61b   :  { %v1033_v31 = vrot.slane %v1008_v36, 6  ;;  %v1035_v40 = vrot.slane %v1008_v36, 7 }
 0x61d   :  { %v1041_v25 = vadd.f32 %v1033_v31, %v4761_v6  ;;  %v1043_v29 = vadd.f32 %v1035_v40, %v4765_v9 }
 0x61f   :  { %v3783_v26 = vmul.f32 -1.442695, %v1041_v25  ;;  %v3785_v44 = vmul.f32 -1.442695, %v1043_v29  ;;  %3923 = vtanh.f32 %v1041_v25 }
 0x620   :  { %3925 = vtanh.f32 %v1043_v29 }
 0x621   :  { %3927 = vpow2.f32 %v3783_v26 }
 0x622   :  { %3929 = vpow2.f32 %v3785_v44 }
 0x625   :  { %v3924_v33 = vpop.eup %3923 }
 0x626   :  { %v3926_v12 = vpop.eup %3925  ;;  %1125 = vrot.lane.b32.xlu2 %v3924_v33, %s4445_s28 }
 0x627   :  { %v3928_v37 = vpop.eup %3927  ;;  %1127 = vrot.lane.b32.xlu0 %v3926_v12, %s4445_s28 }
 0x628   :  { %v3930_v51 = vpop.eup %3929  ;;  %v1057_v35 = vadd.f32 1.0, %v3928_v37  ;;  %v1138_v37 = vpop.permute.xlu0 %1137 }
 0x629   :  { %v1059_v30 = vadd.f32 1.0, %v3930_v51 }
 0x62a   :  { %3931 = vrcp.f32 %v1057_v35  ;;  %v1072_v3 = vand.u32 2147483648, %v1057_v35  ;;  %v1070_v31 = vand.u32 2147483647, %v1057_v35  ;;  %vm1066_vm14 = vweird.f32 %v1057_v35 }
 0x62b   :  { %3933 = vrcp.f32 %v1059_v30  ;;  %v1102_v28 = vand.u32 2147483648, %v1059_v30  ;;  %v1100_v25 = vand.u32 2147483647, %v1059_v30  ;;  %vm1096_vm15 = vweird.f32 %v1059_v30 }
 0x62c   :  { %v1073_v44 = vor.u32 1.1754944e-38, %v1072_v3  ;;  %vm1071_vm4 = vcmp.eq.f32.partialorder %v1070_v31, 8.507059e+37 }
 0x62d   :  { %v1103_v33 = vor.u32 1.1754944e-38, %v1102_v28  ;;  %vm1101_vm6 = vcmp.eq.f32.partialorder %v1100_v25, 8.507059e+37 }
 0x630   :  { %v3932_v39 = vpop.eup %3931 }
 0x631   :  { %v3934_v54 = vpop.eup %3933  ;;  %v1062_v11 = vmul.f32 %v3932_v39, %v1057_v35  ;;  %vm1067_vm12 = vweird.f32 %v3932_v39 }
 0x632   :  { %v1092_v32 = vmul.f32 %v3934_v54, %v1059_v30  ;;  %vm1097_vm13 = vweird.f32 %v3934_v54  ;;  %vm1068_vm1 = vmor %vm1066_vm14, %vm1067_vm12  ;;  %v1028_v30 = vpop.f32.mrf.mxu2 }
 0x633   :  { %v1063_v50 = vsub.f32 1.0, %v1062_v11  ;;  %vm1098_vm2 = vmor %vm1096_vm15, %vm1097_vm13  ;;  %v1036_v3 = vrot.slane %v1028_v30, 7  ;;  %vm2106_vm15 = vcmask 1041408  }
 0x634   :  { %v1093_v62 = vsub.f32 1.0, %v1092_v32  ;;  %v1140_v32 = vpop.permute.xlu1 %1139 }
 0x635   :  { %v1064_v36 = vmul.f32 %v3932_v39, %v1063_v50 }
 0x636   :  { %v1094_v40 = vmul.f32 %v3934_v54, %v1093_v62 }
 0x637   :  { %v1065_v29 = vadd.f32 %v3932_v39, %v1064_v36  ;;  %v1034_v36 = vrot.slane %v1028_v30, 6 }
 0x638   :  { %v1095_v26 = vadd.f32 %v3934_v54, %v1094_v40 }
 0x639   :  { %v1069_v12 = vsel %vm1068_vm1, %v3932_v39, %v1065_v29  ;;  %v1044_v39 = vadd.f32 %v1036_v3, %v4767_v10  ;;  %v1042_v40 = vadd.f32 %v1034_v36, %v4763_v7 }
 0x63a   :  { %v1099_v51 = vsel %vm1098_vm2, %v3934_v54, %v1095_v26  ;;  %v4865_v11 = vsel %vm1071_vm4, %v1073_v44, %v1069_v12 }
 0x63b   :  { %v4867_v50 = vsel %vm1101_vm6, %v1103_v33, %v1099_v51  ;;  %v1143_v62 = vmul.f32 %v1138_v37, %v4865_v11  ;;  %v3786_v28 = vmul.f32 -1.442695, %v1044_v39  ;;  %v3784_v25 = vmul.f32 -1.442695, %v1042_v40 }
 0x63c   :  { %v1144_v35 = vmul.f32 %v1140_v32, %v4867_v50 }
 0x63d   :  { %1147 = vrot.lane.b32.xlu1 %v1143_v62, %s4446_s29  ;;  %3935 = vpow2.f32 %v3786_v28 }
 0x63e   :  { %1149 = vrot.lane.b32.xlu2 %v1144_v35, %s4446_s29 }
 0x643   :  { %v3936_v54 = vpop.eup %3935 }
 0x644   :  { %v1060_v31 = vadd.f32 1.0, %v3936_v54 }
 0x646   :  { %3937 = vrcp.f32 %v1060_v31  ;;  %v1117_v39 = vand.u32 2147483648, %v1060_v31  ;;  %vm1111_vm8 = vweird.f32 %v1060_v31  ;;  %v1115_v28 = vand.u32 2147483647, %v1060_v31 }
 0x647   :  { %3939 = vpow2.f32 %v3784_v25 }
 0x648   :  { %v1118_v40 = vor.u32 1.1754944e-38, %v1117_v39  ;;  %vm1116_vm10 = vcmp.eq.f32.partialorder %v1115_v28, 8.507059e+37 }
 0x64c   :  { %v3938_v29 = vpop.eup %3937 }
 0x64d   :  { %v1107_v26 = vmul.f32 %v3938_v29, %v1060_v31  ;;  %v3940_v33 = vpop.eup %3939  ;;  %vm1112_vm7 = vweird.f32 %v3938_v29 }
 0x64e   :  { %v1058_v37 = vadd.f32 1.0, %v3940_v33  ;;  %vm1113_vm9 = vmor %vm1111_vm8, %vm1112_vm7 }
 0x64f   :  { %v1108_v12 = vsub.f32 1.0, %v1107_v26 }
 0x650   :  { %3941 = vrcp.f32 %v1058_v37  ;;  %vm1081_vm12 = vweird.f32 %v1058_v37 }
 0x651   :  { %v1109_v51 = vmul.f32 %v3938_v29, %v1108_v12 }
 0x653   :  { %v1110_v30 = vadd.f32 %v3938_v29, %v1109_v51 }
 0x655   :  { %v1114_v54 = vsel %vm1113_vm9, %v3938_v29, %v1110_v30  ;;  %v1087_v29 = vand.u32 2147483648, %v1058_v37  ;;  %v1085_v30 = vand.u32 2147483647, %v1058_v37 }
 0x656   :  { %v3942_v36 = vpop.eup %3941  ;;  %v1119_v26 = vsel %vm1116_vm10, %v1118_v40, %v1114_v54 }
 0x657   :  { %v1077_v33 = vmul.f32 %v3942_v36, %v1058_v37  ;;  %vm1082_vm11 = vweird.f32 %v3942_v36  ;;  %v1088_v28 = vor.u32 1.1754944e-38, %v1087_v29  ;;  %vm1086_vm14 = vcmp.eq.f32.partialorder %v1085_v30, 8.507059e+37 }
 0x658   :  { %vm1083_vm13 = vmor %vm1081_vm12, %vm1082_vm11 }
 0x680   :  { %v1126_v44 = vpop.permute.xlu2 %1125 }
 0x698   :  { %v1150_v35 = vpop.permute.xlu2 %1149 }
 0x699   :  { %v1128_v32 = vpop.permute.xlu0 %1127 }
 0x69a   :  { %v1132_v62 = vmul.f32 %v1128_v32, %v4867_v50  ;;  %v1078_v32 = vsub.f32 1.0, %v1077_v33 }
 0x69c   :  { %v1154_v3 = vadd.f32 %v1150_v35, %v1132_v62  ;;  %v1079_v51 = vmul.f32 %v3942_v36, %v1078_v32  ;;  %v1131_v62 = vmul.f32 %v1126_v44, %v4865_v11  ;;  %v2104_v32 = vsel %vm608_vm5, %v4798_v20, %v4842_v27 }
 0x69e   :  { %3943 = vtanh.f32 %v1154_v3  ;;  %v1323_v45 = vrot.slane %v1154_v3, 7  ;;  %v1080_v47 = vadd.f32 %v3942_v36, %v1079_v51 }
 0x6a0   :  { %v1084_v39 = vsel %vm1083_vm13, %v3942_v36, %v1080_v47 }
 0x6a1   :  { %v1089_v40 = vsel %vm1086_vm14, %v1088_v28, %v1084_v39 }
 0x6a4   :  { %v3944_v25 = vpop.eup %3943 }
 0x6a5   :  { %v1168_v12 = vmul.f32 %v3944_v25, %v1119_v26  ;;  %1161 = vrot.lane.b32.xlu1 %v3944_v25, %s4446_s29  ;;  %v2105_v25 = vsel %vm608_vm5, %v4794_v34, %v4845_v13 }
 0x6a7   :  { %v4887_v37 = vsel %vm2106_vm15, %v4839_v38, %v1168_v12 }
 0x6ad   :  { %1326 = vrot.lane.b32.xlu1 %v1323_v45, %s4447_s30 }
 0x6af   :  { %v1148_v35 = vpop.permute.xlu1 %1147 }
 0x6b0   :  { %v1153_v31 = vadd.f32 %v1148_v35, %v1131_v62 }
 0x6b2   :  { %3945 = vtanh.f32 %v1153_v31  ;;  %v1322_v44 = vrot.slane %v1153_v31, 7 }
 0x6b8   :  { %v3946_v54 = vpop.eup %3945 }
 0x6b9   :  { %v1167_v3 = vmul.f32 %v3946_v54, %v1089_v40  ;;  %1159 = vrot.lane.b32.xlu0 %v3946_v54, %s4446_s29 }
 0x6bb   :  { %v4882_v45 = vsel %vm2106_vm15, %v4834_v58, %v1167_v3 }
 0x6c1   :  { %1324 = vrot.lane.b32.xlu0 %v1322_v44, %s4447_s30 }
 0x717   :  { %v1162_v47 = vpop.permute.xlu1 %1161 }
 0x718   :  { %v1166_v36 = vmul.f32 %v1162_v47, %v4867_v50 }
 0x71a   :  { %v4894_v26 = vsel %vm2106_vm15, %v2105_v25, %v1166_v36  ;;  %v1172_v51 = vrot.slane %v1166_v36, 1 }
 0x72b   :  { %v1160_v33 = vpop.permute.xlu0 %1159 }
 0x72c   :  { %v1165_v58 = vmul.f32 %v1160_v33, %v4865_v11 }
 0x72e   :  { %v1171_v38 = vrot.slane %v1165_v58, 2  ;;  %v4901_v12 = vsel %vm2106_vm15, %v2104_v32, %v1165_v58 }
 0x730   :  { %v1173_v50 = vsel %vm431_vm3, %v1172_v51, %v1171_v38 }
 0x731   :  { %1174 = vrot.lane.b32.xlu2 %v1173_v50, %s4447_s30 }
 0x733   :  { %v1325_v38 = vpop.permute.xlu0 %1324 }
 0x78b   :  { %v1175_v34 = vpop.permute.xlu2 %1174 }
 0x78c   :  { %3787 = vmatmul.msk.f32.vlgmr.msra.gmra.mxu3 %vm155_vm0, %v1175_v34  ;;  %3788 = vmatmul.msk.f32.vlgmr.msra.gmra.mxu2 %vm155_vm0, %v1175_v34 }
 0x78d   :  { %1564 = vmatpush.msra.mxu3 %v4671_v55  ;;  %1584 = vmatpush.msra.mxu2 %v4733_v21 }
 0x78f   :  { %1565 = vmatpush.msra.mxu3 %v4673_v56  ;;  %1585 = vmatpush.msra.mxu2 %v4737_v22 }
 0x791   :  { %1566 = vmatpush.msra.mxu3 %v4682_v59  ;;  %1586 = vmatpush.msra.mxu2 %v4740_v23 }
 0x793   :  { %1567 = vmatpush.msra.mxu3 %v4693_v63  ;;  %1587 = vmatpush.msra.mxu2 %v4743_v24 }
 0x80f   :  { %v1195_v20 = vpop.f32.mrf.mxu3 }
 0x810   :  { %v1220_v27 = vrot.slane %v1195_v20, 5  ;;  %v1222_v13 = vrot.slane %v1195_v20, 6  ;;  %v1327_v20 = vpop.permute.xlu1 %1326 }
 0x812   :  { %v1228_v11 = vadd.f32 %v1220_v27, %v4761_v6  ;;  %v1230_v55 = vadd.f32 %v1222_v13, %v4765_v9 }
 0x814   :  { %v3789_v21 = vmul.f32 -1.442695, %v1228_v11  ;;  %v3791_v62 = vmul.f32 -1.442695, %v1230_v55  ;;  %3947 = vtanh.f32 %v1228_v11 }
 0x815   :  { %3949 = vtanh.f32 %v1230_v55  ;;  %v1215_v55 = vpop.f32.mrf.mxu2 }
 0x816   :  { %3951 = vpow2.f32 %v3789_v21  ;;  %v1223_v21 = vrot.slane %v1215_v55, 6 }
 0x817   :  { %3953 = vpow2.f32 %v3791_v62 }
 0x818   :  { %v1231_v62 = vadd.f32 %v1223_v21, %v4767_v10 }
 0x81a   :  { %v3948_v56 = vpop.eup %3947 }
 0x81b   :  { %v3950_v59 = vpop.eup %3949  ;;  %1312 = vrot.lane.b32.xlu2 %v3948_v56, %s4445_s28  ;;  %v3792_v56 = vmul.f32 -1.442695, %v1231_v62 }
 0x81c   :  { %v3952_v63 = vpop.eup %3951  ;;  %1314 = vrot.lane.b32.xlu0 %v3950_v59, %s4445_s28 }
 0x81d   :  { %v3954_v22 = vpop.eup %3953  ;;  %v1244_v23 = vadd.f32 1.0, %v3952_v63  ;;  %v1221_v63 = vrot.slane %v1215_v55, 5 }
 0x81e   :  { %v1246_v24 = vadd.f32 1.0, %v3954_v22 }
 0x81f   :  { %3955 = vrcp.f32 %v1244_v23  ;;  %v1259_v54 = vand.u32 2147483648, %v1244_v23  ;;  %v1257_v44 = vand.u32 2147483647, %v1244_v23  ;;  %vm1253_vm4 = vweird.f32 %v1244_v23 }
 0x820   :  { %3957 = vrcp.f32 %v1246_v24  ;;  %v1289_v40 = vand.u32 2147483648, %v1246_v24  ;;  %v1287_v36 = vand.u32 2147483647, %v1246_v24  ;;  %vm1283_vm6 = vweird.f32 %v1246_v24 }
 0x821   :  { %v1260_v58 = vor.u32 1.1754944e-38, %v1259_v54  ;;  %vm1258_vm9 = vcmp.eq.f32.partialorder %v1257_v44, 8.507059e+37  ;;  %3959 = vpow2.f32 %v3792_v56 }
 0x822   :  { %v1290_v32 = vor.u32 1.1754944e-38, %v1289_v40  ;;  %vm1288_vm10 = vcmp.eq.f32.partialorder %v1287_v36, 8.507059e+37 }
 0x825   :  { %v3956_v35 = vpop.eup %3955 }
 0x826   :  { %v3958_v31 = vpop.eup %3957  ;;  %v1249_v29 = vmul.f32 %v3956_v35, %v1244_v23  ;;  %vm1254_vm1 = vweird.f32 %v3956_v35  ;;  %v1229_v23 = vadd.f32 %v1221_v63, %v4763_v7 }
 0x827   :  { %v1279_v30 = vmul.f32 %v3958_v31, %v1246_v24  ;;  %vm1284_vm2 = vweird.f32 %v3958_v31  ;;  %vm1255_vm7 = vmor %vm1253_vm4, %vm1254_vm1  ;;  %v3960_v59 = vpop.eup %3959 }
 0x828   :  { %v1250_v39 = vsub.f32 1.0, %v1249_v29  ;;  %vm1285_vm8 = vmor %vm1283_vm6, %vm1284_vm2  ;;  %v1247_v22 = vadd.f32 1.0, %v3960_v59  ;;  %v3790_v24 = vmul.f32 -1.442695, %v1229_v23 }
 0x829   :  { %v1280_v28 = vsub.f32 1.0, %v1279_v30 }
 0x82a   :  { %v1251_v3 = vmul.f32 %v3956_v35, %v1250_v39  ;;  %3961 = vrcp.f32 %v1247_v22  ;;  %vm1298_vm12 = vweird.f32 %v1247_v22 }
 0x82b   :  { %v1281_v47 = vmul.f32 %v3958_v31, %v1280_v28  ;;  %3963 = vpow2.f32 %v3790_v24 }
 0x82c   :  { %v1252_v25 = vadd.f32 %v3956_v35, %v1251_v3 }
 0x82d   :  { %v1282_v33 = vadd.f32 %v3958_v31, %v1281_v47 }
 0x82e   :  { %v1256_v51 = vsel %vm1255_vm7, %v3956_v35, %v1252_v25  ;;  %v1304_v25 = vand.u32 2147483648, %v1247_v22  ;;  %vm2109_vm7 = vcmask 1042432  }
 0x82f   :  { %v1286_v50 = vsel %vm1285_vm8, %v3958_v31, %v1282_v33  ;;  %v4919_v34 = vsel %vm1258_vm9, %v1260_v58, %v1256_v51  ;;  %v1302_v33 = vand.u32 2147483647, %v1247_v22 }
 0x830   :  { %v4921_v27 = vsel %vm1288_vm10, %v1290_v32, %v1286_v50  ;;  %v1330_v13 = vmul.f32 %v1325_v38, %v4919_v34  ;;  %v3962_v35 = vpop.eup %3961  ;;  %v1305_v51 = vor.u32 1.1754944e-38, %v1304_v25 }
 0x831   :  { %v1331_v11 = vmul.f32 %v1327_v20, %v4921_v27  ;;  %v1294_v31 = vmul.f32 %v3962_v35, %v1247_v22  ;;  %v3964_v30 = vpop.eup %3963  ;;  %vm1299_vm11 = vweird.f32 %v3962_v35  ;;  %vm1303_vm14 = vcmp.eq.f32.partialorder %v1302_v33, 8.507059e+37 }
 0x832   :  { %1334 = vrot.lane.b32.xlu1 %v1330_v13, %s4446_s29  ;;  %v1245_v28 = vadd.f32 1.0, %v3964_v30  ;;  %vm1300_vm13 = vmor %vm1298_vm12, %vm1299_vm11 }
 0x833   :  { %1336 = vrot.lane.b32.xlu2 %v1331_v11, %s4446_s29  ;;  %v1295_v39 = vsub.f32 1.0, %v1294_v31 }
 0x834   :  { %3965 = vrcp.f32 %v1245_v28  ;;  %v1274_v22 = vand.u32 2147483648, %v1245_v28  ;;  %vm1268_vm2 = vweird.f32 %v1245_v28  ;;  %v1272_v23 = vand.u32 2147483647, %v1245_v28 }
 0x835   :  { %v1296_v54 = vmul.f32 %v3962_v35, %v1295_v39 }
 0x836   :  { %vm1273_vm6 = vcmp.eq.f32.partialorder %v1272_v23, 8.507059e+37 }
 0x837   :  { %v1297_v36 = vadd.f32 %v3962_v35, %v1296_v54 }
 0x839   :  { %v1301_v58 = vsel %vm1300_vm13, %v3962_v35, %v1297_v36  ;;  %v1275_v35 = vor.u32 1.1754944e-38, %v1274_v22 }
 0x83a   :  { %v3966_v32 = vpop.eup %3965  ;;  %v1306_v50 = vsel %vm1303_vm14, %v1305_v51, %v1301_v58  ;;  %v4972_v51 = vld [vmem:[#allocation2 + $0x40] sm:$0xff] }
 0x83b   :  { %v1264_v20 = vmul.f32 %v3966_v32, %v1245_v28  ;;  %vm1269_vm1 = vweird.f32 %v3966_v32 }
 0x83c   :  { %vm1270_vm4 = vmor %vm1268_vm2, %vm1269_vm1 }
 0x83d   :  { %v1265_v11 = vsub.f32 1.0, %v1264_v20 }
 0x83f   :  { %v1266_v21 = vmul.f32 %v3966_v32, %v1265_v11 }
 0x841   :  { %v1267_v63 = vadd.f32 %v3966_v32, %v1266_v21 }
 0x843   :  { %v1271_v24 = vsel %vm1270_vm4, %v3966_v32, %v1267_v63  ;;  %v4969_v32 = vld [vmem:[#allocation2 + $0x38] sm:$0xff] }
 0x844   :  { %v1276_v30 = vsel %vm1273_vm6, %v1275_v35, %v1271_v24 }
 0x875   :  { %v1313_v29 = vpop.permute.xlu2 %1312 }
 0x876   :  { %v1318_v62 = vmul.f32 %v1313_v29, %v4919_v34 }
 0x88d   :  { %v1337_v44 = vpop.permute.xlu2 %1336 }
 0x88e   :  { %v1315_v40 = vpop.permute.xlu0 %1314 }
 0x88f   :  { %v1319_v3 = vmul.f32 %v1315_v40, %v4921_v27 }
 0x891   :  { %v1341_v47 = vadd.f32 %v1337_v44, %v1319_v3 }
 0x893   :  { %3967 = vtanh.f32 %v1341_v47  ;;  %v1510_v55 = vrot.slane %v1341_v47, 7 }
 0x899   :  { %v3968_v38 = vpop.eup %3967 }
 0x89a   :  { %v1355_v13 = vmul.f32 %v3968_v38, %v1306_v50  ;;  %1348 = vrot.lane.b32.xlu1 %v3968_v38, %s4446_s29  ;;  %v4975_v38 = vld [vmem:[#allocation2] sm:$0xff]  ;;  %v4978_v50 = vld [vmem:[#allocation2 + $0x8] sm:$0xff] }
 0x89c   :  { %v4937_v29 = vsel %vm2109_vm7, %v4887_v37, %v1355_v13 }
 0x8a2   :  { %1513 = vrot.lane.b32.xlu1 %v1510_v55, %s4447_s30 }
 0x8a4   :  { %v1335_v56 = vpop.permute.xlu1 %1334 }
 0x8a5   :  { %v1340_v59 = vadd.f32 %v1335_v56, %v1318_v62 }
 0x8a7   :  { %3969 = vtanh.f32 %v1340_v59  ;;  %v1509_v54 = vrot.slane %v1340_v59, 7 }
 0x8ad   :  { %v3970_v31 = vpop.eup %3969 }
 0x8ae   :  { %v1354_v39 = vmul.f32 %v3970_v31, %v1276_v30  ;;  %1346 = vrot.lane.b32.xlu0 %v3970_v31, %s4446_s29 }
 0x8b0   :  { %v4941_v28 = vsel %vm2109_vm7, %v4882_v45, %v1354_v39 }
 0x8b6   :  { %1511 = vrot.lane.b32.xlu0 %v1509_v54, %s4447_s30 }
 0x90c   :  { %v1349_v40 = vpop.permute.xlu1 %1348 }
 0x90d   :  { %v1353_v3 = vmul.f32 %v1349_v40, %v4921_v27  ;;  %v4963_v27 = vld [vmem:[#allocation2 + $0x70] sm:$0xff] }
 0x90f   :  { %v4946_v44 = vsel %vm2109_vm7, %v4894_v26, %v1353_v3  ;;  %v1359_v25 = vrot.slane %v1353_v3, 2  ;;  %v4957_v26 = vld [vmem:[#allocation2 + $0xa8] sm:$0xff] }
 0x920   :  { %v1347_v47 = vpop.permute.xlu0 %1346 }
 0x921   :  { %v1352_v36 = vmul.f32 %v1347_v47, %v4919_v34  ;;  %v4960_v34 = vld [vmem:[#allocation2 + $0xb0] sm:$0xff] }
 0x923   :  { %v1358_v33 = vrot.slane %v1352_v36, 3  ;;  %v4951_v37 = vsel %vm2109_vm7, %v4901_v12, %v1352_v36  ;;  %v4966_v12 = vld [vmem:[#allocation2 + $0x78] sm:$0xff] }
 0x925   :  { %v1360_v58 = vsel %vm431_vm3, %v1359_v25, %v1358_v33 }
 0x926   :  { %1361 = vrot.lane.b32.xlu2 %v1360_v58, %s4447_s30 }
 0x980   :  { %v1362_v45 = vpop.permute.xlu2 %1361 }
 0x981   :  { %3793 = vmatmul.msk.f32.vlgmr.msrb.gmra.mxu3 %vm155_vm0, %v1362_v45  ;;  %3794 = vmatmul.msk.f32.vlgmr.msrb.gmra.mxu2 %vm155_vm0, %v1362_v45 }
 0x982   :  { %1751 = vmatpush.msrb.mxu3 %v4957_v26  ;;  %1771 = vmatpush.msrb.mxu2 %v4960_v34 }
 0x984   :  { %1752 = vmatpush.msrb.mxu3 %v4963_v27  ;;  %1772 = vmatpush.msrb.mxu2 %v4966_v12 }
 0x986   :  { %1753 = vmatpush.msrb.mxu3 %v4969_v32  ;;  %1773 = vmatpush.msrb.mxu2 %v4972_v51 }
 0x988   :  { %1754 = vmatpush.msrb.mxu3 %v4975_v38  ;;  %1774 = vmatpush.msrb.mxu2 %v4978_v50 }
 0xa04   :  { %v1382_v20 = vpop.f32.mrf.mxu3 }
 0xa05   :  { %v1407_v13 = vrot.slane %v1382_v20, 4  ;;  %v1409_v11 = vrot.slane %v1382_v20, 5 }
 0xa07   :  { %v1415_v55 = vadd.f32 %v1407_v13, %v4761_v6  ;;  %v1417_v21 = vadd.f32 %v1409_v11, %v4765_v9 }
 0xa09   :  { %v3795_v62 = vmul.f32 -1.442695, %v1415_v55  ;;  %v3797_v56 = vmul.f32 -1.442695, %v1417_v21  ;;  %3971 = vtanh.f32 %v1415_v55 }
 0xa0a   :  { %3973 = vtanh.f32 %v1417_v21 }
 0xa0b   :  { %3975 = vpow2.f32 %v3795_v62  ;;  %v1512_v62 = vpop.permute.xlu0 %1511 }
 0xa0c   :  { %3977 = vpow2.f32 %v3797_v56 }
 0xa0f   :  { %v3972_v59 = vpop.eup %3971 }
 0xa10   :  { %v3974_v63 = vpop.eup %3973  ;;  %1499 = vrot.lane.b32.xlu2 %v3972_v59, %s4445_s28 }
 0xa11   :  { %v3976_v22 = vpop.eup %3975  ;;  %1501 = vrot.lane.b32.xlu0 %v3974_v63, %s4445_s28  ;;  %v1514_v63 = vpop.permute.xlu1 %1513 }
 0xa12   :  { %v3978_v23 = vpop.eup %3977  ;;  %v1431_v24 = vadd.f32 1.0, %v3976_v22 }
 0xa13   :  { %v1433_v35 = vadd.f32 1.0, %v3978_v23 }
 0xa14   :  { %3979 = vrcp.f32 %v1431_v24  ;;  %v1446_v47 = vand.u32 2147483648, %v1431_v24  ;;  %v1444_v33 = vand.u32 2147483647, %v1431_v24  ;;  %vm1440_vm10 = vweird.f32 %v1431_v24 }
 0xa15   :  { %3981 = vrcp.f32 %v1433_v35  ;;  %v1476_v36 = vand.u32 2147483648, %v1433_v35  ;;  %v1474_v45 = vand.u32 2147483647, %v1433_v35  ;;  %vm1470_vm11 = vweird.f32 %v1433_v35 }
 0xa16   :  { %v1447_v11 = vor.u32 1.1754944e-38, %v1446_v47  ;;  %vm1445_vm14 = vcmp.eq.f32.partialorder %v1444_v33, 8.507059e+37 }
 0xa17   :  { %v1477_v55 = vor.u32 1.1754944e-38, %v1476_v36  ;;  %vm1475_vm1 = vcmp.eq.f32.partialorder %v1474_v45, 8.507059e+37 }
 0xa1a   :  { %v3980_v31 = vpop.eup %3979 }
 0xa1b   :  { %v3982_v30 = vpop.eup %3981  ;;  %v1436_v39 = vmul.f32 %v3980_v31, %v1431_v24  ;;  %vm1441_vm8 = vweird.f32 %v3980_v31 }
 0xa1c   :  { %v1466_v54 = vmul.f32 %v3982_v30, %v1433_v35  ;;  %vm1471_vm9 = vweird.f32 %v3982_v30  ;;  %vm1442_vm12 = vmor %vm1440_vm10, %vm1441_vm8  ;;  %v1402_v35 = vpop.f32.mrf.mxu2 }
 0xa1d   :  { %v1437_v40 = vsub.f32 1.0, %v1436_v39  ;;  %vm1472_vm13 = vmor %vm1470_vm11, %vm1471_vm9  ;;  %v1410_v39 = vrot.slane %v1402_v35, 5 }
 0xa1e   :  { %v1467_v3 = vsub.f32 1.0, %v1466_v54 }
 0xa1f   :  { %v1438_v25 = vmul.f32 %v3980_v31, %v1437_v40  ;;  %v1408_v40 = vrot.slane %v1402_v35, 4 }
 0xa20   :  { %v1468_v58 = vmul.f32 %v3982_v30, %v1467_v3 }
 0xa21   :  { %v1439_v20 = vadd.f32 %v3980_v31, %v1438_v25  ;;  %v1416_v47 = vadd.f32 %v1408_v40, %v4763_v7 }
 0xa22   :  { %v1469_v13 = vadd.f32 %v3982_v30, %v1468_v58 }
 0xa23   :  { %v1443_v21 = vsel %vm1442_vm12, %v3980_v31, %v1439_v20  ;;  %v1418_v31 = vadd.f32 %v1410_v39, %v4767_v10  ;;  %v3796_v36 = vmul.f32 -1.442695, %v1416_v47 }
 0xa24   :  { %v1473_v56 = vsel %vm1472_vm13, %v3982_v30, %v1469_v13  ;;  %v4985_v59 = vsel %vm1445_vm14, %v1447_v11, %v1443_v21  ;;  %vm2112_vm13 = vcmask 1043456  }
 0xa25   :  { %v4987_v22 = vsel %vm1475_vm1, %v1477_v55, %v1473_v56  ;;  %v1517_v23 = vmul.f32 %v1512_v62, %v4985_v59  ;;  %v3798_v54 = vmul.f32 -1.442695, %v1418_v31 }
 0xa26   :  { %v1518_v24 = vmul.f32 %v1514_v63, %v4987_v22 }
 0xa27   :  { %1521 = vrot.lane.b32.xlu1 %v1517_v23, %s4446_s29  ;;  %3983 = vpow2.f32 %v3798_v54 }
 0xa28   :  { %1523 = vrot.lane.b32.xlu2 %v1518_v24, %s4446_s29 }
 0xa2d   :  { %v3984_v30 = vpop.eup %3983 }
 0xa2e   :  { %v1434_v3 = vadd.f32 1.0, %v3984_v30 }
 0xa30   :  { %3985 = vrcp.f32 %v1434_v3  ;;  %v1491_v23 = vand.u32 2147483648, %v1434_v3  ;;  %vm1485_vm4 = vweird.f32 %v1434_v3  ;;  %v1489_v24 = vand.u32 2147483647, %v1434_v3 }
 0xa31   :  { %3987 = vpow2.f32 %v3796_v36 }
 0xa32   :  { %v1492_v31 = vor.u32 1.1754944e-38, %v1491_v23  ;;  %vm1490_vm8 = vcmp.eq.f32.partialorder %v1489_v24, 8.507059e+37 }
 0xa36   :  { %v3986_v25 = vpop.eup %3985 }
 0xa37   :  { %v1481_v33 = vmul.f32 %v3986_v25, %v1434_v3  ;;  %v3988_v45 = vpop.eup %3987  ;;  %vm1486_vm2 = vweird.f32 %v3986_v25 }
 0xa38   :  { %v1432_v13 = vadd.f32 1.0, %v3988_v45  ;;  %vm1487_vm6 = vmor %vm1485_vm4, %vm1486_vm2 }
 0xa39   :  { %v1482_v20 = vsub.f32 1.0, %v1481_v33 }
 0xa3a   :  { %3989 = vrcp.f32 %v1432_v13  ;;  %vm1455_vm10 = vweird.f32 %v1432_v13 }
 0xa3b   :  { %v1483_v11 = vmul.f32 %v3986_v25, %v1482_v20 }
 0xa3d   :  { %v1484_v63 = vadd.f32 %v3986_v25, %v1483_v11 }
 0xa3f   :  { %v1488_v35 = vsel %vm1487_vm6, %v3986_v25, %v1484_v63  ;;  %v1461_v25 = vand.u32 2147483648, %v1432_v13 }
 0xa40   :  { %v3990_v39 = vpop.eup %3989  ;;  %v1493_v30 = vsel %vm1490_vm8, %v1492_v31, %v1488_v35 }
 0xa41   :  { %v1451_v40 = vmul.f32 %v3990_v39, %v1432_v13  ;;  %vm1456_vm9 = vweird.f32 %v3990_v39  ;;  %v1462_v63 = vor.u32 1.1754944e-38, %v1461_v25 }
 0xa42   :  { %vm1457_vm11 = vmor %vm1455_vm10, %vm1456_vm9 }
 0xa43   :  { %v1452_v36 = vsub.f32 1.0, %v1451_v40 }
 0xa45   :  { %v1453_v45 = vmul.f32 %v3990_v39, %v1452_v36 }
 0xa6a   :  { %v1500_v58 = vpop.permute.xlu2 %1499 }
 0xa6b   :  { %v1505_v20 = vmul.f32 %v1500_v58, %v4985_v59 }
 0xa82   :  { %v1524_v62 = vpop.permute.xlu2 %1523 }
 0xa83   :  { %v1502_v55 = vpop.permute.xlu0 %1501 }
 0xa84   :  { %v1506_v21 = vmul.f32 %v1502_v55, %v4987_v22  ;;  %v1454_v55 = vadd.f32 %v3990_v39, %v1453_v45 }
 0xa86   :  { %v1528_v56 = vadd.f32 %v1524_v62, %v1506_v21  ;;  %v1459_v21 = vand.u32 2147483647, %v1432_v13  ;;  %v1458_v62 = vsel %vm1457_vm11, %v3990_v39, %v1454_v55 }
 0xa88   :  { %3991 = vtanh.f32 %v1528_v56  ;;  %v1697_v33 = vrot.slane %v1528_v56, 7  ;;  %vm1460_vm12 = vcmp.eq.f32.partialorder %v1459_v21, 8.507059e+37 }
 0xa89   :  { %v1463_v24 = vsel %vm1460_vm12, %v1462_v63, %v1458_v62 }
 0xa8e   :  { %v3992_v54 = vpop.eup %3991 }
 0xa8f   :  { %v1542_v47 = vmul.f32 %v3992_v54, %v1493_v30  ;;  %1535 = vrot.lane.b32.xlu1 %v3992_v54, %s4446_s29 }
 0xa91   :  { %v5003_v58 = vsel %vm2112_vm13, %v4937_v29, %v1542_v47 }
 0xa97   :  { %1700 = vrot.lane.b32.xlu1 %v1697_v33, %s4447_s30 }
 0xa99   :  { %v1522_v11 = vpop.permute.xlu1 %1521 }
 0xa9a   :  { %v1527_v3 = vadd.f32 %v1522_v11, %v1505_v20 }
 0xa9c   :  { %3993 = vtanh.f32 %v1527_v3  ;;  %v1696_v35 = vrot.slane %v1527_v3, 7 }
 0xaa2   :  { %v3994_v23 = vpop.eup %3993 }
 0xaa3   :  { %v1541_v56 = vmul.f32 %v3994_v23, %v1463_v24  ;;  %1533 = vrot.lane.b32.xlu0 %v3994_v23, %s4446_s29 }
 0xaa5   :  { %v5007_v13 = vsel %vm2112_vm13, %v4941_v28, %v1541_v56 }
 0xaab   :  { %1698 = vrot.lane.b32.xlu0 %v1696_v35, %s4447_s30 }
 0xb01   :  { %v1536_v39 = vpop.permute.xlu1 %1535 }
 0xb02   :  { %v1540_v31 = vmul.f32 %v1536_v39, %v4987_v22 }
 0xb04   :  { %v5012_v54 = vsel %vm2112_vm13, %v4946_v44, %v1540_v31  ;;  %v1546_v36 = vrot.slane %v1540_v31, 3 }
 0xb15   :  { %v1534_v30 = vpop.permute.xlu0 %1533 }
 0xb16   :  { %v1539_v40 = vmul.f32 %v1534_v30, %v4985_v59 }
 0xb18   :  { %v1545_v33 = vrot.slane %v1539_v40, 4  ;;  %v5017_v29 = vsel %vm2112_vm13, %v4951_v37, %v1539_v40 }
 0xb1a   :  { %v1547_v47 = vsel %vm431_vm3, %v1546_v36, %v1545_v33 }
 0xb1b   :  { %1548 = vrot.lane.b32.xlu2 %v1547_v47, %s4447_s30 }
 0xb1d   :  { %v1699_v33 = vpop.permute.xlu0 %1698 }
 0xb75   :  { %v1549_v28 = vpop.permute.xlu2 %1548 }
 0xb76   :  { %3799 = vmatmul.msk.f32.vlgmr.msra.gmra.mxu3 %vm155_vm0, %v1549_v28  ;;  %3800 = vmatmul.msk.f32.vlgmr.msra.gmra.mxu2 %vm155_vm0, %v1549_v28 }
 0xb77   :  { %1958 = vmatpush.msra.mxu2 %v4960_v34  ;;  %1938 = vmatpush.msra.mxu3 %v4957_v26 }
 0xb79   :  { %1959 = vmatpush.msra.mxu2 %v4966_v12  ;;  %1939 = vmatpush.msra.mxu3 %v4963_v27 }
 0xb7b   :  { %1960 = vmatpush.msra.mxu2 %v4972_v51  ;;  %1940 = vmatpush.msra.mxu3 %v4969_v32 }
 0xb7d   :  { %1961 = vmatpush.msra.mxu2 %v4978_v50  ;;  %1941 = vmatpush.msra.mxu3 %v4975_v38 }
 0xbf9   :  { %v1569_v44 = vpop.f32.mrf.mxu3 }
 0xbfa   :  { %v1594_v37 = vrot.slane %v1569_v44, 3  ;;  %v1596_v59 = vrot.slane %v1569_v44, 4  ;;  %v1701_v44 = vpop.permute.xlu1 %1700 }
 0xbfc   :  { %v1602_v22 = vadd.f32 %v1594_v37, %v4761_v6  ;;  %v1604_v34 = vadd.f32 %v1596_v59, %v4765_v9 }
 0xbfe   :  { %v3801_v26 = vmul.f32 -1.442695, %v1602_v22  ;;  %v3803_v45 = vmul.f32 -1.442695, %v1604_v34  ;;  %3995 = vtanh.f32 %v1602_v22 }
 0xbff   :  { %3997 = vtanh.f32 %v1604_v34  ;;  %v1589_v34 = vpop.f32.mrf.mxu2 }
 0xc00   :  { %3999 = vpow2.f32 %v3801_v26  ;;  %v1595_v26 = vrot.slane %v1589_v34, 3 }
 0xc01   :  { %4001 = vpow2.f32 %v3803_v45 }
 0xc02   :  { %v1603_v45 = vadd.f32 %v1595_v26, %v4763_v7 }
 0xc04   :  { %v3996_v27 = vpop.eup %3995 }
 0xc05   :  { %v3998_v12 = vpop.eup %3997  ;;  %1686 = vrot.lane.b32.xlu2 %v3996_v27, %s4445_s28  ;;  %v3802_v27 = vmul.f32 -1.442695, %v1603_v45 }
 0xc06   :  { %v4000_v32 = vpop.eup %3999  ;;  %1688 = vrot.lane.b32.xlu0 %v3998_v12, %s4445_s28 }
 0xc07   :  { %v4002_v51 = vpop.eup %4001  ;;  %v1618_v38 = vadd.f32 1.0, %v4000_v32 }
 0xc08   :  { %v1620_v50 = vadd.f32 1.0, %v4002_v51 }
 0xc09   :  { %4003 = vrcp.f32 %v1618_v38  ;;  %v1633_v62 = vand.u32 2147483648, %v1618_v38  ;;  %v1631_v24 = vand.u32 2147483647, %v1618_v38  ;;  %vm1627_vm2 = vweird.f32 %v1618_v38 }
 0xc0a   :  { %4005 = vrcp.f32 %v1620_v50  ;;  %v1663_v63 = vand.u32 2147483648, %v1620_v50  ;;  %v1661_v35 = vand.u32 2147483647, %v1620_v50  ;;  %vm1657_vm4 = vweird.f32 %v1620_v50 }
 0xc0b   :  { %v1634_v30 = vor.u32 1.1754944e-38, %v1633_v62  ;;  %vm1632_vm9 = vcmp.eq.f32.partialorder %v1631_v24, 8.507059e+37  ;;  %4007 = vpow2.f32 %v3802_v27 }
 0xc0c   :  { %v1664_v40 = vor.u32 1.1754944e-38, %v1663_v63  ;;  %vm1662_vm10 = vcmp.eq.f32.partialorder %v1661_v35, 8.507059e+37 }
 0xc0f   :  { %v4004_v20 = vpop.eup %4003 }
 0xc10   :  { %v4006_v11 = vpop.eup %4005  ;;  %v1623_v3 = vmul.f32 %v4004_v20, %v1618_v38  ;;  %vm1628_vm14 = vweird.f32 %v4004_v20 }
 0xc11   :  { %v1653_v55 = vmul.f32 %v4006_v11, %v1620_v50  ;;  %vm1658_vm1 = vweird.f32 %v4006_v11  ;;  %vm1629_vm6 = vmor %vm1627_vm2, %vm1628_vm14  ;;  %v4008_v32 = vpop.eup %4007 }
 0xc12   :  { %v1624_v25 = vsub.f32 1.0, %v1623_v3  ;;  %vm1659_vm8 = vmor %vm1657_vm4, %vm1658_vm1  ;;  %v1619_v51 = vadd.f32 1.0, %v4008_v32 }
 0xc13   :  { %v1654_v21 = vsub.f32 1.0, %v1653_v55 }
 0xc14   :  { %v1625_v23 = vmul.f32 %v4004_v20, %v1624_v25  ;;  %4009 = vrcp.f32 %v1619_v51  ;;  %vm1642_vm12 = vweird.f32 %v1619_v51 }
 0xc15   :  { %v1655_v56 = vmul.f32 %v4006_v11, %v1654_v21 }
 0xc16   :  { %v1626_v39 = vadd.f32 %v4004_v20, %v1625_v23 }
 0xc17   :  { %v1656_v31 = vadd.f32 %v4006_v11, %v1655_v56 }
 0xc18   :  { %v1630_v36 = vsel %vm1629_vm6, %v4004_v20, %v1626_v39  ;;  %v1648_v39 = vand.u32 2147483648, %v1619_v51 }
 0xc19   :  { %v1660_v47 = vsel %vm1659_vm8, %v4006_v11, %v1656_v31  ;;  %v5035_v28 = vsel %vm1632_vm9, %v1634_v30, %v1630_v36  ;;  %v1646_v31 = vand.u32 2147483647, %v1619_v51  ;;  %v1597_v30 = vrot.slane %v1589_v34, 4 }
 0xc1a   :  { %v5037_v37 = vsel %vm1662_vm10, %v1664_v40, %v1660_v47  ;;  %v1704_v59 = vmul.f32 %v1699_v33, %v5035_v28  ;;  %v4010_v3 = vpop.eup %4009  ;;  %v1649_v36 = vor.u32 1.1754944e-38, %v1648_v39  ;;  %vm2115_vm9 = vcmask 1044480  }
 0xc1b   :  { %v1705_v22 = vmul.f32 %v1701_v44, %v5037_v37  ;;  %v1638_v25 = vmul.f32 %v4010_v3, %v1619_v51  ;;  %vm1643_vm11 = vweird.f32 %v4010_v3  ;;  %vm1647_vm1 = vcmp.eq.f32.partialorder %v1646_v31, 8.507059e+37 }
 0xc1c   :  { %1708 = vrot.lane.b32.xlu1 %v1704_v59, %s4446_s29  ;;  %vm1644_vm14 = vmor %vm1642_vm12, %vm1643_vm11  ;;  %v1605_v44 = vadd.f32 %v1597_v30, %v4767_v10 }
 0xc1d   :  { %1710 = vrot.lane.b32.xlu2 %v1705_v22, %s4446_s29  ;;  %v1639_v21 = vsub.f32 1.0, %v1638_v25 }
 0xc1e   :  { %v3804_v22 = vmul.f32 -1.442695, %v1605_v44 }
 0xc1f   :  { %v1640_v63 = vmul.f32 %v4010_v3, %v1639_v21 }
 0xc21   :  { %v1641_v35 = vadd.f32 %v4010_v3, %v1640_v63 }
 0xc23   :  { %v1645_v40 = vsel %vm1644_vm14, %v4010_v3, %v1641_v35 }
 0xc24   :  { %v1650_v47 = vsel %vm1647_vm1, %v1649_v36, %v1645_v40 }
 0xc5f   :  { %v1687_v12 = vpop.permute.xlu2 %1686 }
 0xc60   :  { %v1692_v23 = vmul.f32 %v1687_v12, %v5035_v28 }
 0xc77   :  { %v1711_v20 = vpop.permute.xlu2 %1710 }
 0xc78   :  { %v1689_v38 = vpop.permute.xlu0 %1688 }
 0xc79   :  { %v1693_v50 = vmul.f32 %v1689_v38, %v5037_v37 }
 0xc7b   :  { %v1715_v11 = vadd.f32 %v1711_v20, %v1693_v50 }
 0xc7d   :  { %4011 = vtanh.f32 %v1715_v11  ;;  %v1884_v62 = vrot.slane %v1715_v11, 7 }
 0xc83   :  { %v4012_v55 = vpop.eup %4011 }
 0xc84   :  { %1722 = vrot.lane.b32.xlu1 %v4012_v55, %s4446_s29 }
 0xc8c   :  { %1887 = vrot.lane.b32.xlu1 %v1884_v62, %s4447_s30 }
 0xc8e   :  { %v1709_v24 = vpop.permute.xlu1 %1708 }
 0xc8f   :  { %v1714_v56 = vadd.f32 %v1709_v24, %v1692_v23 }
 0xc91   :  { %4013 = vtanh.f32 %v1714_v56  ;;  %v1883_v26 = vrot.slane %v1714_v56, 7 }
 0xc92   :  { %4015 = vpow2.f32 %v3804_v22 }
 0xc97   :  { %v4014_v33 = vpop.eup %4013 }
 0xc98   :  { %v1728_v59 = vmul.f32 %v4014_v33, %v1650_v47  ;;  %1720 = vrot.lane.b32.xlu0 %v4014_v33, %s4446_s29  ;;  %v4016_v45 = vpop.eup %4015 }
 0xc99   :  { %v1621_v27 = vadd.f32 1.0, %v4016_v45 }
 0xc9a   :  { %v5057_v63 = vsel %vm2115_vm9, %v5007_v13, %v1728_v59 }
 0xc9b   :  { %4017 = vrcp.f32 %v1621_v27  ;;  %v1678_v50 = vand.u32 2147483648, %v1621_v27  ;;  %vm1672_vm4 = vweird.f32 %v1621_v27  ;;  %v1676_v20 = vand.u32 2147483647, %v1621_v27 }
 0xc9d   :  { %v1679_v3 = vor.u32 1.1754944e-38, %v1678_v50  ;;  %vm1677_vm8 = vcmp.eq.f32.partialorder %v1676_v20, 8.507059e+37 }
 0xca0   :  { %1885 = vrot.lane.b32.xlu0 %v1883_v26, %s4447_s30 }
 0xca1   :  { %v4018_v12 = vpop.eup %4017 }
 0xca2   :  { %v1668_v34 = vmul.f32 %v4018_v12, %v1621_v27  ;;  %vm1673_vm2 = vweird.f32 %v4018_v12 }
 0xca3   :  { %vm1674_vm6 = vmor %vm1672_vm4, %vm1673_vm2 }
 0xca4   :  { %v1669_v32 = vsub.f32 1.0, %v1668_v34 }
 0xca6   :  { %v1670_v51 = vmul.f32 %v4018_v12, %v1669_v32 }
 0xca8   :  { %v1671_v38 = vadd.f32 %v4018_v12, %v1670_v51 }
 0xcaa   :  { %v1675_v11 = vsel %vm1674_vm6, %v4018_v12, %v1671_v38 }
 0xcab   :  { %v1680_v25 = vsel %vm1677_vm8, %v1679_v3, %v1675_v11 }
 0xcac   :  { %v1729_v21 = vmul.f32 %v4012_v55, %v1680_v25 }
 0xcae   :  { %v5053_v62 = vsel %vm2115_vm9, %v5003_v58, %v1729_v21 }
 0xcf6   :  { %v1723_v23 = vpop.permute.xlu1 %1722 }
 0xcf7   :  { %v1727_v24 = vmul.f32 %v1723_v23, %v5037_v37 }
 0xcf9   :  { %v5062_v56 = vsel %vm2115_vm9, %v5012_v54, %v1727_v24  ;;  %v1733_v31 = vrot.slane %v1727_v24, 4 }
 0xd0a   :  { %v1721_v35 = vpop.permute.xlu0 %1720 }
 0xd0b   :  { %v1726_v39 = vmul.f32 %v1721_v35, %v5035_v28 }
 0xd0d   :  { %v1732_v55 = vrot.slane %v1726_v39, 5  ;;  %v5067_v58 = vsel %vm2115_vm9, %v5017_v29, %v1726_v39 }
 0xd0f   :  { %v1734_v30 = vsel %vm431_vm3, %v1733_v31, %v1732_v55 }
 0xd10   :  { %1735 = vrot.lane.b32.xlu2 %v1734_v30, %s4447_s30 }
 0xd12   :  { %v1886_v55 = vpop.permute.xlu0 %1885 }
 0xd6a   :  { %v1736_v13 = vpop.permute.xlu2 %1735 }
 0xd6b   :  { %3805 = vmatmul.msk.f32.vlgmr.msrb.gmra.mxu3 %vm155_vm0, %v1736_v13  ;;  %3806 = vmatmul.msk.f32.vlgmr.msrb.gmra.mxu2 %vm155_vm0, %v1736_v13 }
 0xdee   :  { %v1756_v54 = vpop.f32.mrf.mxu3 }
 0xdef   :  { %v1781_v37 = vrot.slane %v1756_v54, 2  ;;  %v1783_v40 = vrot.slane %v1756_v54, 3  ;;  %v1888_v54 = vpop.permute.xlu1 %1887 }
 0xdf1   :  { %v1789_v28 = vadd.f32 %v1781_v37, %v4761_v6  ;;  %v1791_v36 = vadd.f32 %v1783_v40, %v4765_v9 }
 0xdf3   :  { %v3807_v33 = vmul.f32 -1.442695, %v1789_v28  ;;  %v3809_v47 = vmul.f32 -1.442695, %v1791_v36  ;;  %4019 = vtanh.f32 %v1789_v28 }
 0xdf4   :  { %4021 = vtanh.f32 %v1791_v36  ;;  %v1776_v36 = vpop.f32.mrf.mxu2 }
 0xdf5   :  { %4023 = vpow2.f32 %v3807_v33  ;;  %v1782_v33 = vrot.slane %v1776_v36, 2 }
 0xdf6   :  { %4025 = vpow2.f32 %v3809_v47 }
 0xdf7   :  { %v1790_v47 = vadd.f32 %v1782_v33, %v4763_v7 }
 0xdf9   :  { %v4020_v29 = vpop.eup %4019 }
 0xdfa   :  { %v4022_v44 = vpop.eup %4021  ;;  %1873 = vrot.lane.b32.xlu2 %v4020_v29, %s4445_s28  ;;  %v3808_v29 = vmul.f32 -1.442695, %v1790_v47 }
 0xdfb   :  { %v4024_v59 = vpop.eup %4023  ;;  %1875 = vrot.lane.b32.xlu0 %v4022_v44, %s4445_s28 }
 0xdfc   :  { %v4026_v22 = vpop.eup %4025  ;;  %v1805_v26 = vadd.f32 1.0, %v4024_v59 }
 0xdfd   :  { %v1807_v45 = vadd.f32 1.0, %v4026_v22 }
 0xdfe   :  { %4027 = vrcp.f32 %v1805_v26  ;;  %v1820_v50 = vand.u32 2147483648, %v1805_v26  ;;  %v1818_v3 = vand.u32 2147483647, %v1805_v26  ;;  %vm1814_vm12 = vweird.f32 %v1805_v26 }
 0xdff   :  { %4029 = vrcp.f32 %v1807_v45  ;;  %v1850_v20 = vand.u32 2147483648, %v1807_v45  ;;  %v1848_v21 = vand.u32 2147483647, %v1807_v45  ;;  %vm1844_vm14 = vweird.f32 %v1807_v45 }
 0xe00   :  { %v1821_v35 = vor.u32 1.1754944e-38, %v1820_v50  ;;  %vm1819_vm4 = vcmp.eq.f32.partialorder %v1818_v3, 8.507059e+37  ;;  %4031 = vpow2.f32 %v3808_v29 }
 0xe01   :  { %v1851_v39 = vor.u32 1.1754944e-38, %v1850_v20  ;;  %vm1849_vm6 = vcmp.eq.f32.partialorder %v1848_v21, 8.507059e+37 }
 0xe04   :  { %v4028_v27 = vpop.eup %4027 }
 0xe05   :  { %v4030_v12 = vpop.eup %4029  ;;  %v1810_v34 = vmul.f32 %v4028_v27, %v1805_v26  ;;  %vm1815_vm10 = vweird.f32 %v4028_v27 }
 0xe06   :  { %v1840_v32 = vmul.f32 %v4030_v12, %v1807_v45  ;;  %vm1845_vm11 = vweird.f32 %v4030_v12  ;;  %vm1816_vm1 = vmor %vm1814_vm12, %vm1815_vm10  ;;  %v4032_v59 = vpop.eup %4031 }
 0xe07   :  { %v1811_v51 = vsub.f32 1.0, %v1810_v34  ;;  %vm1846_vm2 = vmor %vm1844_vm14, %vm1845_vm11  ;;  %v1806_v22 = vadd.f32 1.0, %v4032_v59 }
 0xe08   :  { %v1841_v38 = vsub.f32 1.0, %v1840_v32 }
 0xe09   :  { %v1812_v11 = vmul.f32 %v4028_v27, %v1811_v51  ;;  %4033 = vrcp.f32 %v1806_v22  ;;  %v1835_v21 = vand.u32 2147483648, %v1806_v22  ;;  %vm1829_vm10 = vweird.f32 %v1806_v22 }
 0xe0a   :  { %v1842_v25 = vmul.f32 %v4030_v12, %v1841_v38 }
 0xe0b   :  { %v1813_v23 = vadd.f32 %v4028_v27, %v1812_v11 }
 0xe0c   :  { %v1843_v24 = vadd.f32 %v4030_v12, %v1842_v25 }
 0xe0d   :  { %v1817_v31 = vsel %vm1816_vm1, %v4028_v27, %v1813_v23  ;;  %v1833_v23 = vand.u32 2147483647, %v1806_v22 }
 0xe0e   :  { %v1847_v30 = vsel %vm1846_vm2, %v4030_v12, %v1843_v24  ;;  %v5077_v13 = vsel %vm1819_vm4, %v1821_v35, %v1817_v31  ;;  %v1784_v24 = vrot.slane %v1776_v36, 3 }
 0xe0f   :  { %v5079_v37 = vsel %vm1849_vm6, %v1851_v39, %v1847_v30  ;;  %v1891_v40 = vmul.f32 %v1886_v55, %v5077_v13  ;;  %v4034_v34 = vpop.eup %4033  ;;  %v1836_v39 = vor.u32 1.1754944e-38, %v1835_v21  ;;  %vm1834_vm12 = vcmp.eq.f32.partialorder %v1833_v23, 8.507059e+37  ;;  %v72_v23 = vld [vmem:[#allocation2 + $0x20] sm:$0xff] }
 0xe10   :  { %v1892_v28 = vmul.f32 %v1888_v54, %v5079_v37  ;;  %v1825_v51 = vmul.f32 %v4034_v34, %v1806_v22  ;;  %vm1830_vm8 = vweird.f32 %v4034_v34  ;;  %v1792_v30 = vadd.f32 %v1784_v24, %v4767_v10 }
 0xe11   :  { %1895 = vrot.lane.b32.xlu1 %v1891_v40, %s4446_s29  ;;  %vm1831_vm11 = vmor %vm1829_vm10, %vm1830_vm8  ;;  %vm6288_vm6 = vcmask 1045504  }
 0xe12   :  { %1897 = vrot.lane.b32.xlu2 %v1892_v28, %s4446_s29  ;;  %v1826_v38 = vsub.f32 1.0, %v1825_v51  ;;  %v3810_v40 = vmul.f32 -1.442695, %v1792_v30 }
 0xe14   :  { %v1827_v50 = vmul.f32 %v4034_v34, %v1826_v38 }
 0xe16   :  { %v1828_v25 = vadd.f32 %v4034_v34, %v1827_v50 }
 0xe18   :  { %v1832_v35 = vsel %vm1831_vm11, %v4034_v34, %v1828_v25  ;;  %v73_v25 = vld [vmem:[#allocation2 + $0x58] sm:$0xff] }
 0xe19   :  { %v1837_v55 = vsel %vm1834_vm12, %v1836_v39, %v1832_v35 }
 0xe54   :  { %v1874_v44 = vpop.permute.xlu2 %1873 }
 0xe55   :  { %v1879_v20 = vmul.f32 %v1874_v44, %v5077_v13 }
 0xe6c   :  { %v1898_v27 = vpop.permute.xlu2 %1897 }
 0xe6d   :  { %v1876_v26 = vpop.permute.xlu0 %1875 }
 0xe6e   :  { %v1880_v45 = vmul.f32 %v1876_v26, %v5079_v37 }
 0xe70   :  { %v5087_v12 = vadd.f32 %v1898_v27, %v1880_v45 }
 0xe72   :  { %4035 = vtanh.f32 %v5087_v12 }
 0xe78   :  { %v4036_v32 = vpop.eup %4035 }
 0xe79   :  { %1909 = vrot.lane.b32.xlu1 %v4036_v32, %s4446_s29 }
 0xe83   :  { %v1896_v11 = vpop.permute.xlu1 %1895 }
 0xe84   :  { %v1901_v3 = vadd.f32 %v1896_v11, %v1879_v20  ;;  %v75_v11 = vld [vmem:[#allocation2 + $0xc8] sm:$0xff] }
 0xe85   :  { %2198 = vmatpush.msrb.mxu2 %v75_v11  ;;  %3849 = vmatpush.msrb.mxu3 %v75_v11 }
 0xe86   :  { %4037 = vtanh.f32 %v1901_v3  ;;  %v2070_v28 = vrot.slane %v1901_v3, 7  ;;  %v74_v3 = vld [vmem:[#allocation2 + $0x90] sm:$0xff] }
 0xe87   :  { %4039 = vpow2.f32 %v3810_v40  ;;  %2199 = vmatpush.msrb.mxu2 %v74_v3  ;;  %3850 = vmatpush.msrb.mxu3 %v74_v3 }
 0xe89   :  { %2200 = vmatpush.msrb.mxu2 %v73_v25  ;;  %3851 = vmatpush.msrb.mxu3 %v73_v25 }
 0xe8b   :  { %2201 = vmatpush.msrb.mxu2 %v72_v23  ;;  %3852 = vmatpush.msrb.mxu3 %v72_v23 }
 0xe8c   :  { %v4038_v31 = vpop.eup %4037 }
 0xe8d   :  { %v1915_v54 = vmul.f32 %v4038_v31, %v1837_v55  ;;  %1907 = vrot.lane.b32.xlu0 %v4038_v31, %s4446_s29  ;;  %v4040_v33 = vpop.eup %4039 }
 0xe8e   :  { %v1808_v47 = vadd.f32 1.0, %v4040_v33 }
 0xe8f   :  { %v5101_v20 = vsel %vm6288_vm6, %v5057_v63, %v1915_v54 }
 0xe90   :  { %4041 = vrcp.f32 %v1808_v47  ;;  %v1865_v26 = vand.u32 2147483648, %v1808_v47  ;;  %vm1859_vm1 = vweird.f32 %v1808_v47  ;;  %v1863_v45 = vand.u32 2147483647, %v1808_v47 }
 0xe92   :  { %v1866_v34 = vor.u32 1.1754944e-38, %v1865_v26  ;;  %vm1864_vm4 = vcmp.eq.f32.partialorder %v1863_v45, 8.507059e+37 }
 0xe95   :  { %2072 = vrot.lane.b32.xlu0 %v2070_v28, %s4447_s30 }
 0xe96   :  { %v4042_v29 = vpop.eup %4041 }
 0xe97   :  { %v1855_v36 = vmul.f32 %v4042_v29, %v1808_v47  ;;  %vm1860_vm14 = vweird.f32 %v4042_v29 }
 0xe98   :  { %vm1861_vm2 = vmor %vm1859_vm1, %vm1860_vm14 }
 0xe99   :  { %v1856_v44 = vsub.f32 1.0, %v1855_v36 }
 0xe9b   :  { %v1857_v59 = vmul.f32 %v4042_v29, %v1856_v44 }
 0xe9d   :  { %v1858_v22 = vadd.f32 %v4042_v29, %v1857_v59 }
 0xe9f   :  { %v1862_v27 = vsel %vm1861_vm2, %v4042_v29, %v1858_v22 }
 0xea0   :  { %v1867_v51 = vsel %vm1864_vm4, %v1866_v34, %v1862_v27 }
 0xea1   :  { %v1916_v38 = vmul.f32 %v4036_v32, %v1867_v51  ;;  %v2071_v51 = vrot.slane %v5087_v12, 7 }
 0xea3   :  { %v5097_v50 = vsel %vm6288_vm6, %v5053_v62, %v1916_v38 }
 0xeeb   :  { %v1910_v21 = vpop.permute.xlu1 %1909 }
 0xeec   :  { %v1914_v24 = vmul.f32 %v1910_v21, %v5079_v37  ;;  %v4355_v37 = vld [vmem:[%s6284_s5 + $0x3] ss:$0 sm:$0xff] }
 0xeed   :  { %v383_v30 = vadd.f32 %v4355_v37, %v4609_v18  ;;  %v365_v33 = vadd.f32 %v4355_v37, %v4595_v8  ;;  %v374_v47 = vadd.f32 %v4355_v37, %v4603_v15  ;;  %v371_v18 = vadd.f32 %v4355_v37, %v4601_v14 }
 0xeee   :  { %v5106_v62 = vsel %vm6288_vm6, %v5062_v56, %v1914_v24  ;;  %v1920_v35 = vrot.slane %v1914_v24, 5  ;;  %v386_v56 = vadd.f32 %v4355_v37, %v4611_v19  ;;  %v368_v36 = vadd.f32 %v4355_v37, %v4598_v5 }
 0xeef   :  { %v418_v28 = vmax.f32 %v383_v30, 0.0  ;;  %v415_v44 = vmax.f32 %v374_v47, 0.0  ;;  %v6291_v5 = vmax.f32 %v4642_v41, 0.0  ;;  %v6292_v14 = vmax.f32 %v4644_v42, 0.0 }
 0xef0   :  { %v419_v54 = vmax.f32 %v386_v56, 0.0  ;;  %v413_v8 = vmax.f32 %v368_v36, 0.0 }
 0xeff   :  { %v1908_v63 = vpop.permute.xlu0 %1907 }
 0xf00   :  { %v1913_v32 = vmul.f32 %v1908_v63, %v5077_v13  ;;  %v380_v13 = vadd.f32 %v4355_v37, %v4607_v17  ;;  %v412_v17 = vmax.f32 %v365_v33, 0.0 }
 0xf02   :  { %v1919_v39 = vrot.slane %v1913_v32, 6  ;;  %v5111_v31 = vsel %vm6288_vm6, %v5067_v58, %v1913_v32  ;;  %v377_v58 = vadd.f32 %v4355_v37, %v4605_v16  ;;  %v417_v29 = vmax.f32 %v380_v13, 0.0 }
 0xf03   :  { %v414_v16 = vmax.f32 %v371_v18, 0.0 }
 0xf04   :  { %v1921_v55 = vsel %vm431_vm3, %v1920_v35, %v1919_v39  ;;  %v416_v19 = vmax.f32 %v377_v58, 0.0 }
 0xf05   :  { %1922 = vrot.lane.b32.xlu2 %v1921_v55, %s4447_s30 }
 0xf07   :  { %v2073_v45 = vpop.permute.xlu0 %2072 }
 0xf5f   :  { %v1923_v40 = vpop.permute.xlu2 %1922 }
 0xf60   :  { %3811 = vmatmul.msk.f32.vlgmr.msra.gmra.mxu3 %vm155_vm0, %v1923_v40  ;;  %3812 = vmatmul.msk.f32.vlgmr.msra.gmra.mxu2 %vm155_vm0, %v1923_v40 }
 0xf61   :  { %3544 = vmatpush.msra.mxu2 %v419_v54 }
 0xf63   :  { %3545 = vmatpush.msra.mxu2 %v418_v28 }
 0xf65   :  { %3546 = vmatpush.msra.mxu2 %v417_v29 }
 0xf67   :  { %3547 = vmatpush.msra.mxu2 %v416_v19 }
 0xf68   :  { %3817 = vmatmul.msk.f32.vlgmr.msrb.gmra.mxu2 %vm155_vm0, %v412_v17  ;;  %3821 = vmatmul.msk.f32.vlgmr.msrb.gmra.mxu3 %vm155_vm0, %v416_v19 }
 0xf69   :  { %3548 = vmatpush.msra.mxu2 %v415_v44 }
 0xf6b   :  { %3549 = vmatpush.msra.mxu2 %v414_v16 }
 0xf6d   :  { %3550 = vmatpush.msra.mxu2 %v413_v8 }
 0xf6f   :  { %3551 = vmatpush.msra.mxu2 %v412_v17 }
 0xf70   :  { %3818 = vmatmul.msk.f32.gmra.mxu2 %vm155_vm0, %v413_v8  ;;  %3822 = vmatmul.msk.f32.gmra.mxu3 %vm155_vm0, %v417_v29 }
 0xf78   :  { %3819 = vmatmul.msk.f32.gmra.mxu2 %vm155_vm0, %v414_v16  ;;  %3823 = vmatmul.msk.f32.gmra.mxu3 %vm155_vm0, %v418_v28 }
 0xf80   :  { %3820 = vmatmul.msk.f32.gmra.mxu2 %vm155_vm0, %v415_v44  ;;  %3824 = vmatmul.msk.f32.gmra.mxu3 %vm155_vm0, %v419_v54 }
 0xf88   :  { %3825 = vmatmul.msk.f32.gmra.mxu3 %vm155_vm0, %v420_v4 }
 0xf90   :  { %3826 = vmatmul.msk.f32.gmra.mxu3 %vm155_vm0, %v421_v1 }
 0xf98   :  { %3827 = vmatmul.msk.f32.gmra.mxu3 %vm155_vm0, %v422_v61 }
 0xfa0   :  { %3828 = vmatmul.msk.f32.gmra.mxu3 %vm155_vm0, %v423_v57 }
 0xfa8   :  { %3829 = vmatmul.msk.f32.gmra.mxu3 %vm155_vm0, %v424_v53 }
 0xfb0   :  { %3830 = vmatmul.msk.f32.gmra.mxu3 %vm155_vm0, %v425_v49 }
 0xfb8   :  { %3831 = vmatmul.msk.f32.gmra.mxu3 %vm155_vm0, %v6291_v5 }
 0xfc0   :  { %3832 = vmatmul.msk.f32.gmra.mxu3 %vm155_vm0, %v6292_v14 }
 0xfe3   :  { %v1943_v15 = vpop.f32.mrf.mxu3  ;;  %v1963_v48 = vpop.f32.mrf.mxu2 }
 0xfe4   :  { %v1968_v52 = vrot.slane %v1943_v15, 1  ;;  %v1969_v57 = vrot.slane %v1963_v48, 1  ;;  %v1971_v60 = vrot.slane %v1963_v48, 2  ;;  %v1970_v38 = vrot.slane %v1943_v15, 2 }
 0xfe6   :  { %v1976_v46 = vadd.f32 %v1968_v52, %v4761_v6  ;;  %v1977_v53 = vadd.f32 %v1969_v57, %v4763_v7  ;;  %v5163_v43 = vadd.f32 %v1971_v60, %v4767_v10  ;;  %v1978_v11 = vadd.f32 %v1970_v38, %v4765_v9 }
 0xfe8   :  { %v3813_v49 = vmul.f32 -1.442695, %v1976_v46  ;;  %4043 = vtanh.f32 %v1976_v46  ;;  %v3815_v3 = vmul.f32 -1.442695, %v1978_v11  ;;  %v3814_v25 = vmul.f32 -1.442695, %v1977_v53 }
 0xfea   :  { %4045 = vpow2.f32 %v3813_v49 }
 0xfee   :  { %v4044_v41 = vpop.eup %4043 }
 0xfef   :  { %2060 = vrot.lane.b32.xlu1 %v4044_v41, %s4445_s28 }
 0xff0   :  { %v4046_v42 = vpop.eup %4045 }
 0xff1   :  { %v1992_v61 = vadd.f32 1.0, %v4046_v42 }
 0xff3   :  { %4047 = vrcp.f32 %v1992_v61  ;;  %v2007_v59 = vand.u32 2147483648, %v1992_v61  ;;  %v2005_v6 = vand.u32 2147483647, %v1992_v61  ;;  %vm2001_vm8 = vweird.f32 %v1992_v61 }
 0xff4   :  { %4049 = vpow2.f32 %v3815_v3 }
 0xff5   :  { %v2008_v10 = vor.u32 1.1754944e-38, %v2007_v59  ;;  %vm2006_vm11 = vcmp.eq.f32.partialorder %v2005_v6, 8.507059e+37  ;;  %4051 = vpow2.f32 %v3814_v25 }
 0xff9   :  { %v4048_v0 = vpop.eup %4047 }
 0xffa   :  { %v1997_v1 = vmul.f32 %v4048_v0, %v1992_v61  ;;  %vm2002_vm3 = vweird.f32 %v4048_v0  ;;  %v4050_v21 = vpop.eup %4049 }
 0xffb   :  { %vm2003_vm10 = vmor %vm2001_vm8, %vm2002_vm3  ;;  %v1994_v23 = vadd.f32 1.0, %v4050_v21  ;;  %v4052_v24 = vpop.eup %4051  ;;  %v5193_v21 = vpop.f32.mrf.mxu2 }
 0xffc   :  { %v1998_v4 = vsub.f32 1.0, %v1997_v1  ;;  %v1993_v63 = vadd.f32 1.0, %v4052_v24  ;;  %v3816_v1 = vmul.f32 -1.442695, %v5163_v43 }
 0xffd   :  { %4053 = vrcp.f32 %v1994_v23  ;;  %v2037_v58 = vand.u32 2147483648, %v1994_v23  ;;  %vm2031_vm14 = vweird.f32 %v1994_v23  ;;  %v2035_v28 = vand.u32 2147483647, %v1994_v23 }
 0xffe   :  { %v1999_v22 = vmul.f32 %v4048_v0, %v1998_v4  ;;  %4055 = vrcp.f32 %v1993_v63  ;;  %v2022_v18 = vand.u32 2147483648, %v1993_v63  ;;  %vm2016_vm4 = vweird.f32 %v1993_v63 }
 0xfff   :  { %v2038_v19 = vor.u32 1.1754944e-38, %v2037_v58  ;;  %v2020_v17 = vand.u32 2147483647, %v1993_v63  ;;  %vm2036_vm3 = vcmp.eq.f32.partialorder %v2035_v28, 8.507059e+37 }
0x1000   :  { %v2000_v7 = vadd.f32 %v4048_v0, %v1999_v22  ;;  %v2023_v5 = vor.u32 1.1754944e-38, %v2022_v18 }
0x1002   :  { %v2004_v26 = vsel %vm2003_vm10, %v4048_v0, %v2000_v7  ;;  %vm2021_vm10 = vcmp.eq.f32.partialorder %v2020_v17, 8.507059e+37 }
0x1003   :  { %v2009_v27 = vsel %vm2006_vm11, %v2008_v10, %v2004_v26  ;;  %v4054_v32 = vpop.eup %4053  ;;  %vm6290_vm11 = vcmask 1046528  }
0x1004   :  { %v2078_v34 = vmul.f32 %v2073_v45, %v2009_v27  ;;  %v2027_v35 = vmul.f32 %v4054_v32, %v1994_v23  ;;  %v4056_v39 = vpop.eup %4055  ;;  %vm2032_vm12 = vweird.f32 %v4054_v32 }
0x1005   :  { %v2012_v55 = vmul.f32 %v4056_v39, %v1993_v63  ;;  %vm2033_vm1 = vmor %vm2031_vm14, %vm2032_vm12  ;;  %vm2017_vm2 = vweird.f32 %v4056_v39 }
0x1006   :  { %2082 = vrot.lane.b32.xlu2 %v2078_v34, %s4446_s29  ;;  %v2028_v12 = vsub.f32 1.0, %v2027_v35  ;;  %vm2018_vm8 = vmor %vm2016_vm4, %vm2017_vm2  ;;  %vm2335_vm4 = vcmask 523264  }
0x1007   :  { %v2013_v37 = vsub.f32 1.0, %v2012_v55 }
0x1008   :  { %v2029_v56 = vmul.f32 %v4054_v32, %v2028_v12 }
0x1009   :  { %v2014_v13 = vmul.f32 %v4056_v39, %v2013_v37 }
0x100a   :  { %v2030_v54 = vadd.f32 %v4054_v32, %v2029_v56 }
0x100b   :  { %v2015_v47 = vadd.f32 %v4056_v39, %v2014_v13  ;;  %v5229_v13 = vld [vmem:[%s6284_s5 + $0x5] ss:$0 sm:$0xff] }
0x100c   :  { %v2034_v29 = vsel %vm2033_vm1, %v4054_v32, %v2030_v54 }
0x100d   :  { %v2039_v36 = vsel %vm2036_vm3, %v2038_v19, %v2034_v29  ;;  %v2019_v16 = vsel %vm2018_vm8, %v4056_v39, %v2015_v47  ;;  %vm3089_vm3 = vcmask 130112   ;;  %vm3093_vm8 = vcmask 195712  }
0x100e   :  { %2074 = vrot.lane.b32.xlu2 %v2071_v51, %s4447_s30  ;;  %v2024_v15 = vsel %vm2021_vm10, %v2023_v5, %v2019_v16  ;;  %vm3097_vm10 = vcmask 261312  }
0x1060   :  { %v2083_v30 = vpop.permute.xlu2 %2082 }
0x1061   :  { %v2061_v9 = vpop.permute.xlu1 %2060 }
0x1062   :  { %v2066_v40 = vmul.f32 %v2061_v9, %v2009_v27 }
0x1064   :  { %v2088_v33 = vadd.f32 %v2083_v30, %v2066_v40 }
0x1066   :  { %4057 = vtanh.f32 %v2088_v33 }
0x1067   :  { %4059 = vtanh.f32 %v1978_v11 }
0x1068   :  { %v2075_v44 = vpop.permute.xlu2 %2074 }
0x1069   :  { %v2079_v8 = vmul.f32 %v2075_v44, %v2039_v36 }
0x106b   :  { %2084 = vrot.lane.b32.xlu1 %v2079_v8, %s4446_s29 }
0x106c   :  { %v4058_v14 = vpop.eup %4057 }
0x106d   :  { %v2102_v48 = vmul.f32 %v4058_v14, %v2024_v15  ;;  %2094 = vrot.lane.b32.xlu0 %v4058_v14, %s4446_s29  ;;  %v4060_v52 = vpop.eup %4059 }
0x106f   :  { %v5175_v57 = vsel %vm6290_vm11, %v5101_v20, %v2102_v48 }
0x1075   :  { %2062 = vrot.lane.b32.xlu0 %v4060_v52, %s4445_s28 }
0x10dd   :  { %v2085_v42 = vpop.permute.xlu1 %2084 }
0x10df   :  { %v2095_v60 = vpop.permute.xlu0 %2094 }
0x10e0   :  { %v2100_v46 = vmul.f32 %v2095_v60, %v2009_v27 }
0x10e2   :  { %v2122_v53 = vsel %vm6290_vm11, %v5111_v31, %v2100_v46 }
0x10e3   :  { %2253 = vrot.lane.b32.xlu1 %v2122_v53, %s4447_s30 }
0x10e7   :  { %v2063_v49 = vpop.permute.xlu0 %2062 }
0x10e8   :  { %v2067_v41 = vmul.f32 %v2063_v49, %v2039_v36 }
0x10ea   :  { %v2089_v61 = vadd.f32 %v2085_v42, %v2067_v41 }
0x10ec   :  { %4061 = vtanh.f32 %v2089_v61 }
0x10ed   :  { %4063 = vpow2.f32 %v3816_v1 }
0x10f2   :  { %v4062_v0 = vpop.eup %4061 }
0x10f3   :  { %2096 = vrot.lane.b32.xlu2 %v4062_v0, %s4446_s29  ;;  %v4064_v20 = vpop.eup %4063 }
0x10f4   :  { %v1995_v4 = vadd.f32 1.0, %v4064_v20 }
0x10f6   :  { %4065 = vrcp.f32 %v1995_v4  ;;  %v2052_v10 = vand.u32 2147483648, %v1995_v4  ;;  %vm2046_vm14 = vweird.f32 %v1995_v4  ;;  %v2050_v26 = vand.u32 2147483647, %v1995_v4 }
0x10f8   :  { %v2053_v27 = vor.u32 1.1754944e-38, %v2052_v10  ;;  %vm2051_vm2 = vcmp.eq.f32.partialorder %v2050_v26, 8.507059e+37 }
0x10fc   :  { %v4066_v59 = vpop.eup %4065 }
0x10fd   :  { %v2042_v22 = vmul.f32 %v4066_v59, %v1995_v4  ;;  %vm2047_vm12 = vweird.f32 %v4066_v59 }
0x10fe   :  { %vm2048_vm1 = vmor %vm2046_vm14, %vm2047_vm12  ;;  %vm3101_vm12 = vcmask 326912   ;;  %vm3105_vm14 = vcmask 392512  }
0x10ff   :  { %v2043_v6 = vsub.f32 1.0, %v2042_v22 }
0x1101   :  { %v2044_v31 = vmul.f32 %v4066_v59, %v2043_v6  ;;  %v5265_v6 = vpop.f32.mrf.mxu3 }
0x1103   :  { %v2045_v7 = vadd.f32 %v4066_v59, %v2044_v31 }
0x1105   :  { %v2049_v45 = vsel %vm2048_vm1, %v4066_v59, %v2045_v7  ;;  %vm3109_vm1 = vcmask 458112  }
0x1106   :  { %v2054_v34 = vsel %vm2051_vm2, %v2053_v27, %v2049_v45  ;;  %vm3113_vm2 = vcmask 523712  }
0x1107   :  { %v2103_v51 = vmul.f32 %v4062_v0, %v2054_v34 }
0x1109   :  { %v5184_v43 = vsel %vm6290_vm11, %v5097_v50, %v2103_v51  ;;  %v5199_v50 = vpop.f32.mrf.mxu2 }
0x1111   :  { %v5212_v35 = vpop.f32.mrf.mxu2 }
0x1119   :  { %v5231_v40 = vpop.f32.mrf.mxu2 }
0x114d   :  { %v2097_v38 = vpop.permute.xlu2 %2096 }
0x114e   :  { %v2101_v11 = vmul.f32 %v2097_v38, %v2039_v36 }
0x1150   :  { %v2123_v3 = vsel %vm6290_vm11, %v5106_v62, %v2101_v11 }
0x1151   :  { %2255 = vrot.lane.b32.xlu0 %v2123_v3, %s4447_s30 }
0x1155   :  { %v5189_v25 = vpop.permute.xlu1 %2253 }
0x1156   :  { %3833 = vmatmul.msk.f32.vlgmr.msra.gmra.mxu0 %vm155_vm0, %v5189_v25 }
0x11c3   :  { %v5195_v23 = vpop.permute.xlu0 %2255 }
0x11c4   :  { %3834 = vmatmul.msk.f32.gmra.mxu0 %vm155_vm0, %v5195_v23 }
0x11d3   :  { %v5201_v24 = vpop.f32.mrf.mxu0 }
0x11d4   :  { %v5204_v62 = vperm.slane %v5201_v24, 0  ;;  %v5207_v63 = vperm.slane %v5201_v24, 1  ;;  %v5210_v32 = vperm.slane %v5201_v24, 2  ;;  %v5246_v14 = vperm.slane %v5201_v24, 3 }
0x11d5   :  { %v5275_v38 = vperm.slane %v5201_v24, 4 }
0x11d6   :  { %v2386_v39 = vadd.f32 %v5207_v63, %v5193_v21  ;;  %v2287_v55 = vadd.f32 %v5204_v62, %v5199_v50  ;;  %v2286_v12 = vadd.f32 %v5204_v62, %v5193_v21  ;;  %v2484_v37 = vadd.f32 %v5210_v32, %v5193_v21 }
0x11d7   :  { %v2387_v56 = vadd.f32 %v5207_v63, %v5199_v50  ;;  %v2288_v30 = vadd.f32 %v5204_v62, %v5212_v35  ;;  %v2389_v47 = vadd.f32 %v5207_v63, %v5231_v40  ;;  %v2388_v19 = vadd.f32 %v5207_v63, %v5212_v35 }
0x11d8   :  { %4067 = vtanh.f32 %v2386_v39  ;;  %v2485_v44 = vadd.f32 %v5210_v32, %v5199_v50  ;;  %v2583_v60 = vadd.f32 %v5246_v14, %v5199_v50  ;;  %v2289_v53 = vadd.f32 %v5204_v62, %v5231_v40 }
0x11d9   :  { %4069 = vtanh.f32 %v2287_v55  ;;  %v2486_v42 = vadd.f32 %v5210_v32, %v5212_v35  ;;  %v2487_v22 = vadd.f32 %v5210_v32, %v5231_v40  ;;  %v2582_v7 = vadd.f32 %v5246_v14, %v5193_v21 }
0x11da   :  { %4071 = vtanh.f32 %v2286_v12  ;;  %v2290_v45 = vadd.f32 %v5204_v62, %v5265_v6  ;;  %v2681_v55 = vadd.f32 %v5275_v38, %v5199_v50 }
0x11db   :  { %4073 = vtanh.f32 %v2484_v37  ;;  %v2390_v37 = vadd.f32 %v5207_v63, %v5265_v6 }
0x11dc   :  { %4075 = vtanh.f32 %v2387_v56 }
0x11dd   :  { %4077 = vtanh.f32 %v2288_v30 }
0x11de   :  { %v4068_v9 = vpop.eup %4067  ;;  %4079 = vtanh.f32 %v2389_v47 }
0x11df   :  { %v4070_v54 = vpop.eup %4069  ;;  %v2418_v58 = vmul.f32 %v4068_v9, %v5229_v13  ;;  %4081 = vtanh.f32 %v2388_v19  ;;  %v2584_v9 = vadd.f32 %v5246_v14, %v5212_v35  ;;  %v5294_v19 = vpop.f32.mrf.mxu3 }
0x11e0   :  { %v4072_v28 = vpop.eup %4071  ;;  %v2320_v33 = vmul.f32 %v4070_v54, %v5229_v13  ;;  %4083 = vtanh.f32 %v2485_v44 }
0x11e1   :  { %v2434_v29 = vsel %vm2335_vm4, %v2418_v58, 0.0  ;;  %v2319_v18 = vmul.f32 %v4072_v28, %v5229_v13  ;;  %v4074_v17 = vpop.eup %4073  ;;  %4085 = vtanh.f32 %v2583_v60 }
0x11e2   :  { %2435 = vadd.xlane.f32.xlu0 %v2434_v29  ;;  %v2339_v36 = vsel %vm2335_vm4, %v2320_v33, 0.0  ;;  %v4076_v16 = vpop.eup %4075  ;;  %v2516_v15 = vmul.f32 %v4074_v17, %v5229_v13  ;;  %4087 = vtanh.f32 %v2289_v53 }
0x11e3   :  { %2340 = vadd.xlane.f32.xlu2 %v2339_v36  ;;  %v2336_v8 = vsel %vm2335_vm4, %v2319_v18, 0.0  ;;  %v4078_v5 = vpop.eup %4077  ;;  %v2419_v48 = vmul.f32 %v4076_v16, %v5229_v13  ;;  %4089 = vtanh.f32 %v2486_v42  ;;  %v2488_v18 = vadd.f32 %v5210_v32, %v5265_v6 }
0x11e4   :  { %2337 = vadd.xlane.f32.xlu1 %v2336_v8  ;;  %v2321_v52 = vmul.f32 %v4078_v5, %v5229_v13  ;;  %v2532_v46 = vsel %vm2335_vm4, %v2516_v15, 0.0  ;;  %v4080_v49 = vpop.eup %4079  ;;  %4091 = vtanh.f32 %v2487_v22  ;;  %v2680_v36 = vadd.f32 %v5275_v38, %v5193_v21 }
0x11e5   :  { %v2437_v41 = vsel %vm2335_vm4, %v2419_v48, 0.0  ;;  %v4082_v61 = vpop.eup %4081  ;;  %v2421_v20 = vmul.f32 %v4080_v49, %v5229_v13  ;;  %4093 = vtanh.f32 %v2582_v7  ;;  %v2291_v8 = vadd.f32 %v5204_v62, %v5294_v19 }
0x11e6   :  { %v2342_v0 = vsel %vm2335_vm4, %v2321_v52, 0.0  ;;  %v4084_v1 = vpop.eup %4083  ;;  %v2420_v4 = vmul.f32 %v4082_v61, %v5229_v13  ;;  %4095 = vtanh.f32 %v2290_v45  ;;  %v5304_v52 = vperm.slane %v5201_v24, 5 }
0x11e7   :  { %v2517_v59 = vmul.f32 %v4084_v1, %v5229_v13  ;;  %v2443_v31 = vsel %vm2335_vm4, %v2421_v20, 0.0  ;;  %v4086_v10 = vpop.eup %4085  ;;  %4097 = vtanh.f32 %v2681_v55  ;;  %v2391_v42 = vadd.f32 %v5207_v63, %v5294_v19  ;;  %v5320_v7 = vpop.f32.mrf.mxu3 }
0x11e8   :  { %v2440_v26 = vsel %vm2335_vm4, %v2420_v4, 0.0  ;;  %v4088_v27 = vpop.eup %4087  ;;  %v2615_v11 = vmul.f32 %v4086_v10, %v5229_v13  ;;  %4099 = vtanh.f32 %v2390_v37  ;;  %v2778_v49 = vadd.f32 %v5304_v52, %v5193_v21 }
0x11e9   :  { %v2535_v34 = vsel %vm2335_vm4, %v2517_v59, 0.0  ;;  %v4090_v51 = vpop.eup %4089  ;;  %v2322_v3 = vmul.f32 %v4088_v27, %v5229_v13  ;;  %4101 = vtanh.f32 %v2584_v9  ;;  %v2585_v1 = vadd.f32 %v5246_v14, %v5231_v40 }
0x11ea   :  { %2533 = vadd.xlane.f32.xlu0 %v2532_v46  ;;  %v2518_v39 = vmul.f32 %v4090_v51, %v5229_v13  ;;  %v2633_v12 = vsel %vm2335_vm4, %v2615_v11, 0.0  ;;  %v4092_v56 = vpop.eup %4091  ;;  %4103 = vtanh.f32 %v2488_v18  ;;  %v2682_v27 = vadd.f32 %v5275_v38, %v5212_v35 }
0x11eb   :  { %2438 = vadd.xlane.f32.xlu2 %v2437_v41  ;;  %v2345_v30 = vsel %vm2335_vm4, %v2322_v3, 0.0  ;;  %v4094_v54 = vpop.eup %4093  ;;  %v2519_v33 = vmul.f32 %v4092_v56, %v5229_v13  ;;  %4105 = vtanh.f32 %v2680_v36  ;;  %v2779_v11 = vadd.f32 %v5304_v52, %v5199_v50 }
0x11ec   :  { %2343 = vadd.xlane.f32.xlu1 %v2342_v0  ;;  %v2538_v58 = vsel %vm2335_vm4, %v2518_v39, 0.0  ;;  %v4096_v28 = vpop.eup %4095  ;;  %v2614_v47 = vmul.f32 %v4094_v54, %v5229_v13  ;;  %4107 = vtanh.f32 %v2291_v8  ;;  %v2292_v54 = vadd.f32 %v5204_v62, %v5320_v7 }
0x11ed   :  { %v2323_v29 = vmul.f32 %v4096_v28, %v5229_v13  ;;  %v2541_v17 = vsel %vm2335_vm4, %v2519_v33, 0.0  ;;  %v4098_v44 = vpop.eup %4097  ;;  %4109 = vtanh.f32 %v2778_v49  ;;  %v2489_v33 = vadd.f32 %v5210_v32, %v5294_v19 }
0x11ee   :  { %v2630_v16 = vsel %vm2335_vm4, %v2614_v47, 0.0  ;;  %v4100_v5 = vpop.eup %4099  ;;  %v2713_v60 = vmul.f32 %v4098_v44, %v5229_v13  ;;  %4111 = vtanh.f32 %v2391_v42 }
0x11ef   :  { %v2348_v15 = vsel %vm2335_vm4, %v2323_v29, 0.0  ;;  %v4102_v48 = vpop.eup %4101  ;;  %v2422_v46 = vmul.f32 %v4100_v5, %v5229_v13  ;;  %4113 = vtanh.f32 %v2585_v1  ;;  %v2490_v1 = vadd.f32 %v5210_v32, %v5320_v7 }
0x11f0   :  { %v2616_v53 = vmul.f32 %v4102_v48, %v5229_v13  ;;  %v2731_v41 = vsel %vm2335_vm4, %v2713_v60, 0.0  ;;  %v4104_v61 = vpop.eup %4103 }
0x11f1   :  { %v2446_v0 = vsel %vm2335_vm4, %v2422_v46, 0.0  ;;  %v4106_v20 = vpop.eup %4105  ;;  %v2520_v22 = vmul.f32 %v4104_v61, %v5229_v13  ;;  %v2780_v46 = vadd.f32 %v5304_v52, %v5212_v35 }
0x11f2   :  { %2444 = vadd.xlane.f32.xlu0 %v2443_v31  ;;  %v2636_v4 = vsel %vm2335_vm4, %v2616_v53, 0.0  ;;  %v4108_v59 = vpop.eup %4107  ;;  %v2712_v31 = vmul.f32 %v4106_v20, %v5229_v13  ;;  %v5364_v20 = vpop.f32.mrf.mxu3 }
0x11f3   :  { %2441 = vadd.xlane.f32.xlu2 %v2440_v26  ;;  %v2324_v10 = vmul.f32 %v4108_v59, %v5229_v13  ;;  %v2392_v26 = vadd.f32 %v5207_v63, %v5320_v7  ;;  %v2544_v45 = vsel %vm2335_vm4, %v2520_v22, 0.0 }
0x11f4   :  { %2536 = vadd.xlane.f32.xlu1 %v2535_v34  ;;  %v4110_v34 = vpop.eup %4109  ;;  %v2728_v51 = vsel %vm2335_vm4, %v2712_v31, 0.0 }
0x11f5   :  { %v4112_v3 = vpop.eup %4111  ;;  %v2351_v39 = vsel %vm2335_vm4, %v2324_v10, 0.0  ;;  %4115 = vtanh.f32 %v2392_v26  ;;  %v2293_v10 = vadd.f32 %v5204_v62, %v5364_v20 }
0x11f6   :  { %v4114_v55 = vpop.eup %4113  ;;  %4117 = vtanh.f32 %v2682_v27  ;;  %v2423_v37 = vmul.f32 %v4112_v3, %v5229_v13  ;;  %v2781_v3 = vadd.f32 %v5304_v52, %v5231_v40 }
0x11f7   :  { %4119 = vtanh.f32 %v2779_v11  ;;  %v2617_v56 = vmul.f32 %v4114_v55, %v5229_v13 }
0x11f8   :  { %v2449_v28 = vsel %vm2335_vm4, %v2423_v37, 0.0  ;;  %v2587_v37 = vadd.f32 %v5246_v14, %v5294_v19 }
0x11f9   :  { %v2639_v29 = vsel %vm2335_vm4, %v2617_v56, 0.0 }
0x11fa   :  { %2634 = vadd.xlane.f32.xlu0 %v2633_v12  ;;  %v2810_v12 = vmul.f32 %v4110_v34, %v5229_v13 }
0x11fb   :  { %2346 = vadd.xlane.f32.xlu2 %v2345_v30  ;;  %v2683_v30 = vadd.f32 %v5275_v38, %v5231_v40 }
0x11fc   :  { %2539 = vadd.xlane.f32.xlu1 %v2538_v58  ;;  %v2826_v9 = vsel %vm2335_vm4, %v2810_v12, 0.0  ;;  %v4116_v58 = vpop.eup %4115 }
0x11fd   :  { %v4118_v47 = vpop.eup %4117  ;;  %4121 = vtanh.f32 %v2683_v30  ;;  %v2424_v36 = vmul.f32 %v4116_v58, %v5229_v13 }
0x11fe   :  { %v4120_v18 = vpop.eup %4119  ;;  %4123 = vtanh.f32 %v2292_v54  ;;  %v2714_v44 = vmul.f32 %v4118_v47, %v5229_v13  ;;  %v5386_v54 = vperm.slane %v5201_v24, 7 }
0x11ff   :  { %4125 = vtanh.f32 %v2489_v33  ;;  %v2452_v5 = vsel %vm2335_vm4, %v2424_v36, 0.0 }
0x1200   :  { %v2734_v60 = vsel %vm2335_vm4, %v2714_v44, 0.0  ;;  %v2975_v33 = vadd.f32 %v5386_v54, %v5199_v50 }
0x1202   :  { %2542 = vadd.xlane.f32.xlu0 %v2541_v17  ;;  %v5345_v17 = vperm.slane %v5201_v24, 6 }
0x1203   :  { %2631 = vadd.xlane.f32.xlu2 %v2630_v16  ;;  %v2811_v16 = vmul.f32 %v4120_v18, %v5229_v13  ;;  %v4122_v48 = vpop.eup %4121 }
0x1204   :  { %2349 = vadd.xlane.f32.xlu1 %v2348_v15  ;;  %v2877_v8 = vadd.f32 %v5345_v17, %v5199_v50  ;;  %v2586_v15 = vadd.f32 %v5246_v14, %v5265_v6  ;;  %v4124_v53 = vpop.eup %4123  ;;  %v2715_v42 = vmul.f32 %v4122_v48, %v5229_v13  ;;  %v2876_v59 = vadd.f32 %v5345_v17, %v5193_v21 }
0x1205   :  { %v2829_v49 = vsel %vm2335_vm4, %v2811_v16, 0.0  ;;  %v2325_v61 = vmul.f32 %v4124_v53, %v5229_v13  ;;  %v2878_v44 = vadd.f32 %v5345_v17, %v5212_v35  ;;  %v2974_v53 = vadd.f32 %v5386_v54, %v5193_v21 }
0x1206   :  { %4127 = vtanh.f32 %v2877_v8 }
0x1207   :  { %4129 = vtanh.f32 %v2586_v15  ;;  %v2354_v31 = vsel %vm2335_vm4, %v2325_v61, 0.0 }
0x1208   :  { %4131 = vtanh.f32 %v2780_v46 }
0x1209   :  { %4133 = vtanh.f32 %v2490_v1 }
0x120a   :  { %2732 = vadd.xlane.f32.xlu0 %v2731_v41  ;;  %v4126_v41 = vpop.eup %4125  ;;  %4135 = vtanh.f32 %v2876_v59 }
0x120b   :  { %2447 = vadd.xlane.f32.xlu2 %v2446_v0  ;;  %v2521_v0 = vmul.f32 %v4126_v41, %v5229_v13  ;;  %4137 = vtanh.f32 %v2293_v10 }
0x120c   :  { %2637 = vadd.xlane.f32.xlu1 %v2636_v4  ;;  %v2737_v4 = vsel %vm2335_vm4, %v2715_v42, 0.0  ;;  %v4128_v22 = vpop.eup %4127  ;;  %4139 = vtanh.f32 %v2781_v3  ;;  %v2491_v42 = vadd.f32 %v5210_v32, %v5364_v20 }
0x120d   :  { %v4130_v26 = vpop.eup %4129  ;;  %v2909_v34 = vmul.f32 %v4128_v22, %v5229_v13  ;;  %v2976_v22 = vadd.f32 %v5386_v54, %v5212_v35 }
0x120e   :  { %v4132_v27 = vpop.eup %4131 }
0x120f   :  { %v2812_v11 = vmul.f32 %v4132_v27, %v5229_v13  ;;  %v2927_v62 = vsel %vm2335_vm4, %v2909_v34, 0.0  ;;  %v4134_v55 = vpop.eup %4133 }
0x1210   :  { %v4136_v56 = vpop.eup %4135  ;;  %v2522_v58 = vmul.f32 %v4134_v55, %v5229_v13  ;;  %v2879_v55 = vadd.f32 %v5345_v17, %v5231_v40 }
0x1211   :  { %v2832_v30 = vsel %vm2335_vm4, %v2812_v11, 0.0 }
0x1212   :  { %2545 = vadd.xlane.f32.xlu0 %v2544_v45  ;;  %v2547_v45 = vsel %vm2335_vm4, %v2521_v0, 0.0  ;;  %v2550_v47 = vsel %vm2335_vm4, %v2522_v58, 0.0  ;;  %v5437_v58 = vadd.s32 4294967288, %v4592_v2 }
0x1213   :  { %2729 = vadd.xlane.f32.xlu2 %v2728_v51  ;;  %v2618_v51 = vmul.f32 %v4130_v26, %v5229_v13 }
0x1214   :  { %2352 = vadd.xlane.f32.xlu1 %v2351_v39  ;;  %v2393_v39 = vadd.f32 %v5207_v63, %v5364_v20  ;;  %v2908_v63 = vmul.f32 %v4136_v56, %v5229_v13  ;;  %v2589_v56 = vadd.f32 %v5246_v14, %v5364_v20 }
0x1215   :  { %v2642_v12 = vsel %vm2335_vm4, %v2618_v51, 0.0 }
0x1216   :  { %4141 = vtanh.f32 %v2393_v39  ;;  %v2924_v36 = vsel %vm2335_vm4, %v2908_v63, 0.0 }
0x1217   :  { %4143 = vtanh.f32 %v2587_v37 }
0x1218   :  { %4145 = vtanh.f32 %v2975_v33 }
0x121a   :  { %2827 = vadd.xlane.f32.xlu0 %v2826_v9  ;;  %v4138_v9 = vpop.eup %4137 }
0x121b   :  { %2450 = vadd.xlane.f32.xlu2 %v2449_v28  ;;  %v2326_v28 = vmul.f32 %v4138_v9, %v5229_v13  ;;  %v4140_v18 = vpop.eup %4139 }
0x121c   :  { %2640 = vadd.xlane.f32.xlu1 %v2639_v29  ;;  %v2684_v29 = vadd.f32 %v5275_v38, %v5265_v6  ;;  %v4142_v16 = vpop.eup %4141  ;;  %v2813_v50 = vmul.f32 %v4140_v18, %v5229_v13 }
0x121d   :  { %v2357_v8 = vsel %vm2335_vm4, %v2326_v28, 0.0  ;;  %v2425_v15 = vmul.f32 %v4142_v16, %v5229_v13  ;;  %v5439_v28 = vpop.f32.mrf.mxu3 }
0x121e   :  { %4147 = vtanh.f32 %v2684_v29  ;;  %v2835_v46 = vsel %vm2335_vm4, %v2813_v50, 0.0  ;;  %v2686_v50 = vadd.f32 %v5275_v38, %v5320_v7 }
0x121f   :  { %4149 = vtanh.f32 %v2878_v44  ;;  %v2455_v41 = vsel %vm2335_vm4, %v2425_v15, 0.0 }
0x1222   :  { %2453 = vadd.xlane.f32.xlu0 %v2452_v5  ;;  %v4144_v5 = vpop.eup %4143 }
0x1223   :  { %2735 = vadd.xlane.f32.xlu2 %v2734_v60  ;;  %v2619_v48 = vmul.f32 %v4144_v5, %v5229_v13  ;;  %v2685_v60 = vadd.f32 %v5275_v38, %v5294_v19 }
0x1224   :  { %2830 = vadd.xlane.f32.xlu1 %v2829_v49  ;;  %v4146_v49 = vpop.eup %4145 }
0x1225   :  { %v4148_v61 = vpop.eup %4147  ;;  %v2645_v0 = vsel %vm2335_vm4, %v2619_v48, 0.0  ;;  %4151 = vtanh.f32 %v2685_v60 }
0x1226   :  { %v4150_v1 = vpop.eup %4149  ;;  %4153 = vtanh.f32 %v2974_v53  ;;  %v2716_v59 = vmul.f32 %v4148_v61, %v5229_v13 }
0x1227   :  { %4155 = vtanh.f32 %v2491_v42  ;;  %v2910_v21 = vmul.f32 %v4150_v1, %v5229_v13  ;;  %v5457_v42 = vadd.s32 4294967280, %v4592_v2 }
0x1228   :  { %v2740_v26 = vsel %vm2335_vm4, %v2716_v59, 0.0  ;;  %4157 = vtanh.f32 %v2976_v22 }
0x1229   :  { %v2930_v34 = vsel %vm2335_vm4, %v2910_v21, 0.0 }
0x122a   :  { %2738 = vadd.xlane.f32.xlu0 %v2737_v4  ;;  %v3007_v4 = vmul.f32 %v4146_v49, %v5229_v13 }
0x122b   :  { %2355 = vadd.xlane.f32.xlu2 %v2354_v31  ;;  %v2588_v31 = vadd.f32 %v5246_v14, %v5320_v7  ;;  %v4152_v10 = vpop.eup %4151 }
0x122c   :  { %2548 = vadd.xlane.f32.xlu1 %v2547_v45  ;;  %v3025_v32 = vsel %vm2335_vm4, %v3007_v4, 0.0  ;;  %v2782_v45 = vadd.f32 %v5304_v52, %v5265_v6  ;;  %v4154_v27 = vpop.eup %4153  ;;  %v2717_v35 = vmul.f32 %v4152_v10, %v5229_v13  ;;  %v2978_v10 = vadd.f32 %v5386_v54, %v5265_v6 }
0x122d   :  { %v4156_v51 = vpop.eup %4155  ;;  %4159 = vtanh.f32 %v2588_v31  ;;  %v3006_v11 = vmul.f32 %v4154_v27, %v5229_v13  ;;  %v2977_v27 = vadd.f32 %v5386_v54, %v5231_v40 }
0x122e   :  { %4161 = vtanh.f32 %v2782_v45  ;;  %v2523_v3 = vmul.f32 %v4156_v51, %v5229_v13  ;;  %v2743_v39 = vsel %vm2335_vm4, %v2717_v35, 0.0 }
0x122f   :  { %v3022_v37 = vsel %vm2335_vm4, %v3006_v11, 0.0  ;;  %v5476_v11 = vadd.s32 4294967272, %v4592_v2 }
0x1230   :  { %v2553_v9 = vsel %vm2335_vm4, %v2523_v3, 0.0  ;;  %v2784_v3 = vadd.f32 %v5304_v52, %v5320_v7 }
0x1232   :  { %2928 = vadd.xlane.f32.xlu0 %v2927_v62  ;;  %v2783_v62 = vadd.f32 %v5304_v52, %v5294_v19 }
0x1233   :  { %2643 = vadd.xlane.f32.xlu2 %v2642_v12  ;;  %v4158_v12 = vpop.eup %4157 }
0x1234   :  { %2833 = vadd.xlane.f32.xlu1 %v2832_v30  ;;  %v4160_v30 = vpop.eup %4159  ;;  %4163 = vtanh.f32 %v2783_v62 }
0x1235   :  { %v4162_v63 = vpop.eup %4161  ;;  %4165 = vtanh.f32 %v2879_v55  ;;  %v2620_v18 = vmul.f32 %v4160_v30, %v5229_v13 }
0x1236   :  { %4167 = vtanh.f32 %v2589_v56  ;;  %v2814_v44 = vmul.f32 %v4162_v63, %v5229_v13 }
0x1237   :  { %v2648_v60 = vsel %vm2335_vm4, %v2620_v18, 0.0  ;;  %v2979_v18 = vadd.f32 %v5386_v54, %v5294_v19 }
0x1238   :  { %v2838_v49 = vsel %vm2335_vm4, %v2814_v44, 0.0  ;;  %v2881_v44 = vadd.f32 %v5345_v17, %v5294_v19 }
0x123a   :  { %2551 = vadd.xlane.f32.xlu0 %v2550_v47  ;;  %v3008_v47 = vmul.f32 %v4158_v12, %v5229_v13  ;;  %v4164_v15 = vpop.eup %4163 }
0x123b   :  { %2925 = vadd.xlane.f32.xlu2 %v2924_v36  ;;  %v4166_v53 = vpop.eup %4165  ;;  %v2815_v61 = vmul.f32 %v4164_v15, %v5229_v13 }
0x123c   :  { %2358 = vadd.xlane.f32.xlu1 %v2357_v8  ;;  %v2687_v8 = vadd.f32 %v5275_v38, %v5364_v20  ;;  %v3028_v5 = vsel %vm2335_vm4, %v3008_v47, 0.0  ;;  %v2911_v4 = vmul.f32 %v4166_v53, %v5229_v13 }
0x123d   :  { %v2841_v45 = vsel %vm2335_vm4, %v2815_v61, 0.0 }
0x123e   :  { %4169 = vtanh.f32 %v2687_v8  ;;  %v2933_v35 = vsel %vm2335_vm4, %v2911_v4, 0.0  ;;  %v2981_v4 = vadd.f32 %v5386_v54, %v5364_v20 }
0x123f   :  { %4171 = vtanh.f32 %v2686_v50  ;;  %v2785_v50 = vadd.f32 %v5304_v52, %v5364_v20 }
0x1242   :  { %2836 = vadd.xlane.f32.xlu0 %v2835_v46  ;;  %v2880_v46 = vadd.f32 %v5345_v17, %v5265_v6 }
0x1243   :  { %2456 = vadd.xlane.f32.xlu2 %v2455_v41  ;;  %v4168_v41 = vpop.eup %4167 }
0x1244   :  { %2646 = vadd.xlane.f32.xlu1 %v2645_v0  ;;  %v5460_v0 = vpop.f32.mrf.mxu3  ;;  %4173 = vtanh.f32 %v2880_v46 }
0x1245   :  { %4175 = vtanh.f32 %v2978_v10 }
0x1246   :  { %4177 = vtanh.f32 %v2977_v27  ;;  %v2883_v27 = vadd.f32 %v5345_v17, %v5364_v20 }
0x1247   :  { %4179 = vtanh.f32 %v2784_v3 }
0x1248   :  { %4181 = vtanh.f32 %v2979_v18  ;;  %v2980_v18 = vadd.f32 %v5386_v54, %v5320_v7 }
0x1249   :  { %4183 = vtanh.f32 %v2881_v44 }
0x124a   :  { %3026 = vadd.xlane.f32.xlu0 %v3025_v32  ;;  %v2621_v32 = vmul.f32 %v4168_v41, %v5229_v13  ;;  %4185 = vtanh.f32 %v2785_v50 }
0x124b   :  { %2741 = vadd.xlane.f32.xlu2 %v2740_v26  ;;  %4187 = vtanh.f32 %v2981_v4 }
0x124c   :  { %2931 = vadd.xlane.f32.xlu1 %v2930_v34  ;;  %v4170_v34 = vpop.eup %4169  ;;  %v2651_v62 = vsel %vm2335_vm4, %v2621_v32, 0.0  ;;  %v2882_v32 = vadd.f32 %v5345_v17, %v5320_v7 }
0x124d   :  { %v4172_v6 = vpop.eup %4171  ;;  %v2719_v55 = vmul.f32 %v4170_v34, %v5229_v13 }
0x124e   :  { %v2718_v56 = vmul.f32 %v4172_v6, %v5229_v13  ;;  %v5528_v6 = vadd.s32 4294967264, %v4592_v2  ;;  %4189 = vtanh.f32 %v2882_v32 }
0x124f   :  { %4191 = vtanh.f32 %v2883_v27 }
0x1252   :  { %2744 = vadd.xlane.f32.xlu0 %v2743_v39  ;;  %v4174_v39 = vpop.eup %4173 }
0x1253   :  { %3023 = vadd.xlane.f32.xlu2 %v3022_v37  ;;  %v2912_v63 = vmul.f32 %v4174_v39, %v5229_v13 }
0x1254   :  { %2554 = vadd.xlane.f32.xlu1 %v2553_v9 }
0x1255   :  { %v2436_v33 = vpop.xlane.xlu0 %2435 }
0x1256   :  { %v2341_v29 = vpop.xlane.xlu2 %2340  ;;  %v3148_v59 = vperm.slane %v2436_v33, %v4592_v2  ;;  %v5486_v33 = vpop.f32.mrf.mxu3 }
0x1257   :  { %v3088_v14 = vperm.slane %v2341_v29, %v5437_v58  ;;  %v2338_v36 = vpop.xlane.xlu1 %2337 }
0x1258   :  { %v3086_v16 = vperm.slane %v2338_v36, %v4592_v2  ;;  %v2749_v36 = vsel %vm2335_vm4, %v2719_v55, 0.0 }
0x125a   :  { %v3090_v48 = vsel %vm3089_vm3, %v3088_v14, %v3086_v16  ;;  %3029 = vadd.xlane.f32.xlu0 %v3028_v5  ;;  %v4176_v16 = vpop.eup %4175  ;;  %v2746_v5 = vsel %vm2335_vm4, %v2718_v56, 0.0 }
0x125b   :  { %2649 = vadd.xlane.f32.xlu2 %v2648_v60  ;;  %v2936_v60 = vsel %vm2335_vm4, %v2912_v63, 0.0  ;;  %v3010_v53 = vmul.f32 %v4176_v16, %v5229_v13 }
0x125c   :  { %2839 = vadd.xlane.f32.xlu1 %v2838_v49 }
0x125d   :  { %v2534_v38 = vpop.xlane.xlu0 %2533 }
0x125e   :  { %v2439_v1 = vpop.xlane.xlu2 %2438  ;;  %v3196_v47 = vperm.slane %v2534_v38, %v4592_v2  ;;  %v5517_v10 = vpop.f32.mrf.mxu3 }
0x125f   :  { %v3149_v21 = vperm.slane %v2439_v1, %v5437_v58  ;;  %v2344_v22 = vpop.xlane.xlu1 %2343 }
0x1260   :  { %v3092_v31 = vperm.slane %v2344_v22, %v5457_v42  ;;  %v3034_v22 = vsel %vm2335_vm4, %v3010_v53, 0.0 }
0x1261   :  { %v3150_v26 = vsel %vm3089_vm3, %v3149_v21, %v3148_v59  ;;  %v5511_v59 = vpop.f32.mrf.mxu0 }
0x1262   :  { %v3094_v51 = vsel %vm3093_vm8, %v3092_v31, %v3090_v48  ;;  %2842 = vadd.xlane.f32.xlu0 %v2841_v45  ;;  %v4178_v48 = vpop.eup %4177  ;;  %v5525_v3 = vperm.slane %v5511_v59, 0 }
0x1263   :  { %2934 = vadd.xlane.f32.xlu2 %v2933_v35  ;;  %v4180_v46 = vpop.eup %4179  ;;  %v3009_v41 = vmul.f32 %v4178_v48, %v5229_v13 }
0x1264   :  { %2652 = vadd.xlane.f32.xlu1 %v2651_v62  ;;  %v2816_v61 = vmul.f32 %v4180_v46, %v5229_v13  ;;  %v4182_v31 = vpop.eup %4181  ;;  %v2294_v63 = vadd.f32 %v5525_v3, %v5439_v28  ;;  %v2295_v16 = vadd.f32 %v5525_v3, %v5460_v0 }
0x1265   :  { %v2445_v40 = vpop.xlane.xlu0 %2444  ;;  %v3031_v45 = vsel %vm2335_vm4, %v3009_v41, 0.0  ;;  %v4184_v34 = vpop.eup %4183  ;;  %v3011_v39 = vmul.f32 %v4182_v31, %v5229_v13  ;;  %v2296_v31 = vadd.f32 %v5525_v3, %v5486_v33 }
0x1266   :  { %v3153_v12 = vperm.slane %v2445_v40, %v5476_v11  ;;  %v2442_v37 = vpop.xlane.xlu2 %2441  ;;  %v4186_v35 = vpop.eup %4185  ;;  %v2913_v20 = vmul.f32 %v4184_v34, %v5229_v13  ;;  %4193 = vtanh.f32 %v2294_v63  ;;  %v5575_v34 = vadd.s32 4294967256, %v4592_v2 }
0x1267   :  { %v3151_v30 = vperm.slane %v2442_v37, %v5457_v42  ;;  %v2537_v9 = vpop.xlane.xlu1 %2536  ;;  %v2817_v56 = vmul.f32 %v4186_v35, %v5229_v13  ;;  %v5549_v48 = vpop.f32.mrf.mxu3  ;;  %4195 = vtanh.f32 %v2980_v18 }
0x1268   :  { %v3197_v29 = vperm.slane %v2537_v9, %v5437_v58  ;;  %v2939_v44 = vsel %vm2335_vm4, %v2913_v20, 0.0  ;;  %4197 = vtanh.f32 %v2295_v16 }
0x1269   :  { %v3152_v14 = vsel %vm3093_vm8, %v3151_v30, %v3150_v26 }
0x126a   :  { %v3198_v8 = vsel %vm3089_vm3, %v3197_v29, %v3196_v47  ;;  %2750 = vadd.xlane.f32.xlu0 %v2749_v36  ;;  %v5501_v15 = vsel %vm3097_vm10, %v3153_v12, %v3152_v14  ;;  %v3037_v29 = vsel %vm2335_vm4, %v3011_v39, 0.0  ;;  %v4188_v14 = vpop.eup %4187 }
0x126b   :  { %2747 = vadd.xlane.f32.xlu2 %v2746_v5  ;;  %v2847_v5 = vsel %vm2335_vm4, %v2817_v56, 0.0  ;;  %v3013_v54 = vmul.f32 %v4188_v14, %v5229_v13 }
0x126c   :  { %2937 = vadd.xlane.f32.xlu1 %v2936_v60  ;;  %v5552_v60 = vperm.slane %v5511_v59, 1 }
0x126d   :  { %v2635_v19 = vpop.xlane.xlu0 %2634 }
0x126e   :  { %v2347_v49 = vpop.xlane.xlu2 %2346  ;;  %v3245_v55 = vperm.slane %v2635_v19, %v5437_v58  ;;  %v2394_v4 = vadd.f32 %v5552_v60, %v5439_v28  ;;  %v2396_v18 = vadd.f32 %v5552_v60, %v5486_v33 }
0x126f   :  { %v3096_v52 = vperm.slane %v2347_v49, %v5476_v11  ;;  %v2540_v38 = vpop.xlane.xlu1 %2539 }
0x1270   :  { %v3199_v1 = vperm.slane %v2540_v38, %v5457_v42  ;;  %v2395_v38 = vadd.f32 %v5552_v60, %v5460_v0 }
0x1271   :  { %v3098_v21 = vsel %vm3097_vm10, %v3096_v52, %v3094_v51  ;;  %v2844_v51 = vsel %vm2335_vm4, %v2816_v61, 0.0 }
0x1272   :  { %v3200_v26 = vsel %vm3093_vm8, %v3199_v1, %v3198_v8  ;;  %3035 = vadd.xlane.f32.xlu0 %v3034_v22  ;;  %v4190_v8 = vpop.eup %4189  ;;  %v3043_v1 = vsel %vm2335_vm4, %v3013_v54, 0.0  ;;  %4199 = vtanh.f32 %v2395_v38  ;;  %v2397_v38 = vadd.f32 %v5552_v60, %v5517_v10 }
0x1273   :  { %3032 = vadd.xlane.f32.xlu2 %v3031_v45  ;;  %v4192_v50 = vpop.eup %4191  ;;  %v2914_v19 = vmul.f32 %v4190_v8, %v5229_v13  ;;  %4201 = vtanh.f32 %v2394_v4 }
0x1274   :  { %2845 = vadd.xlane.f32.xlu1 %v2844_v51  ;;  %v2915_v41 = vmul.f32 %v4192_v50, %v5229_v13  ;;  %4203 = vtanh.f32 %v2296_v31 }
0x1275   :  { %v2543_v62 = vpop.xlane.xlu0 %2542  ;;  %v2942_v32 = vsel %vm2335_vm4, %v2914_v19, 0.0 }
0x1276   :  { %v3201_v40 = vperm.slane %v2543_v62, %v5476_v11  ;;  %v2632_v17 = vpop.xlane.xlu2 %2631  ;;  %v2945_v45 = vsel %vm2335_vm4, %v2915_v41, 0.0  ;;  %v5578_v62 = vpop.f32.mrf.mxu3 }
0x1277   :  { %v3244_v12 = vperm.slane %v2632_v17, %v4592_v2  ;;  %v2350_v37 = vpop.xlane.xlu1 %2349 }
0x1278   :  { %v3202_v30 = vsel %vm3097_vm10, %v3201_v40, %v3200_v26  ;;  %v3100_v9 = vperm.slane %v2350_v37, %v5528_v6 }
0x1279   :  { %v3246_v47 = vsel %vm3089_vm3, %v3245_v55, %v3244_v12 }
0x127a   :  { %v3102_v36 = vsel %vm3101_vm12, %v3100_v9, %v3098_v21  ;;  %3038 = vadd.xlane.f32.xlu0 %v3037_v29  ;;  %v4194_v21 = vpop.eup %4193 }
0x127b   :  { %2940 = vadd.xlane.f32.xlu2 %v2939_v44  ;;  %v4196_v26 = vpop.eup %4195  ;;  %v2327_v35 = vmul.f32 %v4194_v21, %v5229_v13  ;;  %v2297_v21 = vadd.f32 %v5525_v3, %v5517_v10 }
0x127c   :  { %2848 = vadd.xlane.f32.xlu1 %v2847_v5  ;;  %v4198_v27 = vpop.eup %4197  ;;  %v3012_v17 = vmul.f32 %v4196_v26, %v5229_v13  ;;  %v5620_v26 = vadd.s32 4294967248, %v4592_v2 }
0x127d   :  { %v2733_v7 = vpop.xlane.xlu0 %2732  ;;  %v2328_v37 = vmul.f32 %v4198_v27, %v5229_v13  ;;  %v2360_v29 = vsel %vm2335_vm4, %v2327_v35, 0.0  ;;  %v4200_v14 = vpop.eup %4199  ;;  %v5626_v35 = vperm.slane %v5511_v59, 3 }
0x127e   :  { %v2448_v46 = vpop.xlane.xlu2 %2447  ;;  %v3293_v20 = vperm.slane %v2733_v7, %v5437_v58  ;;  %v3040_v16 = vsel %vm2335_vm4, %v3012_v17, 0.0  ;;  %v4202_v8 = vpop.eup %4201  ;;  %v2427_v54 = vmul.f32 %v4200_v14, %v5229_v13 }
0x127f   :  { %v3155_v53 = vperm.slane %v2448_v46, %v5528_v6  ;;  %v2638_v49 = vpop.xlane.xlu1 %2637  ;;  %v2363_v5 = vsel %vm2335_vm4, %v2328_v37, 0.0  ;;  %v4204_v50 = vpop.eup %4203  ;;  %v2591_v14 = vadd.f32 %v5626_v35, %v5460_v0 }
0x1280   :  { %v3247_v52 = vperm.slane %v2638_v49, %v5457_v42  ;;  %v2329_v49 = vmul.f32 %v4204_v50, %v5229_v13  ;;  %v5606_v41 = vpop.f32.mrf.mxu3  ;;  %v2461_v4 = vsel %vm2335_vm4, %v2427_v54, 0.0 }
0x1281   :  { %v3156_v61 = vsel %vm3101_vm12, %v3155_v53, %v5501_v15  ;;  %v5572_v15 = vperm.slane %v5511_v59, 2 }
0x1282   :  { %v3248_v22 = vsel %vm3093_vm8, %v3247_v52, %v3246_v47  ;;  %3044 = vadd.xlane.f32.xlu0 %v3043_v1 }
0x1283   :  { %2943 = vadd.xlane.f32.xlu2 %v2942_v32  ;;  %v2492_v63 = vadd.f32 %v5572_v15, %v5439_v28 }
0x1284   :  { %2946 = vadd.xlane.f32.xlu1 %v2945_v45  ;;  %v2494_v45 = vadd.f32 %v5572_v15, %v5486_v33 }
0x1285   :  { %v2546_v51 = vpop.xlane.xlu0 %2545  ;;  %4205 = vtanh.f32 %v2492_v63 }
0x1286   :  { %v3203_v39 = vperm.slane %v2546_v51, %v5528_v6  ;;  %v2730_v40 = vpop.xlane.xlu2 %2729  ;;  %4207 = vtanh.f32 %v2396_v18 }
0x1287   :  { %v3292_v55 = vperm.slane %v2730_v40, %v4592_v2  ;;  %v2353_v12 = vpop.xlane.xlu1 %2352 }
0x1288   :  { %v5586_v56 = vsel %vm3101_vm12, %v3203_v39, %v3202_v30  ;;  %v3104_v9 = vperm.slane %v2353_v12, %v5575_v34  ;;  %v2493_v30 = vadd.f32 %v5572_v15, %v5460_v0  ;;  %v5631_v39 = vld [vmem:[%s6284_s5 + $0x5] ss:$0 sm:$0xff]  ;;  %v5649_v50 = vpop.f32.mrf.mxu3 }
0x1289   :  { %v3294_v47 = vsel %vm3089_vm3, %v3293_v20, %v3292_v55 }
0x128a   :  { %v5596_v44 = vsel %vm3105_vm14, %v3104_v9, %v3102_v36  ;;  %2361 = vadd.xlane.f32.xlu0 %v2360_v29  ;;  %v2426_v36 = vmul.f32 %v4202_v8, %v5229_v13  ;;  %4209 = vtanh.f32 %v2493_v30  ;;  %v2590_v8 = vadd.f32 %v5626_v35, %v5439_v28 }
0x128b   :  { %3041 = vadd.xlane.f32.xlu2 %v3040_v16  ;;  %v4206_v32 = vpop.eup %4205  ;;  %4211 = vtanh.f32 %v2397_v38 }
0x128c   :  { %2364 = vadd.xlane.f32.xlu1 %v2363_v5  ;;  %v2458_v13 = vsel %vm2335_vm4, %v2426_v36, 0.0  ;;  %v4208_v27 = vpop.eup %4207  ;;  %v2524_v40 = vmul.f32 %v5631_v39, %v4206_v32  ;;  %4213 = vtanh.f32 %v2297_v21 }
0x128d   :  { %v2828_v7 = vpop.xlane.xlu0 %2827  ;;  %v2428_v55 = vmul.f32 %v5631_v39, %v4208_v27  ;;  %4215 = vtanh.f32 %v2494_v45 }
0x128e   :  { %v2451_v46 = vpop.xlane.xlu2 %2450  ;;  %v3340_v63 = vperm.slane %v2828_v7, %v4592_v2  ;;  %v2556_v30 = vsel %vm2335_vm4, %v2524_v40, 0.0  ;;  %4217 = vtanh.f32 %v2591_v14  ;;  %v2495_v40 = vadd.f32 %v5572_v15, %v5517_v10 }
0x128f   :  { %v3157_v19 = vperm.slane %v2451_v46, %v5575_v34  ;;  %v2641_v53 = vpop.xlane.xlu1 %2640  ;;  %v2464_v54 = vsel %vm2335_vm4, %v2428_v55, 0.0  ;;  %v2298_v46 = vadd.f32 %v5525_v3, %v5549_v48  ;;  %4219 = vtanh.f32 %v2590_v8 }
0x1290   :  { %v3249_v52 = vperm.slane %v2641_v53, %v5476_v11  ;;  %v4210_v51 = vpop.eup %4209  ;;  %v2398_v55 = vadd.f32 %v5552_v60, %v5549_v48  ;;  %v5703_v8 = vperm.slane %v5511_v59, 4 }
0x1291   :  { %v3158_v1 = vsel %vm3105_vm14, %v3157_v19, %v3156_v61  ;;  %v2366_v61 = vsel %vm2335_vm4, %v2329_v49, 0.0  ;;  %v2525_v9 = vmul.f32 %v5631_v39, %v4210_v51  ;;  %v4212_v5 = vpop.eup %4211  ;;  %v5658_v19 = vadd.f32 %v5572_v15, %v5649_v50 }
0x1292   :  { %v5616_v31 = vsel %vm3097_vm10, %v3249_v52, %v3248_v22  ;;  %2462 = vadd.xlane.f32.xlu0 %v2461_v4  ;;  %v4214_v36 = vpop.eup %4213  ;;  %v5662_v49 = vadd.f32 %v5626_v35, %v5649_v50  ;;  %v5665_v52 = vperm.slane %v5511_v59, 5  ;;  %4221 = vtanh.f32 %v2298_v46 }
0x1293   :  { %2459 = vadd.xlane.f32.xlu2 %v2458_v13  ;;  %v4216_v53 = vpop.eup %4215  ;;  %v2330_v32 = vmul.f32 %v5631_v39, %v4214_v36  ;;  %v5671_v13 = vperm.slane %v5511_v59, 6  ;;  %4223 = vtanh.f32 %v2495_v40 }
0x1294   :  { %2367 = vadd.xlane.f32.xlu1 %v2366_v61  ;;  %v2526_v61 = vmul.f32 %v5631_v39, %v4216_v53  ;;  %4225 = vtanh.f32 %v2398_v55  ;;  %v5727_v55 = vadd.s32 4294967240, %v4592_v2 }
0x1295   :  { %v2454_v22 = vpop.xlane.xlu0 %2453 }
0x1296   :  { %v3159_v17 = vperm.slane %v2454_v22, %v5620_v26  ;;  %v2736_v20 = vpop.xlane.xlu2 %2735  ;;  %v2562_v14 = vsel %vm2335_vm4, %v2526_v61, 0.0 }
0x1297   :  { %v3295_v12 = vperm.slane %v2736_v20, %v5457_v42  ;;  %v2831_v37 = vpop.xlane.xlu1 %2830 }
0x1298   :  { %v5640_v29 = vsel %vm3109_vm1, %v3159_v17, %v3158_v1  ;;  %v3341_v18 = vperm.slane %v2831_v37, %v5437_v58  ;;  %v2429_v1 = vmul.f32 %v5631_v39, %v4212_v5  ;;  %v4218_v37 = vpop.eup %4217 }
0x1299   :  { %v3296_v16 = vsel %vm3093_vm8, %v3295_v12, %v3294_v47  ;;  %v2559_v47 = vsel %vm2335_vm4, %v2525_v9, 0.0  ;;  %v5690_v12 = vadd.f32 %v5665_v52, %v5649_v50  ;;  %v2623_v5 = vmul.f32 %v5631_v39, %v4218_v37 }
0x129a   :  { %v3342_v7 = vsel %vm3089_vm3, %v3341_v18, %v3340_v63  ;;  %2557 = vadd.xlane.f32.xlu0 %v2556_v30  ;;  %v2467_v20 = vsel %vm2335_vm4, %v2429_v1, 0.0  ;;  %v2369_v63 = vsel %vm2335_vm4, %v2330_v32, 0.0  ;;  %v4220_v18 = vpop.eup %4219  ;;  %v2689_v1 = vadd.f32 %v5703_v8, %v5460_v0 }
0x129b   :  { %2465 = vadd.xlane.f32.xlu2 %v2464_v54  ;;  %v4222_v30 = vpop.eup %4221  ;;  %v2622_v46 = vmul.f32 %v5631_v39, %v4220_v18  ;;  %v2688_v32 = vadd.f32 %v5703_v8, %v5439_v28 }
0x129c   :  { %2560 = vadd.xlane.f32.xlu1 %v2559_v47  ;;  %v2331_v53 = vmul.f32 %v5631_v39, %v4222_v30 }
0x129d   :  { %v2739_v38 = vpop.xlane.xlu0 %2738  ;;  %v2654_v61 = vsel %vm2335_vm4, %v2622_v46, 0.0 }
0x129e   :  { %v3297_v4 = vperm.slane %v2739_v38, %v5476_v11  ;;  %v2356_v21 = vpop.xlane.xlu2 %2355 }
0x129f   :  { %v3108_v45 = vperm.slane %v2356_v21, %v5620_v26  ;;  %v2549_v27 = vpop.xlane.xlu1 %2548  ;;  %v2657_v21 = vsel %vm2335_vm4, %v2623_v5, 0.0 }
0x12a0   :  { %v5676_v51 = vsel %vm3097_vm10, %v3297_v4, %v3296_v16  ;;  %v3205_v22 = vperm.slane %v2549_v27, %v5575_v34  ;;  %v5700_v16 = vadd.f32 %v5671_v13, %v5649_v50 }
0x12a1   :  { %v5683_v17 = vsel %vm3109_vm1, %v3108_v45, %v5596_v44  ;;  %v2592_v44 = vadd.f32 %v5626_v35, %v5486_v33  ;;  %v4224_v45 = vpop.eup %4223 }
0x12a2   :  { %v3206_v9 = vsel %vm3105_vm14, %v3205_v22, %v5586_v56  ;;  %2468 = vadd.xlane.f32.xlu0 %v2467_v20  ;;  %v2299_v22 = vadd.f32 %v5525_v3, %v5578_v62  ;;  %v4226_v40 = vpop.eup %4225 }
0x12a3   :  { %2370 = vadd.xlane.f32.xlu2 %v2369_v63  ;;  %4227 = vtanh.f32 %v2592_v44  ;;  %v2430_v18 = vmul.f32 %v5631_v39, %v4226_v40 }
0x12a4   :  { %2563 = vadd.xlane.f32.xlu1 %v2562_v14  ;;  %4229 = vtanh.f32 %v2689_v1 }
0x12a5   :  { %v2929_v56 = vpop.xlane.xlu0 %2928  ;;  %4231 = vtanh.f32 %v2688_v32  ;;  %v2593_v32 = vadd.f32 %v5626_v35, %v5517_v10 }
0x12a6   :  { %v2644_v54 = vpop.xlane.xlu2 %2643  ;;  %4233 = vtanh.f32 %v2299_v22  ;;  %v3389_v14 = vperm.slane %v2929_v56, %v5437_v58  ;;  %v2399_v56 = vadd.f32 %v5552_v60, %v5578_v62 }
0x12a7   :  { %v3251_v36 = vperm.slane %v2644_v54, %v5528_v6  ;;  %v2834_v47 = vpop.xlane.xlu1 %2833 }
0x12a8   :  { %v3343_v38 = vperm.slane %v2834_v47, %v5457_v42  ;;  %v2496_v47 = vadd.f32 %v5572_v15, %v5549_v48 }
0x12a9   :  { %v5714_v4 = vsel %vm3101_vm12, %v3251_v36, %v5616_v31  ;;  %v2372_v31 = vsel %vm2335_vm4, %v2331_v53, 0.0  ;;  %v4228_v20 = vpop.eup %4227 }
0x12aa   :  { %v5720_v27 = vsel %vm3093_vm8, %v3343_v38, %v3342_v7  ;;  %2658 = vadd.xlane.f32.xlu0 %v2657_v21  ;;  %v2527_v7 = vmul.f32 %v5631_v39, %v4224_v45  ;;  %v2624_v54 = vmul.f32 %v5631_v39, %v4228_v20  ;;  %v4230_v1 = vpop.eup %4229  ;;  %4235 = vtanh.f32 %v2496_v47 }
0x12ab   :  { %2655 = vadd.xlane.f32.xlu2 %v2654_v61  ;;  %v4232_v45 = vpop.eup %4231  ;;  %4237 = vtanh.f32 %v2399_v56 }
0x12ac   :  { %2373 = vadd.xlane.f32.xlu1 %v2372_v31  ;;  %v2565_v38 = vsel %vm2335_vm4, %v2527_v7, 0.0  ;;  %v2660_v61 = vsel %vm2335_vm4, %v2624_v54, 0.0  ;;  %v4234_v22 = vpop.eup %4233  ;;  %v2721_v31 = vmul.f32 %v5631_v39, %v4230_v1  ;;  %4239 = vtanh.f32 %v2593_v32 }
0x12ad   :  { %v2552_v37 = vpop.xlane.xlu0 %2551 }
0x12ae   :  { %v3207_v63 = vperm.slane %v2552_v37, %v5620_v26  ;;  %v2926_v44 = vpop.xlane.xlu2 %2925 }
0x12af   :  { %v3388_v30 = vperm.slane %v2926_v44, %v4592_v2  ;;  %v2359_v5 = vpop.xlane.xlu1 %2358  ;;  %v2786_v44 = vadd.f32 %v5665_v52, %v5439_v28 }
0x12b0   :  { %v5736_v46 = vsel %vm3109_vm1, %v3207_v63, %v3206_v9  ;;  %v3112_v36 = vperm.slane %v2359_v5, %v5727_v55  ;;  %v2470_v9 = vsel %vm2335_vm4, %v2430_v18, 0.0  ;;  %v2332_v63 = vmul.f32 %v5631_v39, %v4234_v22  ;;  %v4236_v5 = vpop.eup %4235 }
0x12b1   :  { %v5742_v53 = vsel %vm3089_vm3, %v3389_v14, %v3388_v30  ;;  %v2755_v14 = vsel %vm2335_vm4, %v2721_v31, 0.0  ;;  %v2690_v30 = vadd.f32 %v5703_v8, %v5486_v33  ;;  %v4238_v47 = vpop.eup %4237  ;;  %4241 = vtanh.f32 %v2786_v44 }
0x12b2   :  { %v3114_v21 = vsel %vm3113_vm2, %v3112_v36, %v5683_v17  ;;  %2566 = vadd.xlane.f32.xlu0 %v2565_v38  ;;  %v2720_v17 = vmul.f32 %v5631_v39, %v4232_v45  ;;  %v2375_v38 = vsel %vm2335_vm4, %v2332_v63, 0.0  ;;  %v4240_v56 = vpop.eup %4239  ;;  %v2431_v32 = vmul.f32 %v5631_v39, %v4238_v47 }
0x12b3   :  { %2471 = vadd.xlane.f32.xlu2 %v2470_v9  ;;  %4243 = vtanh.f32 %v2690_v30  ;;  %v2625_v45 = vmul.f32 %v5631_v39, %v4240_v56  ;;  %v2300_v31 = vadd.f32 %v5525_v3, %v5606_v41  ;;  %v2691_v47 = vadd.f32 %v5703_v8, %v5517_v10 }
0x12b4   :  { %2661 = vadd.xlane.f32.xlu1 %v2660_v61  ;;  %v2752_v36 = vsel %vm2335_vm4, %v2720_v17, 0.0  ;;  %v2400_v61 = vadd.f32 %v5552_v60, %v5606_v41  ;;  %v2473_v17 = vsel %vm2335_vm4, %v2431_v32, 0.0  ;;  %v2594_v56 = vadd.f32 %v5626_v35, %v5549_v48 }
0x12b5   :  { %v5753_v40 = vpop.xlane.xlu0 %2836  ;;  %v2663_v63 = vsel %vm2335_vm4, %v2625_v45, 0.0 }
0x12b6   :  { %v2457_v20 = vpop.xlane.xlu2 %2456  ;;  %4245 = vtanh.f32 %v2400_v61 }
0x12b7   :  { %v3161_v37 = vperm.slane %v2457_v20, %v5727_v55  ;;  %v5758_v7 = vpop.xlane.xlu1 %2646  ;;  %v4242_v20 = vpop.eup %4241  ;;  %4247 = vtanh.f32 %v2300_v31 }
0x12b8   :  { %4249 = vtanh.f32 %v2691_v47  ;;  %v3253_v47 = vperm.slane %v5758_v7, %v5575_v34  ;;  %v2498_v7 = vadd.f32 %v5572_v15, %v5606_v41 }
0x12b9   :  { %v3162_v18 = vsel %vm3113_vm2, %v3161_v37, %v5640_v29  ;;  %v2528_v29 = vmul.f32 %v5631_v39, %v4236_v5  ;;  %v4244_v37 = vpop.eup %4243  ;;  %4251 = vtanh.f32 %v2594_v56 }
0x12ba   :  { %v3468_v54 = vsel %vm608_vm5, %v3114_v21, %v3162_v18  ;;  %2756 = vadd.xlane.f32.xlu0 %v2755_v14  ;;  %v2818_v18 = vmul.f32 %v5631_v39, %v4242_v20  ;;  %v2722_v30 = vmul.f32 %v5631_v39, %v4244_v37 }
0x12bb   :  { %2753 = vadd.xlane.f32.xlu2 %v2752_v36  ;;  %v2568_v22 = vsel %vm2335_vm4, %v2528_v29, 0.0 }
0x12bc   :  { %2376 = vadd.xlane.f32.xlu1 %v2375_v38  ;;  %v2850_v38 = vsel %vm2335_vm4, %v2818_v18, 0.0  ;;  %v4246_v29 = vpop.eup %4245  ;;  %v2758_v45 = vsel %vm2335_vm4, %v2722_v30, 0.0 }
0x12bd   :  { %v5771_v1 = vpop.xlane.xlu0 %3026  ;;  %v4248_v61 = vpop.eup %4247  ;;  %v2432_v20 = vmul.f32 %v5631_v39, %v4246_v29 }
0x12be   :  { %v5774_v9 = vpop.xlane.xlu2 %2741  ;;  %v2333_v37 = vmul.f32 %v5631_v39, %v4248_v61  ;;  %v4250_v30 = vpop.eup %4249 }
0x12bf   :  { %v5777_v21 = vpop.xlane.xlu1 %2931  ;;  %v2476_v18 = vsel %vm2335_vm4, %v2432_v20, 0.0  ;;  %v2723_v29 = vmul.f32 %v5631_v39, %v4250_v30  ;;  %v3254_v20 = vsel %vm3105_vm14, %v3253_v47, %v5714_v4  ;;  %v3299_v4 = vperm.slane %v5774_v9, %v5528_v6 }
0x12c2   :  { %2569 = vadd.xlane.f32.xlu0 %v2568_v22 }
0x12c3   :  { %2474 = vadd.xlane.f32.xlu2 %v2473_v17 }
0x12c4   :  { %2664 = vadd.xlane.f32.xlu1 %v2663_v63 }
0x12c5   :  { %v5787_v44 = vpop.xlane.xlu0 %2744 }
0x12c6   :  { %v5790_v14 = vpop.xlane.xlu2 %3023 }
0x12c7   :  { %v2555_v5 = vpop.xlane.xlu1 %2554 }
0x12c8   :  { %v3209_v36 = vperm.slane %v2555_v5, %v5727_v55  ;;  %v2378_v5 = vsel %vm2335_vm4, %v2333_v37, 0.0 }
0x12ca   :  { %v3210_v32 = vsel %vm3113_vm2, %v3209_v36, %v5736_v46  ;;  %2851 = vadd.xlane.f32.xlu0 %v2850_v38  ;;  %v2885_v46 = vadd.f32 %v5671_v13, %v5460_v0  ;;  %v4252_v36 = vpop.eup %4251 }
0x12cb   :  { %v3470_v22 = vsel %vm2106_vm15, %v3468_v54, %v3210_v32  ;;  %2759 = vadd.xlane.f32.xlu2 %v2758_v45  ;;  %v2884_v54 = vadd.f32 %v5671_v13, %v5439_v28  ;;  %v2626_v45 = vmul.f32 %v5631_v39, %v4252_v36 }
0x12cc   :  { %4253 = vtanh.f32 %v2885_v46  ;;  %v2761_v46 = vsel %vm2335_vm4, %v2723_v29, 0.0 }
0x12cd   :  { %v5803_v31 = vpop.xlane.xlu0 %3029  ;;  %4255 = vtanh.f32 %v2884_v54 }
0x12ce   :  { %v2650_v17 = vpop.xlane.xlu2 %2649  ;;  %4257 = vtanh.f32 %v2498_v7 }
0x12cf   :  { %v5807_v63 = vpop.xlane.xlu1 %2839  ;;  %v3255_v38 = vperm.slane %v2650_v17, %v5620_v26 }
0x12d1   :  { %v3256_v17 = vsel %vm3109_vm1, %v3255_v38, %v3254_v20  ;;  %v3301_v38 = vperm.slane %v5787_v44, %v5575_v34  ;;  %v2789_v44 = vadd.f32 %v5665_v52, %v5517_v10 }
0x12d2   :  { %2477 = vadd.xlane.f32.xlu0 %v2476_v18  ;;  %v2401_v18 = vadd.f32 %v5552_v60, %v5649_v50  ;;  %v4254_v54 = vpop.eup %4253 }
0x12d3   :  { %2379 = vadd.xlane.f32.xlu2 %v2378_v5  ;;  %v2666_v5 = vsel %vm2335_vm4, %v2626_v45, 0.0  ;;  %v4256_v36 = vpop.eup %4255  ;;  %v2917_v60 = vmul.f32 %v5631_v39, %v4254_v54 }
0x12d4   :  { %4259 = vtanh.f32 %v2401_v18  ;;  %v2916_v45 = vmul.f32 %v5631_v39, %v4256_v36  ;;  %v2692_v18 = vadd.f32 %v5703_v8, %v5549_v48  ;;  %v4258_v54 = vpop.eup %4257 }
0x12d5   :  { %v5818_v56 = vpop.xlane.xlu0 %2842  ;;  %4261 = vtanh.f32 %v2789_v44 }
0x12d6   :  { %v5821_v32 = vpop.xlane.xlu2 %2934  ;;  %4263 = vtanh.f32 %v2692_v18  ;;  %v3349_v18 = vperm.slane %v5818_v56, %v5575_v34 }
0x12d7   :  { %v2653_v61 = vpop.xlane.xlu1 %2652 }
0x12d8   :  { %v3257_v37 = vperm.slane %v2653_v61, %v5727_v55 }
0x12da   :  { %v3258_v30 = vsel %vm3113_vm2, %v3257_v37, %v3256_v17  ;;  %2762 = vadd.xlane.f32.xlu0 %v2761_v46  ;;  %v3300_v37 = vsel %vm3101_vm12, %v3299_v4, %v5676_v51  ;;  %v2951_v46 = vsel %vm2335_vm4, %v2917_v60, 0.0  ;;  %v2948_v51 = vsel %vm2335_vm4, %v2916_v45, 0.0 }
0x12db   :  { %v3472_v47 = vsel %vm2109_vm7, %v3470_v22, %v3258_v30  ;;  %2667 = vadd.xlane.f32.xlu2 %v2666_v5  ;;  %v3302_v17 = vsel %vm3105_vm14, %v3301_v38, %v3300_v37  ;;  %v4260_v5 = vpop.eup %4259  ;;  %v5859_v4 = vperm.slane %v5511_v59, 7 }
0x12dd   :  { %v2751_v29 = vpop.xlane.xlu0 %2750  ;;  %v2983_v45 = vadd.f32 %v5859_v4, %v5460_v0 }
0x12de   :  { %v3305_v61 = vperm.slane %v2751_v29, %v5727_v55  ;;  %v2748_v20 = vpop.xlane.xlu2 %2747  ;;  %v2530_v29 = vmul.f32 %v5631_v39, %v4258_v54 }
0x12df   :  { %v3303_v9 = vperm.slane %v2748_v20, %v5620_v26  ;;  %v5846_v22 = vpop.xlane.xlu1 %2937  ;;  %4265 = vtanh.f32 %v2983_v45  ;;  %v3391_v45 = vperm.slane %v5777_v21, %v5457_v42 }
0x12e0   :  { %v2574_v37 = vsel %vm2335_vm4, %v2530_v29, 0.0 }
0x12e1   :  { %v3304_v7 = vsel %vm3109_vm1, %v3303_v9, %v3302_v17  ;;  %v4262_v9 = vpop.eup %4261  ;;  %v3345_v17 = vperm.slane %v5753_v40, %v5476_v11 }
0x12e2   :  { %v3306_v30 = vsel %vm3113_vm2, %v3305_v61, %v3304_v7  ;;  %2952 = vadd.xlane.f32.xlu0 %v2951_v46  ;;  %v2433_v61 = vmul.f32 %v5631_v39, %v4260_v5  ;;  %v4264_v7 = vpop.eup %4263  ;;  %v3347_v46 = vperm.slane %v5807_v63, %v5528_v6 }
0x12e3   :  { %2949 = vadd.xlane.f32.xlu2 %v2948_v51  ;;  %v3474_v36 = vsel %vm2112_vm13, %v3472_v47, %v3306_v30  ;;  %v2982_v47 = vadd.f32 %v5859_v4, %v5439_v28  ;;  %v2821_v28 = vmul.f32 %v5631_v39, %v4262_v9  ;;  %v3346_v40 = vsel %vm3097_vm10, %v3345_v17, %v5720_v27 }
0x12e4   :  { %v2479_v44 = vsel %vm2335_vm4, %v2433_v61, 0.0  ;;  %v2724_v5 = vmul.f32 %v5631_v39, %v4264_v7  ;;  %v3348_v63 = vsel %vm3101_vm12, %v3347_v46, %v3346_v40  ;;  %v3393_v9 = vperm.slane %v5821_v32, %v5476_v11 }
0x12e5   :  { %v5861_v38 = vpop.xlane.xlu0 %3035  ;;  %4267 = vtanh.f32 %v2982_v47  ;;  %v3350_v61 = vsel %vm3105_vm14, %v3349_v18, %v3348_v63  ;;  %v2859_v27 = vsel %vm2335_vm4, %v2821_v28, 0.0  ;;  %v4266_v47 = vpop.eup %4265  ;;  %v3395_v46 = vperm.slane %v5846_v22, %v5528_v6 }
0x12e6   :  { %v5864_v60 = vpop.xlane.xlu2 %3032  ;;  %v3015_v32 = vmul.f32 %v5631_v39, %v4266_v47  ;;  %v3436_v40 = vperm.slane %v5790_v14, %v4592_v2 }
0x12e7   :  { %v2846_v20 = vpop.xlane.xlu1 %2845  ;;  %v3441_v14 = vperm.slane %v5864_v60, %v5476_v11  ;;  %v3443_v60 = vperm.slane %v5861_v38, %v5528_v6 }
0x12e8   :  { %v3351_v54 = vperm.slane %v2846_v20, %v5620_v26  ;;  %v2693_v20 = vadd.f32 %v5703_v8, %v5578_v62 }
0x12ea   :  { %2575 = vadd.xlane.f32.xlu0 %v2574_v37  ;;  %v3352_v37 = vsel %vm3109_vm1, %v3351_v54, %v3350_v61  ;;  %4269 = vtanh.f32 %v2693_v20  ;;  %v3392_v54 = vsel %vm3093_vm8, %v3391_v45, %v5742_v53  ;;  %v2984_v53 = vadd.f32 %v5859_v4, %v5486_v33 }
0x12eb   :  { %2480 = vadd.xlane.f32.xlu2 %v2479_v44  ;;  %v2764_v44 = vsel %vm2335_vm4, %v2724_v5, 0.0  ;;  %v4268_v7 = vpop.eup %4267  ;;  %v3394_v5 = vsel %vm3097_vm10, %v3393_v9, %v3392_v54 }
0x12ec   :  { %v3014_v22 = vmul.f32 %v5631_v39, %v4268_v7  ;;  %v2787_v7 = vadd.f32 %v5665_v52, %v5460_v0  ;;  %4271 = vtanh.f32 %v2984_v53 }
0x12ed   :  { %v5880_v30 = vpop.xlane.xlu0 %3038 }
0x12ee   :  { %v2941_v51 = vpop.xlane.xlu2 %2940  ;;  %4273 = vtanh.f32 %v2787_v7 }
0x12ef   :  { %v2849_v29 = vpop.xlane.xlu1 %2848  ;;  %v3397_v21 = vperm.slane %v2941_v51, %v5575_v34  ;;  %v3396_v51 = vsel %vm3101_vm12, %v3395_v46, %v3394_v5 }
0x12f0   :  { %v3353_v56 = vperm.slane %v2849_v29, %v5727_v55 }
0x12f1   :  { %v3398_v20 = vsel %vm3105_vm14, %v3397_v21, %v3396_v51  ;;  %v3445_v21 = vperm.slane %v5880_v30, %v5575_v34  ;;  %v2791_v30 = vadd.f32 %v5665_v52, %v5578_v62 }
0x12f2   :  { %v3354_v17 = vsel %vm3113_vm2, %v3353_v56, %v3352_v37  ;;  %2860 = vadd.xlane.f32.xlu0 %v2859_v27  ;;  %v3437_v56 = vperm.slane %v5771_v1, %v5437_v58  ;;  %v3049_v37 = vsel %vm2335_vm4, %v3015_v32, 0.0  ;;  %v4270_v27 = vpop.eup %4269 }
0x12f3   :  { %v3476_v18 = vsel %vm2115_vm9, %v3474_v36, %v3354_v17  ;;  %2765 = vadd.xlane.f32.xlu2 %v2764_v44  ;;  %v3439_v36 = vperm.slane %v5803_v31, %v5457_v42  ;;  %v3046_v17 = vsel %vm2335_vm4, %v3014_v22, 0.0  ;;  %v2725_v32 = vmul.f32 %v5631_v39, %v4270_v27 }
0x12f4   :  { %v3438_v47 = vsel %vm3089_vm3, %v3437_v56, %v3436_v40  ;;  %4275 = vtanh.f32 %v2791_v30 }
0x12f5   :  { %v3045_v28 = vpop.xlane.xlu0 %3044  ;;  %v3440_v1 = vsel %vm3093_vm8, %v3439_v36, %v3438_v47 }
0x12f6   :  { %v2944_v63 = vpop.xlane.xlu2 %2943  ;;  %v3442_v46 = vsel %vm3097_vm10, %v3441_v14, %v3440_v1  ;;  %v3449_v22 = vperm.slane %v3045_v28, %v5727_v55 }
0x12f7   :  { %v3399_v29 = vperm.slane %v2944_v63, %v5620_v26  ;;  %v2947_v61 = vpop.xlane.xlu1 %2946  ;;  %v3444_v38 = vsel %vm3101_vm12, %v3443_v60, %v3442_v46 }
0x12f8   :  { %v3401_v45 = vperm.slane %v2947_v61, %v5727_v55  ;;  %v3446_v0 = vsel %vm3105_vm14, %v3445_v21, %v3444_v38  ;;  %v4272_v61 = vpop.eup %4271 }
0x12f9   :  { %v3400_v31 = vsel %vm3109_vm1, %v3399_v29, %v3398_v20  ;;  %v2767_v29 = vsel %vm2335_vm4, %v2725_v32, 0.0  ;;  %v2497_v20 = vadd.f32 %v5572_v15, %v5578_v62  ;;  %v3016_v27 = vmul.f32 %v5631_v39, %v4272_v61 }
0x12fa   :  { %v3402_v9 = vsel %vm3113_vm2, %v3401_v45, %v3400_v31  ;;  %3050 = vadd.xlane.f32.xlu0 %v3049_v37  ;;  %v4274_v45 = vpop.eup %4273  ;;  %v2695_v15 = vadd.f32 %v5703_v8, %v5649_v50  ;;  %v2788_v32 = vadd.f32 %v5665_v52, %v5486_v33 }
0x12fb   :  { %3047 = vadd.xlane.f32.xlu2 %v3046_v17  ;;  %v3478_v44 = vsel %vm6288_vm6, %v3476_v18, %v3402_v9  ;;  %vm6289_vm6 = vcmp.lt.s32.totalorder %v4592_v2, 49  ;;  %4277 = vtanh.f32 %v2497_v20  ;;  %v3052_v7 = vsel %vm2335_vm4, %v3016_v27, 0.0  ;;  %v4276_v21 = vpop.eup %4275 }
0x12fc   :  { %v2819_v46 = vmul.f32 %v5631_v39, %v4274_v45  ;;  %4279 = vtanh.f32 %v2695_v15  ;;  %v2823_v38 = vmul.f32 %v5631_v39, %v4276_v21  ;;  %v2301_v20 = vadd.f32 %v5525_v3, %v5649_v50 }
0x12fd   :  { %v2362_v54 = vpop.xlane.xlu0 %2361  ;;  %4281 = vtanh.f32 %v2788_v32  ;;  %v2987_v3 = vadd.f32 %v5859_v4, %v5578_v62 }
0x12fe   :  { %v3042_v40 = vpop.xlane.xlu2 %3041  ;;  %v3115_v5 = vperm.slane %v2362_v54, %v4592_v2  ;;  %v2865_v61 = vsel %vm2335_vm4, %v2823_v38, 0.0 }
0x12ff   :  { %v3447_v63 = vperm.slane %v3042_v40, %v5620_v26  ;;  %v2365_v18 = vpop.xlane.xlu1 %2364  ;;  %v2853_v40 = vsel %vm2335_vm4, %v2819_v46, 0.0 }
0x1300   :  { %v3116_v36 = vperm.slane %v2365_v18, %v5437_v58 }
0x1301   :  { %v3448_v51 = vsel %vm3109_vm1, %v3447_v63, %v3446_v0  ;;  %v4278_v63 = vpop.eup %4277 }
0x1302   :  { %v3117_v53 = vsel %vm3089_vm3, %v3116_v36, %v3115_v5  ;;  %2768 = vadd.xlane.f32.xlu0 %v2767_v29  ;;  %v3450_v56 = vsel %vm3113_vm2, %v3449_v22, %v3448_v51  ;;  %v2986_v51 = vadd.f32 %v5859_v4, %v5549_v48 }
0x1303   :  { %v3480_v14 = vsel %vm6290_vm11, %v3478_v44, %v3450_v56  ;;  %v4280_v56 = vpop.eup %4279 }
0x1304   :  { %v5953_v28 = vsel %vm6289_vm6, %v3480_v14, -1e+30  ;;  %4283 = vtanh.f32 %v2986_v51  ;;  %v4282_v27 = vpop.eup %4281  ;;  %v2989_v51 = vadd.f32 %v5859_v4, %v5649_v50 }
0x1305   :  { %v3485_v31 = vsel %vm2335_vm4, %v5953_v28, -inf  ;;  %v2463_v37 = vpop.xlane.xlu0 %2462  ;;  %4285 = vtanh.f32 %v2301_v20  ;;  %v2820_v46 = vmul.f32 %v5631_v39, %v4282_v27  ;;  %v2886_v20 = vadd.f32 %v5671_v13, %v5486_v33 }
0x1306   :  { %v2460_v47 = vpop.xlane.xlu2 %2459  ;;  %3486 = vmax.xlane.f32.xlu1 %v3485_v31  ;;  %v3164_v9 = vperm.slane %v2463_v37, %v5437_v58  ;;  %v2727_v37 = vmul.f32 %v5631_v39, %v4280_v56  ;;  %4287 = vtanh.f32 %v2987_v3 }
0x1307   :  { %v3163_v17 = vperm.slane %v2460_v47, %v4592_v2  ;;  %v2368_v1 = vpop.xlane.xlu1 %2367 }
0x1308   :  { %v3118_v60 = vperm.slane %v2368_v1, %v5457_v42 }
0x1309   :  { %v3165_v44 = vsel %vm3089_vm3, %v3164_v9, %v3163_v17 }
0x130a   :  { %v3119_v54 = vsel %vm3093_vm8, %v3118_v60, %v3117_v53  ;;  %3053 = vadd.xlane.f32.xlu0 %v3052_v7  ;;  %v2529_v53 = vmul.f32 %v5631_v39, %v4278_v63  ;;  %v2773_v7 = vsel %vm2335_vm4, %v2727_v37, 0.0  ;;  %v4284_v21 = vpop.eup %4283 }
0x130b   :  { %v3018_v63 = vmul.f32 %v5631_v39, %v4284_v21 }
0x130c   :  { %v2571_v45 = vsel %vm2335_vm4, %v2529_v53, 0.0 }
0x130d   :  { %v2558_v5 = vpop.xlane.xlu0 %2557 }
0x130e   :  { %v2466_v18 = vpop.xlane.xlu2 %2465  ;;  %2854 = vadd.xlane.f32.xlu1 %v2853_v40  ;;  %v3211_v0 = vperm.slane %v2558_v5, %v4592_v2  ;;  %v2595_v40 = vadd.f32 %v5626_v35, %v5578_v62  ;;  %v2856_v5 = vsel %vm2335_vm4, %v2820_v46, 0.0 }
0x130f   :  { %v3166_v22 = vperm.slane %v2466_v18, %v5457_v42  ;;  %v2561_v36 = vpop.xlane.xlu1 %2560  ;;  %v4286_v18 = vpop.eup %4285 }
0x1310   :  { %v3212_v30 = vperm.slane %v2561_v36, %v5437_v58  ;;  %4289 = vtanh.f32 %v2595_v40  ;;  %v2334_v53 = vmul.f32 %v5631_v39, %v4286_v18  ;;  %v4288_v56 = vpop.eup %4287 }
0x1311   :  { %v3167_v29 = vsel %vm3093_vm8, %v3166_v22, %v3165_v44  ;;  %4291 = vtanh.f32 %v2989_v51  ;;  %v3019_v37 = vmul.f32 %v5631_v39, %v4288_v56  ;;  %v2790_v51 = vadd.f32 %v5665_v52, %v5549_v48 }
0x1312   :  { %v3213_v14 = vsel %vm3089_vm3, %v3212_v30, %v3211_v0  ;;  %2866 = vadd.xlane.f32.xlu0 %v2865_v61  ;;  %v3058_v61 = vsel %vm2335_vm4, %v3018_v63, 0.0  ;;  %4293 = vtanh.f32 %v2886_v20 }
0x1313   :  { %v3061_v3 = vsel %vm2335_vm4, %v3019_v37, 0.0  ;;  %4295 = vtanh.f32 %v5658_v19 }
0x1314   :  { %4297 = vtanh.f32 %v2790_v51 }
0x1315   :  { %v2469_v31 = vpop.xlane.xlu0 %2468  ;;  %4299 = vtanh.f32 %v5662_v49 }
0x1316   :  { %v2371_v47 = vpop.xlane.xlu2 %2370  ;;  %2572 = vadd.xlane.f32.xlu1 %v2571_v45  ;;  %v3168_v9 = vperm.slane %v2469_v31, %v5476_v11  ;;  %v2381_v45 = vsel %vm2335_vm4, %v2334_v53, 0.0  ;;  %v4290_v50 = vpop.eup %4289 }
0x1317   :  { %v3120_v17 = vperm.slane %v2371_v47, %v5476_v11  ;;  %v2564_v1 = vpop.xlane.xlu1 %2563 }
0x1318   :  { %v3214_v60 = vperm.slane %v2564_v1, %v5457_v42  ;;  %v3169_v15 = vsel %vm3097_vm10, %v3168_v9, %v3167_v29 }
0x1319   :  { %v3121_v44 = vsel %vm3097_vm10, %v3120_v17, %v3119_v54 }
0x131a   :  { %v3215_v32 = vsel %vm3093_vm8, %v3214_v60, %v3213_v14  ;;  %2774 = vadd.xlane.f32.xlu0 %v2773_v7  ;;  %v4292_v7 = vpop.eup %4291 }
0x131d   :  { %v2659_v38 = vpop.xlane.xlu0 %2658 }
0x131e   :  { %v2656_v0 = vpop.xlane.xlu2 %2655  ;;  %2857 = vadd.xlane.f32.xlu1 %v2856_v5  ;;  %v3260_v54 = vperm.slane %v2659_v38, %v5437_v58  ;;  %v3021_v5 = vmul.f32 %v5631_v39, %v4292_v7  ;;  %v4294_v38 = vpop.eup %4293 }
0x131f   :  { %v3259_v22 = vperm.slane %v2656_v0, %v4592_v2  ;;  %v2374_v36 = vpop.xlane.xlu1 %2373  ;;  %v4296_v53 = vpop.eup %4295 }
0x1320   :  { %v3122_v30 = vperm.slane %v2374_v36, %v5528_v6  ;;  %v2918_v36 = vmul.f32 %v5631_v39, %v4294_v38 }
0x1321   :  { %v3261_v29 = vsel %vm3089_vm3, %v3260_v54, %v3259_v22  ;;  %v3067_v22 = vsel %vm2335_vm4, %v3021_v5, 0.0 }
0x1322   :  { %v3123_v14 = vsel %vm3101_vm12, %v3122_v30, %v3121_v44  ;;  %3059 = vadd.xlane.f32.xlu0 %v3058_v61  ;;  %v2627_v44 = vmul.f32 %v5631_v39, %v4290_v50 }
0x1324   :  { %v2669_v21 = vsel %vm2335_vm4, %v2627_v44, 0.0 }
0x1325   :  { %v2567_v31 = vpop.xlane.xlu0 %2566 }
0x1326   :  { %v2472_v27 = vpop.xlane.xlu2 %2471  ;;  %2382 = vadd.xlane.f32.xlu1 %v2381_v45  ;;  %v3216_v47 = vperm.slane %v2567_v31, %v5476_v11  ;;  %v2531_v31 = vmul.f32 %v5631_v39, %v4296_v53 }
0x1327   :  { %v3170_v9 = vperm.slane %v2472_v27, %v5528_v6  ;;  %v2662_v17 = vpop.xlane.xlu1 %2661  ;;  %v4298_v27 = vpop.eup %4297 }
0x1328   :  { %v3262_v1 = vperm.slane %v2662_v17, %v5457_v42  ;;  %v3217_v60 = vsel %vm3097_vm10, %v3216_v47, %v3215_v32  ;;  %v2577_v37 = vsel %vm2335_vm4, %v2531_v31, 0.0  ;;  %v4300_v44 = vpop.eup %4299 }
0x1329   :  { %v3171_v33 = vsel %vm3101_vm12, %v3170_v9, %v3169_v15 }
0x132a   :  { %v3263_v46 = vsel %vm3093_vm8, %v3262_v1, %v3261_v29  ;;  %3062 = vadd.xlane.f32.xlu0 %v3061_v3  ;;  %v2954_v29 = vsel %vm2335_vm4, %v2918_v36, 0.0  ;;  %v2822_v1 = vmul.f32 %v5631_v39, %v4298_v27 }
0x132d   :  { %v2757_v40 = vpop.xlane.xlu0 %2756 }
0x132e   :  { %v2754_v63 = vpop.xlane.xlu2 %2753  ;;  %2670 = vadd.xlane.f32.xlu1 %v2669_v21  ;;  %v3308_v32 = vperm.slane %v2757_v40, %v5437_v58 }
0x132f   :  { %v3307_v15 = vperm.slane %v2754_v63, %v4592_v2  ;;  %v2377_v18 = vpop.xlane.xlu1 %2376  ;;  %v2629_v63 = vmul.f32 %v5631_v39, %v4300_v44 }
0x1330   :  { %v3124_v0 = vperm.slane %v2377_v18, %v5575_v34 }
0x1331   :  { %v3309_v54 = vsel %vm3089_vm3, %v3308_v32, %v3307_v15  ;;  %v2792_v32 = vadd.f32 %v5665_v52, %v5606_v41  ;;  %v2675_v15 = vsel %vm2335_vm4, %v2629_v63, 0.0 }
0x1332   :  { %v3125_v30 = vsel %vm3105_vm14, %v3124_v0, %v3123_v14  ;;  %3068 = vadd.xlane.f32.xlu0 %v3067_v22 }
0x1335   :  { %v2570_v61 = vpop.xlane.xlu0 %2569 }
0x1336   :  { %v2475_v56 = vpop.xlane.xlu2 %2474  ;;  %2955 = vadd.xlane.f32.xlu1 %v2954_v29  ;;  %v3218_v19 = vperm.slane %v2570_v61, %v5528_v6 }
0x1337   :  { %v3172_v20 = vperm.slane %v2475_v56, %v5575_v34  ;;  %v2665_v49 = vpop.xlane.xlu1 %2664 }
0x1338   :  { %v6037_v45 = vsel %vm3101_vm12, %v3218_v19, %v3217_v60  ;;  %v2888_v60 = vadd.f32 %v5671_v13, %v5549_v48  ;;  %v3264_v48 = vperm.slane %v2665_v49, %v5476_v11  ;;  %v2596_v49 = vadd.f32 %v5626_v35, %v5606_v41 }
0x1339   :  { %v3173_v14 = vsel %vm3105_vm14, %v3172_v20, %v3171_v33  ;;  %v2862_v33 = vsel %vm2335_vm4, %v2822_v1, 0.0 }
0x133a   :  { %4301 = vtanh.f32 %v2888_v60 }
0x133b   :  { %4303 = vtanh.f32 %v2792_v32 }
0x133c   :  { %4305 = vtanh.f32 %v5690_v12  ;;  %v6085_v12 = vld [vmem:[%s6284_s5 + $0x5] ss:$0 sm:$0xff] }
0x133d   :  { %v6042_v50 = vpop.xlane.xlu0 %2851  ;;  %4307 = vtanh.f32 %v5700_v16 }
0x133e   :  { %v2760_v47 = vpop.xlane.xlu2 %2759  ;;  %2578 = vadd.xlane.f32.xlu1 %v2577_v37 }
0x133f   :  { %v3310_v9 = vperm.slane %v2760_v47, %v5457_v42 }
0x1340   :  { %v4302_v0 = vpop.eup %4301 }
0x1341   :  { %v3311_v17 = vsel %vm3093_vm8, %v3310_v9, %v3309_v54  ;;  %v2920_v52 = vmul.f32 %v5631_v39, %v4302_v0  ;;  %v4304_v56 = vpop.eup %4303  ;;  %v2887_v0 = vadd.f32 %v5671_v13, %v5517_v10 }
0x1342   :  { %v2824_v31 = vmul.f32 %v5631_v39, %v4304_v56  ;;  %v4306_v27 = vpop.eup %4305 }
0x1343   :  { %v2960_v61 = vsel %vm2335_vm4, %v2920_v52, 0.0  ;;  %v2825_v1 = vmul.f32 %v6085_v12, %v4306_v27  ;;  %v4308_v60 = vpop.eup %4307  ;;  %v2694_v52 = vadd.f32 %v5703_v8, %v5606_v41  ;;  %v2985_v8 = vadd.f32 %v5859_v4, %v5517_v10 }
0x1344   :  { %v2868_v37 = vsel %vm2335_vm4, %v2824_v31, 0.0  ;;  %v2923_v16 = vmul.f32 %v6085_v12, %v4308_v60  ;;  %v2889_v60 = vadd.f32 %v5671_v13, %v5578_v62 }
0x1345   :  { %v2478_v3 = vpop.xlane.xlu0 %2477  ;;  %v2871_v39 = vsel %vm2335_vm4, %v2825_v1, 0.0 }
0x1346   :  { %v2380_v7 = vpop.xlane.xlu2 %2379  ;;  %2863 = vadd.xlane.f32.xlu1 %v2862_v33  ;;  %v3174_v21 = vperm.slane %v2478_v3, %v5620_v26 }
0x1347   :  { %v3126_v40 = vperm.slane %v2380_v7, %v5620_v26  ;;  %v2969_v7 = vsel %vm2335_vm4, %v2923_v16, 0.0 }
0x1348   :  { %v3175_v5 = vsel %vm3109_vm1, %v3174_v21, %v3173_v14 }
0x1349   :  { %v6055_v38 = vsel %vm3109_vm1, %v3126_v40, %v3125_v30  ;;  %v3265_v30 = vsel %vm3097_vm10, %v3264_v48, %v3263_v46  ;;  %v3355_v48 = vperm.slane %v6042_v50, %v4592_v2 }
0x134d   :  { %v2763_v18 = vpop.xlane.xlu0 %2762 }
0x134e   :  { %v2668_v54 = vpop.xlane.xlu2 %2667  ;;  %2676 = vadd.xlane.f32.xlu1 %v2675_v15  ;;  %v3312_v22 = vperm.slane %v2763_v18, %v5476_v11 }
0x134f   :  { %v3266_v36 = vperm.slane %v2668_v54, %v5528_v6 }
0x1350   :  { %v3313_v51 = vsel %vm3097_vm10, %v3312_v22, %v3311_v17 }
0x1351   :  { %v6067_v29 = vsel %vm3101_vm12, %v3266_v36, %v3265_v30 }
0x1355   :  { %v2953_v53 = vpop.xlane.xlu0 %2952 }
0x1356   :  { %v2950_v19 = vpop.xlane.xlu2 %2949  ;;  %2961 = vadd.xlane.f32.xlu1 %v2960_v61  ;;  %v3404_v20 = vperm.slane %v2953_v53, %v5437_v58 }
0x1357   :  { %v3403_v14 = vperm.slane %v2950_v19, %v4592_v2 }
0x1359   :  { %v6075_v46 = vsel %vm3089_vm3, %v3404_v20, %v3403_v14 }
0x135d   :  { %v2576_v30 = vpop.xlane.xlu0 %2575 }
0x135e   :  { %v2481_v47 = vpop.xlane.xlu2 %2480  ;;  %2869 = vadd.xlane.f32.xlu1 %v2868_v37  ;;  %v3222_v56 = vperm.slane %v2576_v30, %v5620_v26 }
0x135f   :  { %v3176_v9 = vperm.slane %v2481_v47, %v5727_v55 }
0x1361   :  { %v3177_v17 = vsel %vm3113_vm2, %v3176_v9, %v3175_v5 }
0x1366   :  { %v2766_v33 = vpop.xlane.xlu2 %2765  ;;  %2872 = vadd.xlane.f32.xlu1 %v2871_v39 }
0x1367   :  { %v3314_v3 = vperm.slane %v2766_v33, %v5528_v6 }
0x1369   :  { %v6091_v44 = vsel %vm3101_vm12, %v3314_v3, %v3313_v51 }
0x136e   :  { %2970 = vadd.xlane.f32.xlu1 %v2969_v7 }
0x1379   :  { %v6095_v21 = vpop.xlane.xlu1 %3486 }
0x137a   :  { %v3491_v40 = vsub.f32 %v5953_v28, %v6095_v21 }
0x137c   :  { %v3493_v5 = vmul.f32 1.442695, %v3491_v40  ;;  %v2890_v40 = vadd.f32 %v5671_v13, %v5606_v41 }
0x137e   :  { %4309 = vpow2.f32 %v3493_v5 }
0x137f   :  { %4311 = vtanh.f32 %v2596_v49 }
0x1380   :  { %4313 = vtanh.f32 %v2887_v0 }
0x1381   :  { %v2855_v63 = vpop.xlane.xlu1 %2854  ;;  %4315 = vtanh.f32 %v2694_v52  ;;  %v82_v52 = vld [vmem:[#allocation2 + $0xa0] sm:$0xff] }
0x1382   :  { %v3356_v32 = vperm.slane %v2855_v63, %v5437_v58  ;;  %4317 = vtanh.f32 %v2985_v8 }
0x1383   :  { %4319 = vtanh.f32 %v2889_v60 }
0x1384   :  { %v6104_v15 = vpop.eup %4309  ;;  %v3357_v18 = vsel %vm3089_vm3, %v3356_v32, %v3355_v48  ;;  %4321 = vtanh.f32 %v2890_v40 }
0x1385   :  { %v3497_v54 = vsel %vm2335_vm4, %v6104_v15, 0.0  ;;  %v4312_v22 = vpop.eup %4311 }
0x1386   :  { %3498 = vadd.xlane.f32.xlu2 %v3497_v54  ;;  %v2628_v36 = vmul.f32 %v6085_v12, %v4312_v22  ;;  %v4314_v53 = vpop.eup %4313 }
0x1387   :  { %v2919_v20 = vmul.f32 %v6085_v12, %v4314_v53  ;;  %v4316_v27 = vpop.eup %4315 }
0x1388   :  { %v2672_v61 = vsel %vm2335_vm4, %v2628_v36, 0.0  ;;  %v2726_v9 = vmul.f32 %v6085_v12, %v4316_v27  ;;  %v4318_v3 = vpop.eup %4317  ;;  %v2861_v36 = vpop.xlane.xlu0 %2860 }
0x1389   :  { %v2573_v35 = vpop.xlane.xlu1 %2572  ;;  %v3017_v7 = vmul.f32 %v6085_v12, %v4318_v3  ;;  %v4320_v49 = vpop.eup %4319 }
0x138a   :  { %v3220_v50 = vperm.slane %v2573_v35, %v5575_v34  ;;  %v2770_v10 = vsel %vm2335_vm4, %v2726_v9, 0.0  ;;  %v2921_v62 = vmul.f32 %v6085_v12, %v4320_v49  ;;  %v4322_v48 = vpop.eup %4321 }
0x138b   :  { %v3055_v5 = vsel %vm2335_vm4, %v3017_v7, 0.0  ;;  %v2922_v13 = vmul.f32 %v6085_v12, %v4322_v48 }
0x138c   :  { %v3221_v51 = vsel %vm3105_vm14, %v3220_v50, %v6037_v45  ;;  %v2957_v45 = vsel %vm2335_vm4, %v2919_v20, 0.0  ;;  %v2963_v63 = vsel %vm2335_vm4, %v2921_v62, 0.0  ;;  %v80_v20 = vld [vmem:[#allocation2 + $0x30] sm:$0xff] }
0x138d   :  { %v3223_v14 = vsel %vm3109_vm1, %v3222_v56, %v3221_v51  ;;  %v2966_v22 = vsel %vm2335_vm4, %v2922_v13, 0.0  ;;  %v83_v51 = vld [vmem:[#allocation2 + $0xd8] sm:$0xff] }
0x138e   :  { %2673 = vadd.xlane.f32.xlu2 %v2672_v61  ;;  %3597 = vmatpush.msrb.mxu2 %v83_v51  ;;  %v6155_v61 = vpop.xlane.xlu2 %3047 }
0x1390   :  { %v6153_v30 = vpop.xlane.xlu0 %3050  ;;  %3598 = vmatpush.msrb.mxu2 %v82_v52 }
0x1391   :  { %v2858_v19 = vpop.xlane.xlu1 %2857 }
0x1392   :  { %v3358_v31 = vperm.slane %v2858_v19, %v5457_v42  ;;  %v81_v19 = vld [vmem:[#allocation2 + $0x68] sm:$0xff] }
0x1393   :  { %3599 = vmatpush.msrb.mxu2 %v81_v19 }
0x1394   :  { %v6123_v37 = vsel %vm3093_vm8, %v3358_v31, %v3357_v18 }
0x1395   :  { %3600 = vmatpush.msrb.mxu2 %v80_v20 }
0x1396   :  { %2958 = vadd.xlane.f32.xlu2 %v2957_v45 }
0x1398   :  { %v2769_v56 = vpop.xlane.xlu0 %2768 }
0x1399   :  { %v2383_v47 = vpop.xlane.xlu1 %2382 }
0x139a   :  { %v3128_v1 = vperm.slane %v2383_v47, %v5727_v55 }
0x139c   :  { %v3129_v39 = vsel %vm3113_vm2, %v3128_v1, %v6055_v38 }
0x139d   :  { %v3469_v33 = vsel %vm608_vm5, %v3129_v39, %v3177_v17  ;;  %v2988_v17 = vadd.f32 %v5859_v4, %v5606_v41 }
0x139e   :  { %2771 = vadd.xlane.f32.xlu2 %v2770_v10 }
0x139f   :  { %4323 = vtanh.f32 %v2988_v17 }
0x13a0   :  { %v6159_v8 = vpop.xlane.xlu0 %3053 }
0x13a1   :  { %v2671_v16 = vpop.xlane.xlu1 %2670 }
0x13a2   :  { %v3268_v45 = vperm.slane %v2671_v16, %v5575_v34 }
0x13a4   :  { %v3269_v39 = vsel %vm3105_vm14, %v3268_v45, %v6067_v29 }
0x13a5   :  { %v4324_v35 = vpop.eup %4323 }
0x13a6   :  { %3056 = vadd.xlane.f32.xlu2 %v3055_v5  ;;  %v3020_v41 = vmul.f32 %v6085_v12, %v4324_v35 }
0x13a8   :  { %v3064_v4 = vsel %vm2335_vm4, %v3020_v41, 0.0  ;;  %v2867_v49 = vpop.xlane.xlu0 %2866 }
0x13a9   :  { %v6140_v38 = vpop.xlane.xlu1 %2955  ;;  %v3364_v52 = vperm.slane %v2867_v49, %v5575_v34 }
0x13ae   :  { %2964 = vadd.xlane.f32.xlu2 %v2963_v63 }
0x13b0   :  { %v2775_v35 = vpop.xlane.xlu0 %2774 }
0x13b1   :  { %v2579_v32 = vpop.xlane.xlu1 %2578 }
0x13b2   :  { %v3224_v18 = vperm.slane %v2579_v32, %v5727_v55 }
0x13b4   :  { %v3225_v0 = vsel %vm3113_vm2, %v3224_v18, %v3223_v14 }
0x13b5   :  { %v3471_v54 = vsel %vm2106_vm15, %v3469_v33, %v3225_v0  ;;  %v3360_v0 = vperm.slane %v2861_v36, %v5476_v11 }
0x13b6   :  { %2967 = vadd.xlane.f32.xlu2 %v2966_v22 }
0x13b7   :  { %v3361_v41 = vsel %vm3097_vm10, %v3360_v0, %v6123_v37 }
0x13b9   :  { %v2864_v50 = vpop.xlane.xlu1 %2863 }
0x13ba   :  { %v3362_v18 = vperm.slane %v2864_v50, %v5528_v6 }
0x13be   :  { %3065 = vadd.xlane.f32.xlu2 %v3064_v4  ;;  %v3363_v4 = vsel %vm3101_vm12, %v3362_v18, %v3361_v41 }
0x13bf   :  { %v3365_v19 = vsel %vm3105_vm14, %v3364_v52, %v3363_v4 }
0x13c1   :  { %v2677_v53 = vpop.xlane.xlu1 %2676 }
0x13c2   :  { %v3272_v60 = vperm.slane %v2677_v53, %v5727_v55 }
0x13c9   :  { %v6157_v31 = vpop.xlane.xlu1 %2961 }
0x13d1   :  { %v2870_v7 = vpop.xlane.xlu1 %2869 }
0x13d2   :  { %v3366_v51 = vperm.slane %v2870_v7, %v5620_v26  ;;  %v3452_v7 = vperm.slane %v6153_v30, %v5437_v58 }
0x13d4   :  { %v3367_v20 = vsel %vm3109_vm1, %v3366_v51, %v3365_v19 }
0x13d9   :  { %v2873_v22 = vpop.xlane.xlu1 %2872 }
0x13da   :  { %v3368_v50 = vperm.slane %v2873_v22, %v5727_v55 }
0x13dc   :  { %v3369_v45 = vsel %vm3113_vm2, %v3368_v50, %v3367_v20 }
0x13e1   :  { %v2971_v49 = vpop.xlane.xlu1 %2970 }
0x13e2   :  { %v3416_v30 = vperm.slane %v2971_v49, %v5727_v55 }
0x13f9   :  { %v3499_v14 = vpop.xlane.xlu2 %3498 }
0x13fa   :  { %4325 = vrcp.f32 %v3499_v14  ;;  %v3514_v10 = vand.u32 2147483648, %v3499_v14  ;;  %v3512_v5 = vand.u32 2147483647, %v3499_v14  ;;  %vm3508_vm15 = vweird.f32 %v3499_v14 }
0x13fc   :  { %v3515_v63 = vor.u32 1.1754944e-38, %v3514_v10  ;;  %vm3513_vm11 = vcmp.eq.f32.partialorder %v3512_v5, 8.507059e+37 }
0x1400   :  { %v4326_v27 = vpop.eup %4325 }
0x1401   :  { %v3504_v47 = vmul.f32 %v4326_v27, %v3499_v14  ;;  %v2674_v9 = vpop.xlane.xlu2 %2673  ;;  %vm3509_vm5 = vweird.f32 %v4326_v27 }
0x1402   :  { %v3270_v1 = vperm.slane %v2674_v9, %v5620_v26  ;;  %vm3510_vm6 = vmor %vm3508_vm15, %vm3509_vm5  ;;  %v3060_v9 = vpop.xlane.xlu0 %3059 }
0x1403   :  { %v3505_v33 = vsub.f32 1.0, %v3504_v47 }
0x1404   :  { %v3271_v3 = vsel %vm3109_vm1, %v3270_v1, %v3269_v39  ;;  %v3406_v39 = vperm.slane %v6140_v38, %v5457_v42  ;;  %v3410_v38 = vperm.slane %v6157_v31, %v5528_v6 }
0x1405   :  { %v3506_v40 = vmul.f32 %v4326_v27, %v3505_v33  ;;  %v3273_v16 = vsel %vm3113_vm2, %v3272_v60, %v3271_v3  ;;  %v3451_v3 = vperm.slane %v6155_v61, %v4592_v2 }
0x1406   :  { %v3473_v62 = vsel %vm2109_vm7, %v3471_v54, %v3273_v16  ;;  %v3316_v54 = vperm.slane %v2769_v56, %v5575_v34  ;;  %v3320_v56 = vperm.slane %v2775_v35, %v5727_v55  ;;  %v3407_v10 = vsel %vm3093_vm8, %v3406_v39, %v6075_v46 }
0x1407   :  { %v3507_v17 = vadd.f32 %v4326_v27, %v3506_v40  ;;  %v3454_v16 = vperm.slane %v6159_v8, %v5457_v42  ;;  %v3453_v58 = vsel %vm3089_vm3, %v3452_v7, %v3451_v3  ;;  %vm6293_vm7 = vcmask 1045504  }
0x1408   :  { %v3317_v36 = vsel %vm3105_vm14, %v3316_v54, %v6091_v44 }
0x1409   :  { %v3511_v29 = vsel %vm3510_vm6, %v4326_v27, %v3507_v17  ;;  %v2959_v48 = vpop.xlane.xlu2 %2958 }
0x140a   :  { %v3516_v32 = vsel %vm3513_vm11, %v3515_v63, %v3511_v29  ;;  %v3408_v60 = vperm.slane %v2959_v48, %v5476_v11  ;;  %v3063_v33 = vpop.xlane.xlu0 %3062  ;;  %v3455_v29 = vsel %vm3093_vm8, %v3454_v16, %v3453_v58 }
0x140b   :  { %v6170_v13 = vmul.f32 %v6104_v15, %v3516_v32  ;;  %v3460_v0 = vperm.slane %v3063_v33, %v5575_v34 }
0x140c   :  { %v3409_v40 = vsel %vm3097_vm10, %v3408_v60, %v3407_v10 }
0x140d   :  { %3835 = vmatmul.msk.f32.vlgmr.msra.gmra.mxu2 %vm2335_vm4, %v6170_v13  ;;  %v3411_v17 = vsel %vm3101_vm12, %v3410_v38, %v3409_v40 }
0x1411   :  { %v2772_v15 = vpop.xlane.xlu2 %2771 }
0x1412   :  { %v3318_v53 = vperm.slane %v2772_v15, %v5620_v26  ;;  %v3069_v32 = vpop.xlane.xlu0 %3068 }
0x1413   :  { %v3464_v35 = vperm.slane %v3069_v32, %v5727_v55  ;;  %v68_v32 = vld [vmem:[#allocation2 + $0x18] sm:$0xff] }
0x1414   :  { %v3319_v37 = vsel %vm3109_vm1, %v3318_v53, %v3317_v36 }
0x1415   :  { %v3321_v14 = vsel %vm3113_vm2, %v3320_v56, %v3319_v37  ;;  %3837 = vmatmul.msk.f32.vlgmr.msrb.gmra.mxu2 %vm155_vm0, %v5175_v57 }
0x1416   :  { %v3475_v27 = vsel %vm2112_vm13, %v3473_v62, %v3321_v14  ;;  %vm6294_vm13 = vcmask 1046528  }
0x1417   :  { %v3477_v47 = vsel %vm2115_vm9, %v3475_v27, %v3369_v45  ;;  %vm6295_vm9 = vcmp.lt.s32.totalorder %v4592_v2, 49 }
0x1419   :  { %v3057_v44 = vpop.xlane.xlu2 %3056 }
0x141a   :  { %v3456_v62 = vperm.slane %v3057_v44, %v5476_v11  ;;  %v3458_v11 = vperm.slane %v3060_v9, %v5528_v6 }
0x141c   :  { %v3457_v31 = vsel %vm3097_vm10, %v3456_v62, %v3455_v29 }
0x141d   :  { %3838 = vmatmul.msk.f32.gmra.mxu2 %vm155_vm0, %v5184_v43  ;;  %v3459_v18 = vsel %vm3101_vm12, %v3458_v11, %v3457_v31  ;;  %v70_v11 = vld [vmem:[#allocation2 + $0x88] sm:$0xff] }
0x141e   :  { %v3461_v41 = vsel %vm3105_vm14, %v3460_v0, %v3459_v18 }
0x1421   :  { %v2965_v1 = vpop.xlane.xlu2 %2964 }
0x1422   :  { %v3412_v5 = vperm.slane %v2965_v1, %v5575_v34 }
0x1424   :  { %v3413_v63 = vsel %vm3105_vm14, %v3412_v5, %v3411_v17 }
0x1429   :  { %v2968_v46 = vpop.xlane.xlu2 %2967 }
0x142a   :  { %v3414_v61 = vperm.slane %v2968_v46, %v5620_v26 }
0x142c   :  { %v3415_v42 = vsel %vm3109_vm1, %v3414_v61, %v3413_v63 }
0x142d   :  { %v3417_v8 = vsel %vm3113_vm2, %v3416_v30, %v3415_v42 }
0x142e   :  { %v3479_v48 = vsel %vm6293_vm7, %v3477_v47, %v3417_v8  ;;  %v71_v8 = vld [vmem:[#allocation2 + $0xc0] sm:$0xff]  ;;  %vm6296_vm7 = vmmov %vm6295_vm9 }
0x142f   :  { %3703 = vmatpush.msra.mxu0 %v71_v8 }
0x1431   :  { %v3066_v54 = vpop.xlane.xlu2 %3065  ;;  %3704 = vmatpush.msra.mxu0 %v70_v11 }
0x1432   :  { %v3462_v22 = vperm.slane %v3066_v54, %v5620_v26 }
0x1434   :  { %v3463_v4 = vsel %vm3109_vm1, %v3462_v22, %v3461_v41 }
0x1435   :  { %v3465_v51 = vsel %vm3113_vm2, %v3464_v35, %v3463_v4  ;;  %vm3714_vm2 = vcmp.eq.s32.totalorder %v4592_v2, 49 }
0x1436   :  { %v3481_v6 = vsel %vm6294_vm13, %v3479_v48, %v3465_v51  ;;  %v69_v48 = vld [vmem:[#allocation2 + $0x50] sm:$0xff] }
0x1437   :  { %v3484_v15 = vsel %vm6295_vm9, %v3481_v6, -1e+30  ;;  %3705 = vmatpush.msra.mxu0 %v69_v48 }
0x1438   :  { %v3488_v52 = vsel %vm2335_vm4, %v3484_v15, -inf }
0x1439   :  { %3489 = vmax.xlane.f32.xlu1 %v3488_v52  ;;  %3706 = vmatpush.msra.mxu0 %v68_v32 }
0x1490   :  { %v6236_v34 = vpop.f32.mrf.mxu2 }
0x1498   :  { %v3602_v50 = vpop.f32.mrf.mxu2 }
0x1499   :  { %v3608_v26 = vadd.f32 %v3602_v50, %v5201_v24 }
0x149b   :  { %4327 = vtanh.f32 %v3608_v26 }
0x14a0   :  { %v3605_v55 = vpop.f32.mrf.mxu2 }
0x14a1   :  { %v4328_v53 = vpop.eup %4327  ;;  %v3609_v36 = vadd.f32 %v3605_v55, %v5511_v59 }
0x14a2   :  { %v3612_v56 = vmul.f32 %v6085_v12, %v4328_v53 }
0x14a3   :  { %4329 = vtanh.f32 %v3609_v36 }
0x14a4   :  { %v3614_v19 = vsel %vm2335_vm4, %v3612_v56, 0.0 }
0x14a5   :  { %3615 = vadd.xlane.f32.xlu0 %v3614_v19 }
0x14a9   :  { %v4330_v37 = vpop.eup %4329 }
0x14aa   :  { %v3613_v20 = vmul.f32 %v6085_v12, %v4330_v37 }
0x14ac   :  { %v3490_v14 = vpop.xlane.xlu1 %3489  ;;  %v3617_v45 = vsel %vm2335_vm4, %v3613_v20, 0.0 }
0x14ad   :  { %v3492_v27 = vsub.f32 %v3484_v15, %v3490_v14  ;;  %3618 = vadd.xlane.f32.xlu1 %v3617_v45 }
0x14af   :  { %v3495_v24 = vmul.f32 1.442695, %v3492_v27 }
0x14b1   :  { %4331 = vpow2.f32 %v3495_v24 }
0x14b7   :  { %v4332_v47 = vpop.eup %4331 }
0x14b8   :  { %v3500_v44 = vsel %vm2335_vm4, %v4332_v47, 0.0 }
0x14b9   :  { %3501 = vadd.xlane.f32.xlu2 %v3500_v44 }
0x1518   :  { %v3616_v59 = vpop.xlane.xlu0 %3615 }
0x1519   :  { %v3620_v9 = vmax.f32 %v6095_v21, %v3616_v59 }
0x151b   :  { %v3628_v1 = vsub.f32 %v5953_v28, %v3620_v9  ;;  %v3622_v42 = vsub.f32 %v3616_v59, %v3620_v9 }
0x151d   :  { %v3630_v39 = vmul.f32 1.442695, %v3628_v1  ;;  %v3624_v31 = vmul.f32 1.442695, %v3622_v42 }
0x151f   :  { %4333 = vpow2.f32 %v3630_v39 }
0x1520   :  { %v3619_v60 = vpop.xlane.xlu1 %3618 }
0x1521   :  { %v3621_v12 = vmax.f32 %v3490_v14, %v3619_v60 }
0x1523   :  { %v3623_v33 = vsub.f32 %v3619_v60, %v3621_v12  ;;  %v3629_v10 = vsub.f32 %v3484_v15, %v3621_v12 }
0x1525   :  { %v3632_v3 = vmul.f32 1.442695, %v3629_v10  ;;  %v4334_v7 = vpop.eup %4333  ;;  %v3626_v18 = vmul.f32 1.442695, %v3623_v33 }
0x1526   :  { %v3634_v40 = vsel %vm2335_vm4, %v4334_v7, 0.0 }
0x1527   :  { %4335 = vpow2.f32 %v3632_v3  ;;  %3635 = vadd.xlane.f32.xlu2 %v3634_v40 }
0x152c   :  { %v3502_v5 = vpop.xlane.xlu2 %3501 }
0x152d   :  { %4337 = vrcp.f32 %v3502_v5  ;;  %v4336_v16 = vpop.eup %4335  ;;  %v3529_v62 = vand.u32 2147483648, %v3502_v5  ;;  %v3527_v17 = vand.u32 2147483647, %v3502_v5  ;;  %vm3523_vm11 = vweird.f32 %v3502_v5 }
0x152e   :  { %v3637_v38 = vsel %vm2335_vm4, %v4336_v16, 0.0  ;;  %4339 = vpow2.f32 %v3624_v31 }
0x152f   :  { %3638 = vadd.xlane.f32.xlu0 %v3637_v38  ;;  %v3530_v58 = vor.u32 1.1754944e-38, %v3529_v62  ;;  %vm3528_vm8 = vcmp.eq.f32.partialorder %v3527_v17, 8.507059e+37  ;;  %4341 = vpow2.f32 %v3626_v18 }
0x1533   :  { %v4338_v21 = vpop.eup %4337 }
0x1534   :  { %v3519_v28 = vmul.f32 %v4338_v21, %v3502_v5  ;;  %vm3524_vm6 = vweird.f32 %v4338_v21  ;;  %v4340_v0 = vpop.eup %4339 }
0x1535   :  { %vm3525_vm3 = vmor %vm3523_vm11, %vm3524_vm6  ;;  %v4342_v35 = vpop.eup %4341 }
0x1536   :  { %v3520_v49 = vsub.f32 1.0, %v3519_v28  ;;  %vm6297_vm6 = vmmov %vm6296_vm7 }
0x1538   :  { %v3521_v46 = vmul.f32 %v4338_v21, %v3520_v49  ;;  %v3874_v49 = vld [vmem:[%s6284_s5 + $0x2] ss:$0 sm:$0xff] }
0x153a   :  { %v3522_v61 = vadd.f32 %v4338_v21, %v3521_v46 }
0x153c   :  { %v3526_v30 = vsel %vm3525_vm3, %v4338_v21, %v3522_v61 }
0x153d   :  { %v3531_v63 = vsel %vm3528_vm8, %v3530_v58, %v3526_v30 }
0x153e   :  { %v6249_v29 = vmul.f32 %v4332_v47, %v3531_v63 }
0x1540   :  { %3836 = vmatmul.msk.f32.vlgmr.msrb.gmra.mxu0 %vm2335_vm4, %v6249_v29 }
0x159a   :  { %v3636_v54 = vpop.xlane.xlu2 %3635 }
0x159b   :  { %v3640_v22 = vadd.f32 %v4340_v0, %v3636_v54 }
0x159d   :  { %4343 = vrcp.f32 %v3640_v22  ;;  %v3653_v52 = vand.u32 2147483648, %v3640_v22  ;;  %v3651_v26 = vand.u32 2147483647, %v3640_v22  ;;  %vm3647_vm12 = vweird.f32 %v3640_v22 }
0x159f   :  { %v3654_v36 = vor.u32 1.1754944e-38, %v3653_v52  ;;  %vm3652_vm1 = vcmp.eq.f32.partialorder %v3651_v26, 8.507059e+37 }
0x15a2   :  { %v3639_v41 = vpop.xlane.xlu0 %3638 }
0x15a3   :  { %v4344_v4 = vpop.eup %4343  ;;  %v3641_v51 = vadd.f32 %v4342_v35, %v3639_v41 }
0x15a4   :  { %v3643_v6 = vmul.f32 %v4344_v4, %v3640_v22  ;;  %vm3648_vm10 = vweird.f32 %v4344_v4 }
0x15a5   :  { %4345 = vrcp.f32 %v3641_v51  ;;  %vm3649_vm14 = vmor %vm3647_vm12, %vm3648_vm10  ;;  %v3666_v45 = vand.u32 2147483647, %v3641_v51  ;;  %v3668_v27 = vand.u32 2147483648, %v3641_v51  ;;  %vm3662_vm15 = vweird.f32 %v3641_v51 }
0x15a6   :  { %v3644_v15 = vsub.f32 1.0, %v3643_v6 }
0x15a7   :  { %v3669_v12 = vor.u32 1.1754944e-38, %v3668_v27  ;;  %vm3667_vm9 = vcmp.eq.f32.partialorder %v3666_v45, 8.507059e+37 }
0x15a8   :  { %v3645_v50 = vmul.f32 %v4344_v4, %v3644_v15 }
0x15aa   :  { %v3646_v55 = vadd.f32 %v4344_v4, %v3645_v50 }
0x15ab   :  { %v4346_v53 = vpop.eup %4345 }
0x15ac   :  { %v3650_v56 = vsel %vm3649_vm14, %v4344_v4, %v3646_v55  ;;  %v3658_v19 = vmul.f32 %v4346_v53, %v3641_v51  ;;  %vm3663_vm5 = vweird.f32 %v4346_v53 }
0x15ad   :  { %v3655_v37 = vsel %vm3652_vm1, %v3654_v36, %v3650_v56  ;;  %vm3664_vm13 = vmor %vm3662_vm15, %vm3663_vm5 }
0x15ae   :  { %v3656_v20 = vmul.f32 %v4340_v0, %v3655_v37  ;;  %v3659_v14 = vsub.f32 1.0, %v3658_v19 }
0x15b0   :  { %v3660_v24 = vmul.f32 %v4346_v53, %v3659_v14  ;;  %v3674_v47 = vsub.f32 1.0, %v3656_v20  ;;  %v3715_v44 = vsel %vm3714_vm2, %v3656_v20, 0.0  ;;  %v3672_v9 = vmul.f32 %v3656_v20, %v5175_v57 }
0x15b1   :  { %v3717_v59 = vsel %vm6296_vm7, %v6170_v13, %v3715_v44 }
0x15b2   :  { %v3676_v1 = vmul.f32 %v3674_v47, %v6236_v34  ;;  %v3661_v39 = vadd.f32 %v4346_v53, %v3660_v24  ;;  %v3719_v60 = vsel %vm2335_vm4, %v3717_v59, 0.0 }
0x15b3   :  { %3722 = vst [vmem:[#allocation7 + $0x8] sm:$0xff] %v3719_v60 }
0x15b4   :  { %v3678_v33 = vadd.f32 %v3676_v1, %v3672_v9  ;;  %v3665_v10 = vsel %vm3664_vm13, %v4346_v53, %v3661_v39 }
0x15b5   :  { %v3670_v3 = vsel %vm3667_vm9, %v3669_v12, %v3665_v10 }
0x15b6   :  { %v3682_v7 = vadd.f32 %v3678_v33, %v5189_v25  ;;  %v3671_v40 = vmul.f32 %v4342_v35, %v3670_v3 }
0x15b8   :  { %3839 = vmatmul.msk.f32.vlgmr.msra.gmra.mxu0 %vm155_vm0, %v3682_v7  ;;  %v3716_v57 = vsel %vm3714_vm2, %v3671_v40, 0.0  ;;  %v3675_v5 = vsub.f32 1.0, %v3671_v40  ;;  %v3673_v38 = vmul.f32 %v3671_v40, %v5184_v43 }
0x15b9   :  { %v3718_v13 = vsel %vm6297_vm6, %v6249_v29, %v3716_v57 }
0x15ba   :  { %v3720_v34 = vsel %vm2335_vm4, %v3718_v13, 0.0 }
0x15bb   :  { %3724 = vst [vmem:[#allocation7 + $0x18] sm:$0xff] %v3720_v34 }
0x15bd   :  { %v3576_v16 = vpop.f32.mrf.mxu0 }
0x15be   :  { %v3677_v21 = vmul.f32 %v3675_v5, %v3576_v16 }
0x15c0   :  { %v3679_v28 = vadd.f32 %v3677_v21, %v3673_v38 }
0x15c2   :  { %v3683_v25 = vadd.f32 %v3679_v28, %v5195_v23 }
0x15c4   :  { %3840 = vmatmul.msk.f32.gmra.mxu0 %vm155_vm0, %v3683_v25 }
0x1635   :  { %v3708_v62 = vpop.f32.mrf.mxu0 }
0x1636   :  { %v3709_v2 = vadd.f32 %v3874_v49, %v3708_v62 }
0x1638   :  { %3721 = vst [vmem:[#allocation7] sm:$0xff] %v3709_v2 }
0x1641   :  { %v3711_v43 = vpop.f32.mrf.mxu0 }
0x1642   :  { %v3712_v46 = vadd.f32 %v3874_v49, %v3711_v43 }
0x1644   :  { %3723 = vst [vmem:[#allocation7 + $0x10] sm:$0xff] %v3712_v46 }
0x1645   :  { %3737 = dma.vmem_to_hbm [thread:$0]  %s3730_s16, 512, %s3732_s19, [#allocation4], %s4449_s20, %s4449_s20, %s4450_s0  }
0x1646   :  { %4434 = dma.done.wait [#allocation4], 512  }
0x1647   :  { %4435 = vsyncadd [#allocation4], 4294966784 }
0x1648   :  { %3742 = vsyncpa [#allocation3], 1 }
0x1649   :  { %3743 = vsyncpa [#allocation6], 1 }
0x164a   :  { %3744 = vsyncpa [#allocation4], 1 }

</bundles_post_ra>
